<compile_context>
chip_gen: v7x
topology: tpu7x:2x2x1
jax: 0.10.0
libtpu: 0.0.40
codegen_flags: <defaults>
</compile_context>

<pallas_src>
import functools

import jax
import jax.numpy as jnp
import numpy as np
from jax.experimental import pallas as pl
from jax.experimental.pallas import tpu as pltpu

jax.config.update("jax_default_matmul_precision", "highest")

INPUT_NUM = 16                       # input_num
OUTPUT_NUM = 32                      # output_num
HIDDEN_NUM = 2                       # hidden_num
BATCH = 12                           # test batch (not a multiple of 8/TM)
EPS = 1e-5                           # nn.LayerNorm default eps
FUSED = 2 * OUTPUT_NUM               # left|right concatenated on the lane axis (64)
IN_TOTAL = INPUT_NUM + OUTPUT_NUM    # packed x0|x1 width (48)
STAGE1 = 2 * FUSED                   # first-stage fused width hx|hh (128)

# ---- slab A layout (lane width STAGE1 = 128) -------------------------------
_A_WIN = 0                           # (48, 128) block-diag [[Wx_f 0];[0 Wh_f]]
_A_MAVG = _A_WIN + IN_TOTAL          # (128, 128) segmented averaging matrix
_A_B = _A_MAVG + STAGE1              # bias   [bx_L bx_R bh_L bh_R]
_A_G = _A_B + 1                      # gamma
_A_BETA = _A_G + 1                   # beta
_A_ROWS = _A_BETA + 1                # 179

# ---- slab B layout (lane width FUSED = 64) ---------------------------------
_B_FOLD = 0                          # (128, 64) [[I64];[I64]]  -> LN(hx)+LN(hh)
_B_WHID = _B_FOLD + STAGE1           # HIDDEN_NUM x (64, 64) block-diag weights
_B_WOUT = _B_WHID + HIDDEN_NUM * FUSED
_B_MAVG = _B_WOUT + FUSED            # (64, 64) segmented averaging matrix
_B_VEC = _B_MAVG + FUSED             # 3*(HIDDEN_NUM+1) rows: (b, gamma, beta) each
_B_ROWS = _B_VEC + 3 * (HIDDEN_NUM + 1)


def _round_up(x, m):
    return ((x + m - 1) // m) * m


def _cdiv(a, b):
    return (a + b - 1) // b


def _dotf(a, b):
    return jnp.dot(a, b, preferred_element_type=jnp.float32,
                   precision=jax.lax.Precision.HIGHEST)


# --------------------------------------------------------------------------
# Kernel
# --------------------------------------------------------------------------
def cross_unit_kernel(x_ref, wa_ref, wb_ref, out_ref):
    x = x_ref[...]                                        # (TM, 48) = x0|x1

    w_in = wa_ref[_A_WIN:_A_WIN + IN_TOTAL, :]            # (48, 128)
    mavg128 = wa_ref[_A_MAVG:_A_MAVG + STAGE1, :]         # (128, 128)
    b128 = wa_ref[_A_B:_A_B + 1, :]
    g128 = wa_ref[_A_G:_A_G + 1, :]
    beta128 = wa_ref[_A_BETA:_A_BETA + 1, :]

    fold = wb_ref[_B_FOLD:_B_FOLD + STAGE1, :]            # (128, 64)
    mavg64 = wb_ref[_B_MAVG:_B_MAVG + FUSED, :]           # (64, 64)

    def seg_layernorm(h, mavg, gamma, beta):
        # Segmented (per 32-lane block) LayerNorm with statistics on the MXU:
        # mu broadcast within each segment via the block-diag averaging matrix;
        # variance in centered form for accuracy.
        mu = _dotf(h, mavg)
        xc = h - mu
        var = _dotf(xc * xc, mavg)
        return xc * jax.lax.rsqrt(var + EPS) * gamma + beta

    # stage 1: both input projections of both units as one (TM,128) matmul
    #   lanes [0:32]=hx_left [32:64]=hx_right [64:96]=hh_left [96:128]=hh_right
    h = _dotf(x, w_in) + b128
    h = seg_layernorm(h, mavg128, g128, beta128)
    # residual = LN(fc_in_x(X0)) + LN(fc_in_h(X1)) via the [[I];[I]] fold matmul
    residual = _dotf(h, fold)                             # (TM, 64)
    output = jax.nn.sigmoid(residual)

    # hidden layers (block-diagonal fused weights; static unroll)
    for i in range(HIDDEN_NUM):
        wrow = _B_WHID + i * FUSED
        vrow = _B_VEC + 3 * i
        hh = _dotf(output, wb_ref[wrow:wrow + FUSED, :]) + wb_ref[vrow:vrow + 1, :]
        hh = seg_layernorm(hh, mavg64,
                           wb_ref[vrow + 1:vrow + 2, :],
                           wb_ref[vrow + 2:vrow + 3, :])
        residual = residual + hh
        output = jax.nn.sigmoid(residual)

    # output layer, then left - right
    vrow = _B_VEC + 3 * HIDDEN_NUM
    hh = _dotf(output, wb_ref[_B_WOUT:_B_WOUT + FUSED, :]) + wb_ref[vrow:vrow + 1, :]
    hh = seg_layernorm(hh, mavg64,
                       wb_ref[vrow + 1:vrow + 2, :],
                       wb_ref[vrow + 2:vrow + 3, :])
    fused_out = jax.nn.sigmoid(residual + hh)
    out_ref[...] = fused_out[:, :OUTPUT_NUM] - fused_out[:, OUTPUT_NUM:]


# --------------------------------------------------------------------------
# Wrapper
# --------------------------------------------------------------------------
def _hw_budget():
    """(batch-tile cap, vmem_limit_bytes) chosen from the chip's VMEM size."""
    try:
        info = pltpu.get_tpu_info()
        vmem = int(getattr(info, "vmem_capacity_bytes", 64 * 1024 * 1024))
    except Exception:
        vmem = 64 * 1024 * 1024
    if vmem >= 100 * 1024 * 1024:                 # v5e / v6e: 128 MiB VMEM
        return 8192, 96 * 1024 * 1024
    return 4096, 48 * 1024 * 1024                  # v7x: 64 MiB VMEM per TC


@functools.partial(jax.jit, static_argnums=(4, 5))
def _cross_unit_impl(x0, x1, w_in_slab, w_rest_slab, tm, vmem_limit):
    B = x0.shape[0]
    x01 = jnp.concatenate([x0, x1], axis=1)        # (B, 48) packed input
    grid = (_cdiv(B, tm),)                         # partial final tile allowed
    return pl.pallas_call(
        cross_unit_kernel,
        out_shape=jax.ShapeDtypeStruct((B, OUTPUT_NUM), jnp.float32),
        grid=grid,
        in_specs=[
            pl.BlockSpec((tm, IN_TOTAL), lambda i: (i, 0)),
            # Params: full block, constant index -> resident across grid steps.
            pl.BlockSpec((_A_ROWS, STAGE1), lambda i: (0, 0)),
            pl.BlockSpec((_B_ROWS, FUSED), lambda i: (0, 0)),
        ],
        out_specs=pl.BlockSpec((tm, OUTPUT_NUM), lambda i: (i, 0)),
        compiler_params=pltpu.CompilerParams(
            dimension_semantics=("parallel",),
            vmem_limit_bytes=vmem_limit,
        ),
    )(x01, w_in_slab, w_rest_slab)


def cross_unit(x0, x1, w_in_slab, w_rest_slab, *, tm=None):
    B = x0.shape[0]
    cap, vmem_limit = _hw_budget()
    if tm is not None:
        cap = tm
    if B <= 8:
        TM = 8
    else:
        # >= 2 grid steps so v7x can shard the batch axis across both TCs,
        # capped so tiles (with 128-lane padding) stay comfortably in VMEM.
        TM = max(8, min(cap, _round_up(_cdiv(B, 2), 8)))
    return _cross_unit_impl(x0, x1, w_in_slab, w_rest_slab, TM, vmem_limit)


# --------------------------------------------------------------------------
# Parameters: unfused (for the pure-JAX reference) + host-side packing
# --------------------------------------------------------------------------
def init_params(key):
    """Deterministic parameter init. Leading dim 2 = (left, right)."""
    ks = jax.random.split(key, 8)
    scale_in = 1.0 / np.sqrt(INPUT_NUM)
    scale_out = 1.0 / np.sqrt(OUTPUT_NUM)
    wx = jax.random.uniform(ks[0], (2, INPUT_NUM, OUTPUT_NUM), jnp.float32,
                            -scale_in, scale_in)
    bx = jax.random.uniform(ks[1], (2, OUTPUT_NUM), jnp.float32, -scale_in, scale_in)
    wh = jax.random.uniform(ks[2], (2, OUTPUT_NUM, OUTPUT_NUM), jnp.float32,
                            -scale_out, scale_out)
    bh = jax.random.uniform(ks[3], (2, OUTPUT_NUM), jnp.float32, -scale_out, scale_out)
    whid = jax.random.uniform(ks[4], (2, HIDDEN_NUM, OUTPUT_NUM, OUTPUT_NUM),
                              jnp.float32, -scale_out, scale_out)
    bhid = jax.random.uniform(ks[5], (2, HIDDEN_NUM, OUTPUT_NUM), jnp.float32,
                              -scale_out, scale_out)
    wout = jax.random.uniform(ks[6], (2, OUTPUT_NUM, OUTPUT_NUM), jnp.float32,
                              -scale_out, scale_out)
    bout = jax.random.uniform(ks[7], (2, OUTPUT_NUM), jnp.float32,
                              -scale_out, scale_out)
    gx = jnp.ones((2, OUTPUT_NUM), jnp.float32)
    betax = jnp.zeros((2, OUTPUT_NUM), jnp.float32)
    gh = jnp.ones((2, OUTPUT_NUM), jnp.float32)
    betah = jnp.zeros((2, OUTPUT_NUM), jnp.float32)
    ghid = jnp.ones((2, HIDDEN_NUM, OUTPUT_NUM), jnp.float32)
    betahid = jnp.zeros((2, HIDDEN_NUM, OUTPUT_NUM), jnp.float32)
    gout = jnp.ones((2, OUTPUT_NUM), jnp.float32)
    betaout = jnp.zeros((2, OUTPUT_NUM), jnp.float32)
    return (wx, bx, gx, betax,
            wh, bh, gh, betah,
            whid, bhid, ghid, betahid,
            wout, bout, gout, betaout)


def pack_params(params):
    """Pack per-unit params into (128-wide slab, 64-wide slab) for the kernel."""
    (wx, bx, gx, betax, wh, bh, gh, betah,
     whid, bhid, ghid, betahid, wout, bout, gout, betaout) = params

    def blockdiag(a, b):
        za = jnp.zeros((a.shape[0], b.shape[1]), a.dtype)
        zb = jnp.zeros((b.shape[0], a.shape[1]), b.dtype)
        return jnp.concatenate(
            [jnp.concatenate([a, za], axis=1),
             jnp.concatenate([zb, b], axis=1)], axis=0)

    def cat(v):  # (2, OUTPUT_NUM) -> (FUSED,)
        return jnp.concatenate([v[0], v[1]], axis=0)

    seg = jnp.full((OUTPUT_NUM, OUTPUT_NUM), 1.0 / OUTPUT_NUM, jnp.float32)

    # ---- slab A (width 128): input layer + first-stage LN params ----
    wx_f = jnp.concatenate([wx[0], wx[1]], axis=1)            # (16, 64)
    wh_f = jnp.concatenate([wh[0], wh[1]], axis=1)            # (32, 64)
    w_in = blockdiag(wx_f, wh_f)                              # (48, 128)
    mavg128 = jnp.kron(jnp.eye(4, dtype=jnp.float32), seg)    # (128, 128)
    b128 = jnp.concatenate([cat(bx), cat(bh)])[None, :]
    g128 = jnp.concatenate([cat(gx), cat(gh)])[None, :]
    beta128 = jnp.concatenate([cat(betax), cat(betah)])[None, :]
    w_in_slab = jnp.concatenate([w_in, mavg128, b128, g128, beta128], axis=0)
    assert w_in_slab.shape == (_A_ROWS, STAGE1)

    # ---- slab B (width 64): fold, hidden/output weights, LN params ----
    eye64 = jnp.eye(FUSED, dtype=jnp.float32)
    fold = jnp.concatenate([eye64, eye64], axis=0)            # (128, 64)
    whid_bd = [blockdiag(whid[0, i], whid[1, i]) for i in range(HIDDEN_NUM)]
    wout_bd = blockdiag(wout[0], wout[1])                     # (64, 64)
    mavg64 = jnp.kron(jnp.eye(2, dtype=jnp.float32), seg)     # (64, 64)
    vec_rows = []
    for i in range(HIDDEN_NUM):
        vec_rows += [cat(bhid[:, i]), cat(ghid[:, i]), cat(betahid[:, i])]
    vec_rows += [cat(bout), cat(gout), cat(betaout)]
    w_rest_slab = jnp.concatenate(
        [fold] + whid_bd + [wout_bd, mavg64, jnp.stack(vec_rows, axis=0)], axis=0)
    assert w_rest_slab.shape == (_B_ROWS, FUSED)
    return w_in_slab, w_rest_slab


# --------------------------------------------------------------------------
# Pure-JAX reference (unfused; matches the PyTorch forward semantics)
# --------------------------------------------------------------------------
def _layernorm(x, gamma, beta):
    mu = jnp.mean(x, axis=-1, keepdims=True)
    xc = x - mu
    var = jnp.mean(xc * xc, axis=-1, keepdims=True)
    return xc * jax.lax.rsqrt(var + EPS) * gamma + beta


def reference_cross_unit(x0, x1, params):
    (wx, bx, gx, betax, wh, bh, gh, betah,
     whid, bhid, ghid, betahid, wout, bout, gout, betaout) = params

    def unit(u):
        hx = _layernorm(x0 @ wx[u] + bx[u], gx[u], betax[u])
        hh = _layernorm(x1 @ wh[u] + bh[u], gh[u], betah[u])
        residual = hx + hh
        output = jax.nn.sigmoid(residual)
        for i in range(HIDDEN_NUM):
            residual = residual + _layernorm(output @ whid[u, i] + bhid[u, i],
                                             ghid[u, i], betahid[u, i])
            output = jax.nn.sigmoid(residual)
        return jax.nn.sigmoid(
            residual + _layernorm(output @ wout[u] + bout[u], gout[u], betaout[u]))

    return unit(0) - unit(1)


if __name__ == "__main__":
    key = jax.random.PRNGKey(0)
    k_x0, k_x1, k_p = jax.random.split(key, 3)
    x0 = jax.random.normal(k_x0, (BATCH, INPUT_NUM), jnp.float32)
    x1 = jax.random.normal(k_x1, (BATCH, OUTPUT_NUM), jnp.float32)
    params = init_params(k_p)
    w_in_slab, w_rest_slab = pack_params(params)

    out = cross_unit(x0, x1, w_in_slab, w_rest_slab)
    out = jax.block_until_ready(out)

    ref = reference_cross_unit(x0, x1, params)
    np.testing.assert_allclose(np.asarray(out), np.asarray(ref),
                               rtol=1e-5, atol=1e-5)
    print("KERNEL_OK")
</pallas_src>

<mosaic_0001>
module attributes {stable_mosaic.version = 11 : i64} {
  func.func @cross_unit_kernel(%arg0: i32, %arg1: memref<8x48xf32, #tpu.memory_space<vmem>>, %arg2: memref<179x128xf32, #tpu.memory_space<vmem>>, %arg3: memref<393x64xf32, #tpu.memory_space<vmem>>, %arg4: memref<8x32xf32, #tpu.memory_space<vmem>>) attributes {dimension_semantics = [#tpu.dimension_semantics<parallel>], iteration_bounds = array<i64: 2>, scalar_prefetch = 0 : i64, scratch_operands = 0 : i64, tpu.core_type = #tpu.core_type<tc>, window_params = [{transform_indices = @transform_0, window_bounds = array<i64: 8, 48>}, {pipeline_mode = #tpu.pipeline_mode<synchronous>, transform_indices = @transform_1, window_bounds = array<i64: 179, 128>}, {pipeline_mode = #tpu.pipeline_mode<synchronous>, transform_indices = @transform_2, window_bounds = array<i64: 393, 64>}, {transform_indices = @transform_3, window_bounds = array<i64: 8, 32>}]} {
    %c0 = arith.constant 0 : index
    %c0_0 = arith.constant 0 : index
    %0 = vector.load %arg1[%c0, %c0_0] : memref<8x48xf32, #tpu.memory_space<vmem>>, vector<8x48xf32>
    %c0_1 = arith.constant 0 : index
    %c0_2 = arith.constant 0 : index
    %1 = vector.load %arg2[%c0_1, %c0_2] : memref<179x128xf32, #tpu.memory_space<vmem>>, vector<48x128xf32>
    %c48 = arith.constant 48 : index
    %c0_3 = arith.constant 0 : index
    %2 = vector.load %arg2[%c48, %c0_3] : memref<179x128xf32, #tpu.memory_space<vmem>>, vector<128x128xf32>
    %c176 = arith.constant 176 : index
    %c0_4 = arith.constant 0 : index
    %3 = vector.load %arg2[%c176, %c0_4] : memref<179x128xf32, #tpu.memory_space<vmem>>, vector<1x128xf32>
    %c177 = arith.constant 177 : index
    %c0_5 = arith.constant 0 : index
    %4 = vector.load %arg2[%c177, %c0_5] : memref<179x128xf32, #tpu.memory_space<vmem>>, vector<1x128xf32>
    %c178 = arith.constant 178 : index
    %c0_6 = arith.constant 0 : index
    %5 = vector.load %arg2[%c178, %c0_6] : memref<179x128xf32, #tpu.memory_space<vmem>>, vector<1x128xf32>
    %c0_7 = arith.constant 0 : index
    %c0_8 = arith.constant 0 : index
    %6 = vector.load %arg3[%c0_7, %c0_8] : memref<393x64xf32, #tpu.memory_space<vmem>>, vector<128x64xf32>
    %c320 = arith.constant 320 : index
    %c0_9 = arith.constant 0 : index
    %7 = vector.load %arg3[%c320, %c0_9] : memref<393x64xf32, #tpu.memory_space<vmem>>, vector<64x64xf32>
    %cst = arith.constant dense<0.000000e+00> : vector<8x128xf32>
    %8 = tpu.matmul %0, %1, %cst {dimension_numbers = #tpu.dot_dimension_numbers<[1], [0], [0], [1], [0, 0, 1, 1], [], []>, precision = #tpu.contract_precision<fp32>} : vector<8x48xf32>, vector<48x128xf32>, vector<8x128xf32> -> vector<8x128xf32>
    %9 = vector.broadcast %3 : vector<1x128xf32> to vector<8x128xf32>
    %10 = arith.addf %8, %9 : vector<8x128xf32>
    %cst_10 = arith.constant dense<0.000000e+00> : vector<8x128xf32>
    %11 = tpu.matmul %10, %2, %cst_10 {dimension_numbers = #tpu.dot_dimension_numbers<[1], [0], [0], [1], [0, 0, 1, 1], [], []>, precision = #tpu.contract_precision<fp32>} : vector<8x128xf32>, vector<128x128xf32>, vector<8x128xf32> -> vector<8x128xf32>
    %12 = arith.subf %10, %11 : vector<8x128xf32>
    %13 = arith.mulf %12, %12 : vector<8x128xf32>
    %cst_11 = arith.constant dense<0.000000e+00> : vector<8x128xf32>
    %14 = tpu.matmul %13, %2, %cst_11 {dimension_numbers = #tpu.dot_dimension_numbers<[1], [0], [0], [1], [0, 0, 1, 1], [], []>, precision = #tpu.contract_precision<fp32>} : vector<8x128xf32>, vector<128x128xf32>, vector<8x128xf32> -> vector<8x128xf32>
    %cst_12 = arith.constant 9.99999974E-6 : f32
    %15 = vector.broadcast %cst_12 : f32 to vector<8x128xf32>
    %16 = arith.addf %14, %15 : vector<8x128xf32>
    %17 = math.rsqrt %16 : vector<8x128xf32>
    %18 = arith.mulf %12, %17 : vector<8x128xf32>
    %19 = vector.broadcast %4 : vector<1x128xf32> to vector<8x128xf32>
    %20 = arith.mulf %18, %19 : vector<8x128xf32>
    %21 = vector.broadcast %5 : vector<1x128xf32> to vector<8x128xf32>
    %22 = arith.addf %20, %21 : vector<8x128xf32>
    %cst_13 = arith.constant dense<0.000000e+00> : vector<8x64xf32>
    %23 = tpu.matmul %22, %6, %cst_13 {dimension_numbers = #tpu.dot_dimension_numbers<[1], [0], [0], [1], [0, 0, 1, 1], [], []>, precision = #tpu.contract_precision<fp32>} : vector<8x128xf32>, vector<128x64xf32>, vector<8x64xf32> -> vector<8x64xf32>
    %24 = arith.negf %23 : vector<8x64xf32>
    %25 = math.exp %24 : vector<8x64xf32>
    %cst_14 = arith.constant 1.000000e+00 : f32
    %26 = vector.broadcast %cst_14 : f32 to vector<8x64xf32>
    %27 = arith.addf %26, %25 : vector<8x64xf32>
    %28 = arith.divf %26, %27 : vector<8x64xf32>
    %c128 = arith.constant 128 : index
    %c0_15 = arith.constant 0 : index
    %29 = vector.load %arg3[%c128, %c0_15] : memref<393x64xf32, #tpu.memory_space<vmem>>, vector<64x64xf32>
    %cst_16 = arith.constant dense<0.000000e+00> : vector<8x64xf32>
    %30 = tpu.matmul %28, %29, %cst_16 {dimension_numbers = #tpu.dot_dimension_numbers<[1], [0], [0], [1], [0, 0, 1, 1], [], []>, precision = #tpu.contract_precision<fp32>} : vector<8x64xf32>, vector<64x64xf32>, vector<8x64xf32> -> vector<8x64xf32>
    %c384 = arith.constant 384 : index
    %c0_17 = arith.constant 0 : index
    %31 = vector.load %arg3[%c384, %c0_17] : memref<393x64xf32, #tpu.memory_space<vmem>>, vector<1x64xf32>
    %32 = vector.broadcast %31 : vector<1x64xf32> to vector<8x64xf32>
    %33 = arith.addf %30, %32 : vector<8x64xf32>
    %c385 = arith.constant 385 : index
    %c0_18 = arith.constant 0 : index
    %34 = vector.load %arg3[%c385, %c0_18] : memref<393x64xf32, #tpu.memory_space<vmem>>, vector<1x64xf32>
    %c386 = arith.constant 386 : index
    %c0_19 = arith.constant 0 : index
    %35 = vector.load %arg3[%c386, %c0_19] : memref<393x64xf32, #tpu.memory_space<vmem>>, vector<1x64xf32>
    %cst_20 = arith.constant dense<0.000000e+00> : vector<8x64xf32>
    %36 = tpu.matmul %33, %7, %cst_20 {dimension_numbers = #tpu.dot_dimension_numbers<[1], [0], [0], [1], [0, 0, 1, 1], [], []>, precision = #tpu.contract_precision<fp32>} : vector<8x64xf32>, vector<64x64xf32>, vector<8x64xf32> -> vector<8x64xf32>
    %37 = arith.subf %33, %36 : vector<8x64xf32>
    %38 = arith.mulf %37, %37 : vector<8x64xf32>
    %cst_21 = arith.constant dense<0.000000e+00> : vector<8x64xf32>
    %39 = tpu.matmul %38, %7, %cst_21 {dimension_numbers = #tpu.dot_dimension_numbers<[1], [0], [0], [1], [0, 0, 1, 1], [], []>, precision = #tpu.contract_precision<fp32>} : vector<8x64xf32>, vector<64x64xf32>, vector<8x64xf32> -> vector<8x64xf32>
    %cst_22 = arith.constant 9.99999974E-6 : f32
    %40 = vector.broadcast %cst_22 : f32 to vector<8x64xf32>
    %41 = arith.addf %39, %40 : vector<8x64xf32>
    %42 = math.rsqrt %41 : vector<8x64xf32>
    %43 = arith.mulf %37, %42 : vector<8x64xf32>
    %44 = vector.broadcast %34 : vector<1x64xf32> to vector<8x64xf32>
    %45 = arith.mulf %43, %44 : vector<8x64xf32>
    %46 = vector.broadcast %35 : vector<1x64xf32> to vector<8x64xf32>
    %47 = arith.addf %45, %46 : vector<8x64xf32>
    %48 = arith.addf %23, %47 : vector<8x64xf32>
    %49 = arith.negf %48 : vector<8x64xf32>
    %50 = math.exp %49 : vector<8x64xf32>
    %cst_23 = arith.constant 1.000000e+00 : f32
    %51 = vector.broadcast %cst_23 : f32 to vector<8x64xf32>
    %52 = arith.addf %51, %50 : vector<8x64xf32>
    %53 = arith.divf %51, %52 : vector<8x64xf32>
    %c192 = arith.constant 192 : index
    %c0_24 = arith.constant 0 : index
    %54 = vector.load %arg3[%c192, %c0_24] : memref<393x64xf32, #tpu.memory_space<vmem>>, vector<64x64xf32>
    %cst_25 = arith.constant dense<0.000000e+00> : vector<8x64xf32>
    %55 = tpu.matmul %53, %54, %cst_25 {dimension_numbers = #tpu.dot_dimension_numbers<[1], [0], [0], [1], [0, 0, 1, 1], [], []>, precision = #tpu.contract_precision<fp32>} : vector<8x64xf32>, vector<64x64xf32>, vector<8x64xf32> -> vector<8x64xf32>
    %c387 = arith.constant 387 : index
    %c0_26 = arith.constant 0 : index
    %56 = vector.load %arg3[%c387, %c0_26] : memref<393x64xf32, #tpu.memory_space<vmem>>, vector<1x64xf32>
    %57 = vector.broadcast %56 : vector<1x64xf32> to vector<8x64xf32>
    %58 = arith.addf %55, %57 : vector<8x64xf32>
    %c388 = arith.constant 388 : index
    %c0_27 = arith.constant 0 : index
    %59 = vector.load %arg3[%c388, %c0_27] : memref<393x64xf32, #tpu.memory_space<vmem>>, vector<1x64xf32>
    %c389 = arith.constant 389 : index
    %c0_28 = arith.constant 0 : index
    %60 = vector.load %arg3[%c389, %c0_28] : memref<393x64xf32, #tpu.memory_space<vmem>>, vector<1x64xf32>
    %cst_29 = arith.constant dense<0.000000e+00> : vector<8x64xf32>
    %61 = tpu.matmul %58, %7, %cst_29 {dimension_numbers = #tpu.dot_dimension_numbers<[1], [0], [0], [1], [0, 0, 1, 1], [], []>, precision = #tpu.contract_precision<fp32>} : vector<8x64xf32>, vector<64x64xf32>, vector<8x64xf32> -> vector<8x64xf32>
    %62 = arith.subf %58, %61 : vector<8x64xf32>
    %63 = arith.mulf %62, %62 : vector<8x64xf32>
    %cst_30 = arith.constant dense<0.000000e+00> : vector<8x64xf32>
    %64 = tpu.matmul %63, %7, %cst_30 {dimension_numbers = #tpu.dot_dimension_numbers<[1], [0], [0], [1], [0, 0, 1, 1], [], []>, precision = #tpu.contract_precision<fp32>} : vector<8x64xf32>, vector<64x64xf32>, vector<8x64xf32> -> vector<8x64xf32>
    %cst_31 = arith.constant 9.99999974E-6 : f32
    %65 = vector.broadcast %cst_31 : f32 to vector<8x64xf32>
    %66 = arith.addf %64, %65 : vector<8x64xf32>
    %67 = math.rsqrt %66 : vector<8x64xf32>
    %68 = arith.mulf %62, %67 : vector<8x64xf32>
    %69 = vector.broadcast %59 : vector<1x64xf32> to vector<8x64xf32>
    %70 = arith.mulf %68, %69 : vector<8x64xf32>
    %71 = vector.broadcast %60 : vector<1x64xf32> to vector<8x64xf32>
    %72 = arith.addf %70, %71 : vector<8x64xf32>
    %73 = arith.addf %48, %72 : vector<8x64xf32>
    %74 = arith.negf %73 : vector<8x64xf32>
    %75 = math.exp %74 : vector<8x64xf32>
    %cst_32 = arith.constant 1.000000e+00 : f32
    %76 = vector.broadcast %cst_32 : f32 to vector<8x64xf32>
    %77 = arith.addf %76, %75 : vector<8x64xf32>
    %78 = arith.divf %76, %77 : vector<8x64xf32>
    %c256 = arith.constant 256 : index
    %c0_33 = arith.constant 0 : index
    %79 = vector.load %arg3[%c256, %c0_33] : memref<393x64xf32, #tpu.memory_space<vmem>>, vector<64x64xf32>
    %cst_34 = arith.constant dense<0.000000e+00> : vector<8x64xf32>
    %80 = tpu.matmul %78, %79, %cst_34 {dimension_numbers = #tpu.dot_dimension_numbers<[1], [0], [0], [1], [0, 0, 1, 1], [], []>, precision = #tpu.contract_precision<fp32>} : vector<8x64xf32>, vector<64x64xf32>, vector<8x64xf32> -> vector<8x64xf32>
    %c390 = arith.constant 390 : index
    %c0_35 = arith.constant 0 : index
    %81 = vector.load %arg3[%c390, %c0_35] : memref<393x64xf32, #tpu.memory_space<vmem>>, vector<1x64xf32>
    %82 = vector.broadcast %81 : vector<1x64xf32> to vector<8x64xf32>
    %83 = arith.addf %80, %82 : vector<8x64xf32>
    %c391 = arith.constant 391 : index
    %c0_36 = arith.constant 0 : index
    %84 = vector.load %arg3[%c391, %c0_36] : memref<393x64xf32, #tpu.memory_space<vmem>>, vector<1x64xf32>
    %c392 = arith.constant 392 : index
    %c0_37 = arith.constant 0 : index
    %85 = vector.load %arg3[%c392, %c0_37] : memref<393x64xf32, #tpu.memory_space<vmem>>, vector<1x64xf32>
    %cst_38 = arith.constant dense<0.000000e+00> : vector<8x64xf32>
    %86 = tpu.matmul %83, %7, %cst_38 {dimension_numbers = #tpu.dot_dimension_numbers<[1], [0], [0], [1], [0, 0, 1, 1], [], []>, precision = #tpu.contract_precision<fp32>} : vector<8x64xf32>, vector<64x64xf32>, vector<8x64xf32> -> vector<8x64xf32>
    %87 = arith.subf %83, %86 : vector<8x64xf32>
    %88 = arith.mulf %87, %87 : vector<8x64xf32>
    %cst_39 = arith.constant dense<0.000000e+00> : vector<8x64xf32>
    %89 = tpu.matmul %88, %7, %cst_39 {dimension_numbers = #tpu.dot_dimension_numbers<[1], [0], [0], [1], [0, 0, 1, 1], [], []>, precision = #tpu.contract_precision<fp32>} : vector<8x64xf32>, vector<64x64xf32>, vector<8x64xf32> -> vector<8x64xf32>
    %cst_40 = arith.constant 9.99999974E-6 : f32
    %90 = vector.broadcast %cst_40 : f32 to vector<8x64xf32>
    %91 = arith.addf %89, %90 : vector<8x64xf32>
    %92 = math.rsqrt %91 : vector<8x64xf32>
    %93 = arith.mulf %87, %92 : vector<8x64xf32>
    %94 = vector.broadcast %84 : vector<1x64xf32> to vector<8x64xf32>
    %95 = arith.mulf %93, %94 : vector<8x64xf32>
    %96 = vector.broadcast %85 : vector<1x64xf32> to vector<8x64xf32>
    %97 = arith.addf %95, %96 : vector<8x64xf32>
    %98 = arith.addf %73, %97 : vector<8x64xf32>
    %99 = arith.negf %98 : vector<8x64xf32>
    %100 = math.exp %99 : vector<8x64xf32>
    %cst_41 = arith.constant 1.000000e+00 : f32
    %101 = vector.broadcast %cst_41 : f32 to vector<8x64xf32>
    %102 = arith.addf %101, %100 : vector<8x64xf32>
    %103 = arith.divf %101, %102 : vector<8x64xf32>
    %104 = vector.extract_strided_slice %103 {offsets = [0, 0], sizes = [8, 32], strides = [1, 1]} : vector<8x64xf32> to vector<8x32xf32>
    %105 = vector.extract_strided_slice %103 {offsets = [0, 32], sizes = [8, 32], strides = [1, 1]} : vector<8x64xf32> to vector<8x32xf32>
    %106 = arith.subf %104, %105 : vector<8x32xf32>
    %c0_42 = arith.constant 0 : index
    %c0_43 = arith.constant 0 : index
    %107 = vector.load %arg4[%c0_42, %c0_43] : memref<8x32xf32, #tpu.memory_space<vmem>>, vector<8x32xf32>
    tpu.vector_store %arg4[%c0_42, %c0_43], %106 {strides = array<i32>} : memref<8x32xf32, #tpu.memory_space<vmem>>, vector<8x32xf32>,
    return
  }
  func.func @transform_0(%arg0: i32) -> (i32, i32) {
    %c0_i32 = arith.constant 0 : i32
    %c0_i32_0 = arith.constant 0 : i32
    return %arg0, %c0_i32 : i32, i32
  }
  func.func @transform_1(%arg0: i32) -> (i32, i32) {
    %c0_i32 = arith.constant 0 : i32
    %c0_i32_0 = arith.constant 0 : i32
    %c0_i32_1 = arith.constant 0 : i32
    return %c0_i32, %c0_i32_0 : i32, i32
  }
  func.func @transform_2(%arg0: i32) -> (i32, i32) {
    %c0_i32 = arith.constant 0 : i32
    %c0_i32_0 = arith.constant 0 : i32
    %c0_i32_1 = arith.constant 0 : i32
    return %c0_i32, %c0_i32_0 : i32, i32
  }
  func.func @transform_3(%arg0: i32) -> (i32, i32) {
    %c0_i32 = arith.constant 0 : i32
    %c0_i32_0 = arith.constant 0 : i32
    return %arg0, %c0_i32 : i32, i32
  }
}

</mosaic_0001>

<bundles_post_ra>
// kernel: _cross_unit_impl.1
= control target key start
LH: loop header
LB: loop body
LE: loop exit
PB: predicated region body
PF: predicated region fallthrough
CT: control target
= control target key end

     0   :  { %8 = vsyncpa [#allocation3], 0  ;;  %s13740_s0 = inlined_call_operand.vmem [shape: f32[12,48], index: 0, kind: input, shape index: {}]   ;;  %s13741_s1 = inlined_call_operand.vmem [shape: f32[179,128], index: 1, kind: input, shape index: {}]   ;;  %s13742_s2 = inlined_call_operand.vmem [shape: f32[393,64], index: 2, kind: input, shape index: {}]   ;;  %s13743_s3 = inlined_call_operand.hbm [shape: f32[12,32], index: 3, kind: output, shape index: {}]  }
   0x1   :  { %10 = vsyncpa [#allocation3 + $0x1], 0  ;;  %s11760_s12 = smov 0   ;;  %s11762_s13 = smov 0  }
   0x2   :  { %s11764_s14 = smov 0   ;;  %s11766_s15 = smov 0  }
   0x3 LB: > { %s11781_s16 = sadd.s32 4294967295, %s11733_s15   ;;  %s7727_s17 = sadd.s32 4294967294, %s11733_s15   ;;  %s11733_s15 = sphi %s11766_s15, %s13763_s15   ;;  %s11729_s14 = sphi %s11764_s14, %s13762_s14   ;;  %s11725_s13 = sphi %s11762_s13, %s13761_s13   ;;  %s11721_s12 = sphi %s11760_s12, %s13760_s12  }
   0x4   : > { %s11785_s18 = sadd.s32 1, %s11733_s15   ;;  %s91_s19 = sadd.s32 1, %s11729_s14 }
   0x5   : > { %s88_s20 = ssub.s32 %s11733_s15, %s11785_s18  ;;  %p101_p0 = scmp.ne.s32.totalorder %s11729_s14, %s11725_s13 }
   0x6   : > { %p89_p1 = scmp.eq.s32.totalorder %s88_s20, 0  ;;  %p102_p2 = scmp.eq.s32.totalorder %s11781_s16, 1 }
   0x7   : > { %p107_p3 = scmp.ne.s32.totalorder %s11725_s13, %s11721_s12  ;;  %p108_p4 = scmp.eq.s32.totalorder %s7727_s17, 1 }
   0x8   : > { %s11796_s21 = scalar_select %p89_p1, %s11729_s14, %s91_s19  }
   0x9   : > { %p11798_p5 = por %p102_p2, %p101_p0  ;;  %p11802_p6 = por %p108_p4, %p107_p3 }
   0xa   : > { %p7730_p7 = scmp.ge.s32.totalorder %s11733_s15, 1  ;;  %p139_p8 = scmp.lt.s32.totalorder %s11733_s15, 3 }
   0xc   : > { %p140_p9 = pnand %p7730_p7, %p139_p8 }
   0xd   : > { %v167_v0 = vld [vmem:[%s13741_s1] sm:$0xff] (!%p140_p9)  ;;  %v168_v1 = vld [vmem:[%s13741_s1 + $0x8] sm:$0xff] (!%p140_p9)  ;;  %v169_v2 = vld [vmem:[%s13741_s1 + $0x10] sm:$0xff] (!%p140_p9)  ;;  %v11735_v3 = vmov (!%p140_p9), 0.0|0.0   ;;  %vm11736_vm0 = vmmov (!%p140_p9), 0   ;;  %v11737_v9 = vmov (!%p140_p9), 0.0  }
   0xe   : > { %143 = sbr.rel (%p140_p9) target bundleno = 4499 (0x1193), region = 32  ;;  %10333 = vmatprep.subr.bf16.mxu0 (!%p140_p9), %v11735_v3  ;;  %v225_v4 = vand.u32 (!%p140_p9), 4294901760, %v167_v0  ;;  %v228_v5 = vand.u32 (!%p140_p9), 4294901760, %v168_v1  ;;  %v170_v6 = vld [vmem:[%s13741_s1 + $0x18] sm:$0xff] (!%p140_p9)  ;;  %v231_v7 = vand.u32 (!%p140_p9), 4294901760, %v169_v2  ;;  %v171_v8 = vld [vmem:[%s13741_s1 + $0x20] sm:$0xff] (!%p140_p9)  ;;  %8599 = vmatprep.mubr.msk.f32.mxu0 (!%p140_p9), %vm11736_vm0, %v11737_v9 }
   0xf   : > { %v234_v10 = vand.u32 (!%p140_p9), 4294901760, %v170_v6  ;;  %v172_v11 = vld [vmem:[%s13741_s1 + $0x28] sm:$0xff] (!%p140_p9)  ;;  %p162_p10 = scmp.lt.s32.totalorder (!%p140_p9), %s11781_s16, 1  ;;  %10387 = vmatprep.subr.bf16.mxu1 (!%p140_p9), %v11735_v3  ;;  %8709 = vmatprep.mubr.msk.f32.mxu1 (!%p140_p9), %vm11736_vm0, %v11737_v9  ;;  %v237_v17 = vand.u32 (!%p140_p9), 4294901760, %v171_v8  ;;  %vm220_vm1 = vcmask (!%p140_p9), 392192   ;;  %v11862_v27 = vld [vmem:[%s13741_s1 + $0x30] sm:$0xff] (!%p140_p9) }
  0x10   : > { %v11833_v12 = vpack.c.bf16 (!%p140_p9), %v228_v5, %v225_v4  ;;  %v11835_v13 = vsub.f32 (!%p140_p9), %v167_v0, %v225_v4  ;;  %v11837_v14 = vsub.f32 (!%p140_p9), %v168_v1, %v228_v5  ;;  %v11839_v15 = vsub.f32 (!%p140_p9), %v169_v2, %v231_v7  ;;  %v11876_v32 = vld [vmem:[%s13741_s1 + $0x38] sm:$0xff] (!%p140_p9)  ;;  %v11884_v34 = vld [vmem:[%s13741_s1 + $0x40] sm:$0xff] (!%p140_p9)  ;;  %v11889_v35 = vld [vmem:[%s13741_s1 + $0x48] sm:$0xff] (!%p140_p9)  ;;  %s11738_s4 = smov (!%p140_p9), 96   ;;  %s159_s5 = sand.u32 (!%p140_p9), 1, %s11725_s13  }
  0x11   : > { %v11841_v16 = vsub.f32 (!%p140_p9), %v170_v6, %v234_v10  ;;  %v11845_v18 = vpack.c.bf16 (!%p140_p9), %v234_v10, %v231_v7  ;;  %v240_v19 = vand.u32 (!%p140_p9), 4294901760, %v172_v11  ;;  %v11850_v22 = vsub.f32 (!%p140_p9), %v171_v8, %v237_v17  ;;  %v11910_v47 = vld [vmem:[%s13741_s1 + $0x50] sm:$0xff] (!%p140_p9)  ;;  %v11915_v48 = vld [vmem:[%s13741_s1 + $0x58] sm:$0xff] (!%p140_p9)  ;;  %v11947_v60 = vld [vmem:[%s13741_s1 + $0x60] sm:$0xff] (!%p140_p9)  ;;  %s7731_s6 = sshll.u32 (!%p140_p9), %s159_s5, 3  ;;  %s7750_s7 = sshll.u32 (!%p140_p9), %s11781_s16, 7 }
  0x12   : > { %10335 = vmatpush3.bf16.msra.mxu0 (!%p140_p9), %v11833_v12  ;;  %v308_v20 = vand.u32 (!%p140_p9), 4294901760, %v11835_v13  ;;  %v315_v21 = vand.u32 (!%p140_p9), 4294901760, %v11837_v14  ;;  %v322_v23 = vand.u32 (!%p140_p9), 4294901760, %v11839_v15  ;;  %v736_v38 = vand.u32 (!%p140_p9), 4294901760, %v11862_v27  ;;  %v11952_v61 = vld [vmem:[%s13741_s1 + $0x68] sm:$0xff] (!%p140_p9)  ;;  %v11968_v6 = vld [vmem:[%s13741_s1 + $0x70] sm:$0xff] (!%p140_p9)  ;;  %s13698_s17 = scalar_lea.hbm (!%p140_p9), %s13743_s3, %s7750_s7 }
  0x13   : > { %10336 = vmatprep.subr.bf16.mxu0 (!%p140_p9), %v11735_v3  ;;  %v11856_v24 = vsub.f32 (!%p140_p9), %v172_v11, %v240_v19  ;;  %v329_v26 = vand.u32 (!%p140_p9), 4294901760, %v11841_v16  ;;  %v11865_v28 = vpack.c.bf16 (!%p140_p9), %v240_v19, %v237_v17  ;;  %v336_v37 = vand.u32 (!%p140_p9), 4294901760, %v11850_v22  ;;  %v11973_v7 = vld [vmem:[%s13741_s1 + $0x78] sm:$0xff] (!%p140_p9)  ;;  %s161_s8 = scalar_lea.vmem (!%p140_p9), [#allocation2], %s7731_s6 }
  0x14   : > { %v309_v30 = vsub.f32 (!%p140_p9), %v11835_v13, %v308_v20  ;;  %v316_v31 = vsub.f32 (!%p140_p9), %v11837_v14, %v315_v21  ;;  %v323_v36 = vsub.f32 (!%p140_p9), %v11839_v15, %v322_v23  ;;  %v739_v42 = vand.u32 (!%p140_p9), 4294901760, %v11876_v32 }
  0x15   : > { %s163_s9 = scalar_select %p162_p10, %s11781_s16, 1  ;;  %v330_v40 = vsub.f32 %v11841_v16, %v329_v26  ;;  %v343_v41 = vand.u32 4294901760, %v11856_v24  ;;  %v742_v45 = vand.u32 4294901760, %v11884_v34  ;;  %v745_v46 = vand.u32 4294901760, %v11889_v35 }
  0x16   : > { %10338 = vmatpush3.bf16.msra.mxu0 %v11845_v18  ;;  %v310_v43 = vand.u32 4294901760, %v309_v30  ;;  %v317_v44 = vand.u32 4294901760, %v316_v31  ;;  %v11923_v50 = vpack.c.bf16 %v739_v42, %v736_v38  ;;  %v337_v51 = vsub.f32 %v11850_v22, %v336_v37  ;;  %s11739_s16 = smov [#allocation2]  }
  0x17   : > { %s7732_s10 = sshll.u32 %s163_s9, 3  ;;  %10339 = vmatprep.subr.bf16.mxu0 %v11735_v3  ;;  %v11936_v53 = vpack.c.bf16 %v745_v46, %v742_v45  ;;  %v748_v54 = vand.u32 4294901760, %v11910_v47  ;;  %v751_v55 = vand.u32 4294901760, %v11915_v48  ;;  %v324_v57 = vand.u32 4294901760, %v323_v36  ;;  %s7668_s9 = sshll.u32 %s161_s8, 4  ;;  %s13700_s9 = int_to_ptr.vmem [resolvable:$true] %s7668_s9 }
  0x18   : > { %s165_s19 = scalar_lea.vmem %s13740_s0, %s7732_s10  ;;  %10389 = vmatpush3.bf16.msra.mxu1 %v11923_v50  ;;  %v10343_v56 = vpack.c.bf16 %v317_v44, %v310_v43  ;;  %v331_v58 = vand.u32 4294901760, %v330_v40  ;;  %v344_v59 = vsub.f32 %v11856_v24, %v343_v41  ;;  %v754_v0 = vand.u32 4294901760, %v11947_v60  ;;  %s11671_s20 = scalar_lea.vmem %s13700_s9, 128 }
  0x19   : > { %v166_v25 = vld [vmem:[%s165_s19] sm:$0xff]  ;;  %10390 = vmatprep.subr.bf16.mxu1 %v11735_v3  ;;  %v11959_v63 = vpack.c.bf16 %v751_v55, %v748_v54  ;;  %v757_v1 = vand.u32 4294901760, %v11952_v61  ;;  %v338_v4 = vand.u32 4294901760, %v337_v51  ;;  %v760_v10 = vand.u32 4294901760, %v11968_v6  ;;  %s7655_s19 = scalar_lea.sflag [#allocation3], %s159_s5  ;;  %p11672_p11 = scmp.ne.s32.totalorder %s13700_s9, %s11671_s20 }
  0x1a   : > { %v222_v29 = vsel %vm220_vm1, %v166_v25, 0  ;;  %10341 = vmatpush3.bf16.msra.mxu0 %v11865_v28  ;;  %v10346_v2 = vpack.c.bf16 %v331_v58, %v324_v57  ;;  %v345_v5 = vand.u32 4294901760, %v344_v59  ;;  %v763_v11 = vand.u32 4294901760, %v11973_v7  ;;  %s11675_s24 = sshll.u32 %s11739_s16, 4  ;;  %s11676_s24 = int_to_ptr.vmem [resolvable:$false] %s11675_s24 }
  0x1b   : > { %v11879_v33 = vand.u32 4294901760, %v222_v29  ;;  %10342 = vmatprep.subr.bf16.mxu0 %v11735_v3  ;;  %v11982_v8 = vpack.c.bf16 %v757_v1, %v754_v0  ;;  %v10352_v25 = vpack.c.bf16 %v11837_v14, %v11835_v13  ;;  %v10358_v30 = vpack.c.bf16 %v11856_v24, %v11850_v22  ;;  %v184_v14 = vld [vmem:[%s13741_s1 + $0x88] sm:$0xff]  ;;  %p11673_p12 = pnand %p11672_p11, %p11798_p5  ;;  %s11677_s25 = scalar_lea.vmem %s11676_s24, 256 }
  0x1c   : > { %10392 = vmatpush3.bf16.msra.mxu1 %v11936_v53  ;;  %v10349_v17 = vpack.c.bf16 %v345_v5, %v338_v4  ;;  %v11993_v19 = vpack.c.bf16 %v763_v11, %v760_v10  ;;  %v10370_v31 = vpack.c.bf16 %v315_v21, %v308_v20  ;;  %v10373_v36 = vpack.c.bf16 %v329_v26, %v322_v23  ;;  %v185_v20 = vld [vmem:[%s13741_s1 + $0x90] sm:$0xff]  ;;  %v186_v21 = vld [vmem:[%s13741_s1 + $0x98] sm:$0xff]  ;;  %v187_v26 = vld [vmem:[%s13741_s1 + $0xa0] sm:$0xff]  ;;  %p11678_p0 = scmp.lt.s32.totalorder %s13700_s9, %s11676_s24  ;;  %p11679_p1 = scmp.lt.s32.totalorder %s11677_s25, %s11671_s20 }
  0x1d   : > { %v11897_v39 = vsub.f32 %v222_v29, %v11879_v33  ;;  %10393 = vmatprep.subr.bf16.mxu1 %v11735_v3  ;;  %v10355_v29 = vpack.c.bf16 %v11841_v16, %v11839_v15  ;;  %v10376_v13 = vpack.c.bf16 %v343_v41, %v336_v37  ;;  %v769_v16 = vand.u32 4294901760, %v184_v14  ;;  %p11674_p13 = pneg %p11673_p12 }
  0x1e   : > { %v772_v22 = vand.u32 4294901760, %v185_v20  ;;  %v775_v23 = vand.u32 4294901760, %v186_v21  ;;  %vm2691_vm2 = vcmask 523264   ;;  %vm7652_vm3 = vcmask 261120   ;;  %p11680_p2 = por %p11679_p1, %p11678_p0 }
  0x1f   : > { %v297_v49 = vand.u32 4294901760, %v11897_v39  ;;  %v12099_v41 = vsub.f32 %v184_v14, %v769_v16 }
  0x20   : > { %10395 = vmatpush3.bf16.msra.mxu1 %v11959_v63  ;;  %v12079_v24 = vpack.c.bf16 %v775_v23, %v772_v22  ;;  %p11681_p3 = pnand %p11680_p2, %p11674_p13 }
  0x21   : > { %v298_v52 = vsub.f32 %v11897_v39, %v297_v49  ;;  %10396 = vmatprep.subr.bf16.mxu1 %v11735_v3  ;;  %v906_v44 = vand.u32 4294901760, %v12099_v41 }
  0x23   : > { %v299_v62 = vand.u32 4294901760, %v298_v52  ;;  %v907_v51 = vsub.f32 %v12099_v41, %v906_v44  ;;  %v12109_v52 = vsub.f32 %v185_v20, %v772_v22 }
  0x24   : > { %10398 = vmatpush3.bf16.msra.mxu1 %v11982_v8 }
  0x25   : > { %8600 = vmatmul.mubr.f32.vlgmr.msra.gmra.mrb[0].mxu0 %v299_v62  ;;  %10399 = vmatprep.subr.bf16.mxu1 %v11735_v3  ;;  %v908_v58 = vand.u32 4294901760, %v907_v51  ;;  %v913_v59 = vand.u32 4294901760, %v12109_v52  ;;  %v12171_v51 = vsub.f32 %v11889_v35, %v745_v46  ;;  %v12189_v46 = vsub.f32 %v11910_v47, %v748_v54 }
  0x26   : > { %10344 = vmatpush3.bf16.msra.mxu0 %v10343_v56  ;;  %8614 = vmatprep.mubr.msk.f32.mxu0 %vm11736_vm0, %v11737_v9  ;;  %v12111_v56 = vsub.f32 %v186_v21, %v775_v23 }
  0x27   : > { %10345 = vmatprep.subr.bf16.mxu0 %v11735_v3  ;;  %v914_v4 = vsub.f32 %v12109_v52, %v913_v59  ;;  %v850_v35 = vand.u32 4294901760, %v12171_v51 }
  0x28   : > { %10401 = vmatpush3.bf16.msra.mxu1 %v11993_v19  ;;  %v920_v62 = vand.u32 4294901760, %v12111_v56  ;;  %v12145_v22 = vpack.c.bf16 %v12111_v56, %v12109_v52 }
  0x29   : > { %10402 = vmatprep.subr.bf16.mxu1 %v11735_v3  ;;  %v851_v47 = vsub.f32 %v12171_v51, %v850_v35 }
  0x2a   : > { %10347 = vmatpush3.bf16.msra.mxu0 %v10346_v2 }
  0x2b   : > { %10348 = vmatprep.subr.bf16.mxu0 %v11735_v3 }
  0x2e   : > { %10350 = vmatpush3.bf16.msra.mxu0 %v10349_v17 }
  0x2f   : > { %10351 = vmatprep.subr.bf16.mxu0 %v11735_v3 }
  0x31   : > { %8615 = vmatmul.mubr.f32.vlgmr.msra.gmra.mrb[0].mxu0 %v11879_v33 }
  0x32   : > { %10353 = vmatpush3.bf16.msra.mxu0 %v10352_v25  ;;  %8629 = vmatprep.mubr.msk.f32.mxu0 %vm11736_vm0, %v11737_v9  ;;  %v921_v25 = vsub.f32 %v12111_v56, %v920_v62 }
  0x33   : > { %10354 = vmatprep.subr.bf16.mxu0 %v11735_v3 }
  0x36   : > { %10356 = vmatpush3.bf16.msra.mxu0 %v10355_v29  ;;  %v915_v29 = vand.u32 4294901760, %v914_v4 }
  0x37   : > { %10357 = vmatprep.subr.bf16.mxu0 %v11735_v3 }
  0x3a   : > { %10359 = vmatpush3.bf16.msra.mxu0 %v10358_v30 }
  0x3b   : > { %10360 = vmatprep.subr.bf16.mxu0 %v11735_v3 }
  0x3d   : > { %8630 = vmatmul.mubr.f32.vlgmr.msra.gmra.mrb[0].mxu0 %v11897_v39 }
  0x3e   : > { %10362 = vmatpush3.bf16.msra.mxu0 %v11833_v12  ;;  %8644 = vmatprep.mubr.msk.f32.mxu0 %vm11736_vm0, %v11737_v9 }
  0x3f   : > { %10363 = vmatprep.subr.bf16.mxu0 %v11735_v3 }
  0x42   : > { %10365 = vmatpush3.bf16.msra.mxu0 %v11845_v18 }
  0x43   : > { %10366 = vmatprep.subr.bf16.mxu0 %v11735_v3 }
  0x46   : > { %10368 = vmatpush3.bf16.msra.mxu0 %v11865_v28 }
  0x47   : > { %10369 = vmatprep.subr.bf16.mxu0 %v11735_v3 }
  0x49   : > { %8645 = vmatmul.mubr.f32.vlgmr.msra.gmra.mrb[0].mxu0 %v297_v49 }
  0x4a   : > { %10371 = vmatpush3.bf16.msra.mxu0 %v10370_v31  ;;  %8659 = vmatprep.mubr.msk.f32.mxu0 %vm11736_vm0, %v11737_v9 }
  0x4b   : > { %10372 = vmatprep.subr.bf16.mxu0 %v11735_v3 }
  0x4e   : > { %10374 = vmatpush3.bf16.msra.mxu0 %v10373_v36  ;;  %v922_v36 = vand.u32 4294901760, %v921_v25 }
  0x4f   : > { %10375 = vmatprep.subr.bf16.mxu0 %v11735_v3 }
  0x50   : > { %v12135_v14 = vpack.c.bf16 %v922_v36, %v915_v29 }
  0x52   : > { %10377 = vmatpush3.bf16.msra.mxu0 %v10376_v13 }
  0x53   : > { %10378 = vmatprep.subr.bf16.mxu0 %v11735_v3 }
  0x55   : > { %8660 = vmatmul.mubr.f32.vlgmr.msra.gmra.mrb[0].mxu0 %v11879_v33 }
  0x56   : > { %10380 = vmatpush3.bf16.msra.mxu0 %v11833_v12  ;;  %8674 = vmatprep.mubr.msk.f32.mxu0 %vm11736_vm0, %v11737_v9  ;;  %v183_v12 = vld [vmem:[%s13741_s1 + $0x80] sm:$0xff] }
  0x57   : > { %10381 = vmatprep.subr.bf16.mxu0 %v11735_v3  ;;  %v766_v15 = vand.u32 4294901760, %v183_v12 }
  0x59   : > { %v12097_v40 = vsub.f32 %v183_v12, %v766_v15 }
  0x5a   : > { %10383 = vmatpush3.bf16.msra.mxu0 %v11845_v18  ;;  %v12067_v18 = vpack.c.bf16 %v769_v16, %v766_v15 }
  0x5b   : > { %10384 = vmatprep.subr.bf16.mxu0 %v11735_v3  ;;  %v899_v43 = vand.u32 4294901760, %v12097_v40  ;;  %v12141_v21 = vpack.c.bf16 %v12099_v41, %v12097_v40 }
  0x5c   : > { %10404 = vmatpush3.bf16.msra.mxu1 %v12067_v18 }
  0x5d   : > { %10405 = vmatprep.subr.bf16.mxu1 %v11735_v3  ;;  %v900_v49 = vsub.f32 %v12097_v40, %v899_v43 }
  0x5e   : > { %10386 = vmatpush3.bf16.msra.mxu0 %v11865_v28  ;;  %v188_v28 = vld [vmem:[%s13741_s1 + $0xa8] sm:$0xff] }
  0x5f   : > { %10531 = vmatprep.subr.bf16.mxu0 %v11735_v3  ;;  %v781_v37 = vand.u32 4294901760, %v188_v28  ;;  %v901_v57 = vand.u32 4294901760, %v900_v49  ;;  %v12166_v49 = vsub.f32 %v11884_v34, %v742_v45 }
  0x60   : > { %10407 = vmatpush3.bf16.msra.mxu1 %v12079_v24 }
  0x61   : > { %8675 = vmatmul.mubr.f32.vlgmr.msra.gmra.mrb[0].mxu0 %v11879_v33  ;;  %v778_v33 = vand.u32 4294901760, %v187_v26  ;;  %10408 = vmatprep.subr.bf16.mxu1 %v11735_v3  ;;  %v12115_v2 = vpack.c.bf16 %v908_v58, %v901_v57  ;;  %v12122_v17 = vsub.f32 %v188_v28, %v781_v37  ;;  %v12159_v28 = vsub.f32 %v11876_v32, %v739_v42 }
  0x62   : > { %10533 = vmatpush3.bf16.msra.mxu0 %v11923_v50  ;;  %8919 = vmatprep.mubr.msk.f32.mxu0 %vm11736_vm0, %v11737_v9  ;;  %v843_v34 = vand.u32 4294901760, %v12166_v49  ;;  %v12194_v58 = vsub.f32 %v11915_v48, %v751_v55  ;;  %v857_v48 = vand.u32 4294901760, %v12189_v46  ;;  %v12214_v55 = vsub.f32 %v11947_v60, %v754_v0 }
  0x63   : > { %10534 = vmatprep.subr.bf16.mxu0 %v11735_v3  ;;  %v12091_v39 = vpack.c.bf16 %v781_v37, %v778_v33  ;;  %v12120_v5 = vsub.f32 %v187_v26, %v778_v33  ;;  %v13744_v31 = vand.u32 4294901760, %v12122_v17  ;;  %v12154_v26 = vsub.f32 %v11862_v27, %v736_v38  ;;  %v7733_v27 = vld [vmem:[%s13741_s1 + $0xb0] ss:$0 sm:$0xff] }
  0x64   : > { %v836_v37 = vand.u32 4294901760, %v12159_v28  ;;  %v844_v36 = vsub.f32 %v12166_v49, %v843_v34  ;;  %v864_v54 = vand.u32 4294901760, %v12194_v58  ;;  %v858_v60 = vsub.f32 %v12189_v46, %v857_v48 }
  0x65   : > { %10410 = vmatpush3.bf16.msra.mxu1 %v12091_v39  ;;  %v927_v30 = vand.u32 4294901760, %v12120_v5  ;;  %v935_v12 = vsub.f32 %v12122_v17, %v13744_v31  ;;  %v12149_v23 = vpack.c.bf16 %v12122_v17, %v12120_v5  ;;  %v829_v33 = vand.u32 4294901760, %v12154_v26 }
  0x66   : > { %10536 = vmatpush3.bf16.msra.mxu0 %v11936_v53  ;;  %10411 = vmatprep.subr.bf16.mxu1 %v11735_v3  ;;  %v837_v42 = vsub.f32 %v12159_v28, %v836_v37  ;;  %v865_v0 = vsub.f32 %v12194_v58, %v864_v54  ;;  %v13753_v40 = vand.u32 4294901760, %v12122_v17 }
  0x67   : > { %10537 = vmatprep.subr.bf16.mxu0 %v11735_v3  ;;  %v928_v13 = vsub.f32 %v12120_v5, %v927_v30  ;;  %v936_v16 = vand.u32 4294901760, %v935_v12  ;;  %v830_v38 = vsub.f32 %v12154_v26, %v829_v33  ;;  %v12219_v12 = vsub.f32 %v11952_v61, %v757_v1 }
  0x68   : > { %v838_v29 = vand.u32 4294901760, %v837_v42  ;;  %v871_v61 = vand.u32 4294901760, %v12214_v55  ;;  %v12238_v42 = vsub.f32 %v11968_v6, %v760_v10  ;;  %v12406_v41 = vpack.c.bf16 %v13753_v40, %v927_v30 }
  0x69   : > { %v929_v15 = vand.u32 4294901760, %v928_v13  ;;  %v831_v25 = vand.u32 4294901760, %v830_v38  ;;  %v852_v38 = vand.u32 4294901760, %v851_v47  ;;  %v878_v1 = vand.u32 4294901760, %v12219_v12 }
  0x6a   : > { %10539 = vmatpush3.bf16.msra.mxu0 %v11959_v63  ;;  %v866_v47 = vand.u32 4294901760, %v865_v0  ;;  %v872_v31 = vsub.f32 %v12214_v55, %v871_v61  ;;  %v885_v10 = vand.u32 4294901760, %v12238_v42 }
  0x6b   : > { %10540 = vmatprep.subr.bf16.mxu0 %v11735_v3  ;;  %v12137_v20 = vpack.c.bf16 %v936_v16, %v929_v15  ;;  %v12222_v16 = vpack.c.bf16 %v838_v29, %v831_v25  ;;  %v879_v6 = vsub.f32 %v12219_v12, %v878_v1 }
  0x6e   : > { %10542 = vmatpush3.bf16.msra.mxu0 %v11982_v8 }
  0x6f   : > { %10543 = vmatprep.subr.bf16.mxu0 %v11735_v3 }
  0x72   : > { %10545 = vmatpush3.bf16.msra.mxu0 %v11993_v19 }
  0x73   : > { %10546 = vmatprep.subr.bf16.mxu0 %v11735_v3 }
  0x76   : > { %10548 = vmatpush3.bf16.msra.mxu0 %v12067_v18 }
  0x77   : > { %10549 = vmatprep.subr.bf16.mxu0 %v11735_v3 }
  0x7a   : > { %10551 = vmatpush3.bf16.msra.mxu0 %v12079_v24 }
  0x7b   : > { %10552 = vmatprep.subr.bf16.mxu0 %v11735_v3 }
  0x7e   : > { %10554 = vmatpush3.bf16.msra.mxu0 %v12091_v39 }
  0x7f   : > { %10555 = vmatprep.subr.bf16.mxu0 %v11735_v3 }
 0x134   : > { %v731_v32 = vpop.f32.mrb[0].mxu0 }
 0x135   : > { %v12183_v45 = vadd.f32 %v7733_v27, %v731_v32  ;;  %v8676_v57 = vpop.f32.mrb[1].mxu0  ;;  %v845_v27 = vand.u32 4294901760, %v844_v36  ;;  %v859_v36 = vand.u32 4294901760, %v858_v60 }
 0x136   : > { %v12243_v57 = vsub.f32 %v11973_v7, %v763_v11 }
 0x137   : > { %v12197_v4 = vand.u32 4294901760, %v12183_v45  ;;  %v12245_v29 = vpack.c.bf16 %v852_v38, %v845_v27  ;;  %v12259_v11 = vpack.c.bf16 %v866_v47, %v859_v36  ;;  %v873_v27 = vand.u32 4294901760, %v872_v31 }
 0x138   : > { %v892_v7 = vand.u32 4294901760, %v12243_v57  ;;  %v886_v38 = vsub.f32 %v12238_v42, %v885_v10  ;;  %v12286_v47 = vpack.c.bf16 %v12159_v28, %v12154_v26  ;;  %v12366_v26 = vpack.c.bf16 %v864_v54, %v857_v48  ;;  %v200_v48 = vld [vmem:[%s13742_s2 + $0x40] sm:$0xff]  ;;  %v201_v54 = vld [vmem:[%s13742_s2 + $0x48] sm:$0xff] }
 0x139   : > { %v12204_v13 = vsub.f32 %v12183_v45, %v12197_v4  ;;  %v12374_v28 = vpack.c.bf16 %v878_v1, %v871_v61  ;;  %v203_v61 = vld [vmem:[%s13742_s2 + $0x58] sm:$0xff] }
 0x13a   : > { %v893_v60 = vsub.f32 %v12243_v57, %v892_v7 }
 0x13b   : > { %v818_v15 = vand.u32 4294901760, %v12204_v13 }
 0x13c   : > { %v894_v36 = vand.u32 4294901760, %v893_v60  ;;  %v12346_v60 = vpack.c.bf16 %v836_v37, %v829_v33  ;;  %v12382_v33 = vpack.c.bf16 %v892_v7, %v885_v10  ;;  %v12390_v37 = vpack.c.bf16 %v906_v44, %v899_v43 }
 0x13d   : > { %v819_v32 = vsub.f32 %v12204_v13, %v818_v15 }
 0x13f   : > { %v820_v25 = vand.u32 4294901760, %v819_v32  ;;  %v880_v32 = vand.u32 4294901760, %v879_v6  ;;  %v12293_v6 = vpack.c.bf16 %v12171_v51, %v12166_v49  ;;  %v12398_v49 = vpack.c.bf16 %v920_v62, %v913_v59  ;;  %v192_v51 = vld [vmem:[%s13742_s2] sm:$0xff] }
 0x141   : > { %8710 = vmatmul.mubr.f32.vlgmr.msra.gmra.mrb[0].mxu1 %v820_v25  ;;  %v12270_v0 = vpack.c.bf16 %v880_v32, %v873_v27  ;;  %v887_v25 = vand.u32 4294901760, %v886_v38  ;;  %v12301_v27 = vpack.c.bf16 %v12194_v58, %v12189_v46  ;;  %v12307_v32 = vpack.c.bf16 %v12219_v12, %v12214_v55  ;;  %v199_v46 = vld [vmem:[%s13742_s2 + $0x38] sm:$0xff] }
 0x142   : > { %10413 = vmatpush3.bf16.msra.mxu1 %v12222_v16  ;;  %8744 = vmatprep.mubr.msk.f32.mxu1 %vm11736_vm0, %v11737_v9  ;;  %v12313_v38 = vpack.c.bf16 %v12243_v57, %v12238_v42  ;;  %v2056_v55 = vand.u32 4294901760, %v200_v48  ;;  %v2059_v12 = vand.u32 4294901760, %v201_v54  ;;  %v2065_v42 = vand.u32 4294901760, %v203_v61 }
 0x143   : > { %10414 = vmatprep.subr.bf16.mxu1 %v11735_v3  ;;  %v12274_v31 = vpack.c.bf16 %v894_v36, %v887_v25  ;;  %v12356_v25 = vpack.c.bf16 %v850_v35, %v843_v34  ;;  %v206_v36 = vld [vmem:[%s13742_s2 + $0x70] sm:$0xff] }
 0x146   : > { %10416 = vmatpush3.bf16.msra.mxu1 %v12245_v29 }
 0x147   : > { %10417 = vmatprep.subr.bf16.mxu1 %v11735_v3 }
 0x14a   : > { %10419 = vmatpush3.bf16.msra.mxu1 %v12259_v11 }
 0x14b   : > { %10420 = vmatprep.subr.bf16.mxu1 %v11735_v3 }
 0x14e   : > { %10422 = vmatpush3.bf16.msra.mxu1 %v12270_v0 }
 0x14f   : > { %10423 = vmatprep.subr.bf16.mxu1 %v11735_v3 }
 0x152   : > { %10425 = vmatpush3.bf16.msra.mxu1 %v12274_v31 }
 0x153   : > { %10426 = vmatprep.subr.bf16.mxu1 %v11735_v3 }
 0x156   : > { %10428 = vmatpush3.bf16.msra.mxu1 %v12115_v2 }
 0x157   : > { %10429 = vmatprep.subr.bf16.mxu1 %v11735_v3 }
 0x15a   : > { %10431 = vmatpush3.bf16.msra.mxu1 %v12135_v14 }
 0x15b   : > { %10432 = vmatprep.subr.bf16.mxu1 %v11735_v3 }
 0x15e   : > { %10434 = vmatpush3.bf16.msra.mxu1 %v12137_v20 }
 0x15f   : > { %10435 = vmatprep.subr.bf16.mxu1 %v11735_v3 }
 0x161   : > { %8745 = vmatmul.mubr.f32.vlgmr.msra.gmra.mrb[0].mxu1 %v12197_v4 }
 0x162   : > { %10437 = vmatpush3.bf16.msra.mxu1 %v12286_v47  ;;  %8779 = vmatprep.mubr.msk.f32.mxu1 %vm11736_vm0, %v11737_v9 }
 0x163   : > { %10438 = vmatprep.subr.bf16.mxu1 %v11735_v3 }
 0x166   : > { %10440 = vmatpush3.bf16.msra.mxu1 %v12293_v6 }
 0x167   : > { %10441 = vmatprep.subr.bf16.mxu1 %v11735_v3 }
 0x16a   : > { %10443 = vmatpush3.bf16.msra.mxu1 %v12301_v27 }
 0x16b   : > { %10444 = vmatprep.subr.bf16.mxu1 %v11735_v3 }
 0x16e   : > { %10446 = vmatpush3.bf16.msra.mxu1 %v12307_v32 }
 0x16f   : > { %10447 = vmatprep.subr.bf16.mxu1 %v11735_v3 }
 0x172   : > { %10449 = vmatpush3.bf16.msra.mxu1 %v12313_v38 }
 0x173   : > { %10450 = vmatprep.subr.bf16.mxu1 %v11735_v3 }
 0x176   : > { %10452 = vmatpush3.bf16.msra.mxu1 %v12141_v21 }
 0x177   : > { %10453 = vmatprep.subr.bf16.mxu1 %v11735_v3 }
 0x17a   : > { %10455 = vmatpush3.bf16.msra.mxu1 %v12145_v22 }
 0x17b   : > { %10456 = vmatprep.subr.bf16.mxu1 %v11735_v3 }
 0x17e   : > { %10458 = vmatpush3.bf16.msra.mxu1 %v12149_v23 }
 0x17f   : > { %10459 = vmatprep.subr.bf16.mxu1 %v11735_v3 }
 0x181   : > { %8780 = vmatmul.mubr.f32.vlgmr.msra.gmra.mrb[0].mxu1 %v12204_v13 }
 0x182   : > { %10461 = vmatpush3.bf16.msra.mxu1 %v11923_v50  ;;  %8814 = vmatprep.mubr.msk.f32.mxu1 %vm11736_vm0, %v11737_v9 }
 0x183   : > { %10462 = vmatprep.subr.bf16.mxu1 %v11735_v3 }
 0x186   : > { %10464 = vmatpush3.bf16.msra.mxu1 %v11936_v53 }
 0x187   : > { %10465 = vmatprep.subr.bf16.mxu1 %v11735_v3 }
 0x18a   : > { %10467 = vmatpush3.bf16.msra.mxu1 %v11959_v63 }
 0x18b   : > { %10468 = vmatprep.subr.bf16.mxu1 %v11735_v3 }
 0x18e   : > { %10470 = vmatpush3.bf16.msra.mxu1 %v11982_v8 }
 0x18f   : > { %10471 = vmatprep.subr.bf16.mxu1 %v11735_v3 }
 0x192   : > { %10473 = vmatpush3.bf16.msra.mxu1 %v11993_v19 }
 0x193   : > { %10474 = vmatprep.subr.bf16.mxu1 %v11735_v3 }
 0x196   : > { %10476 = vmatpush3.bf16.msra.mxu1 %v12067_v18 }
 0x197   : > { %10477 = vmatprep.subr.bf16.mxu1 %v11735_v3 }
 0x19a   : > { %10479 = vmatpush3.bf16.msra.mxu1 %v12079_v24 }
 0x19b   : > { %10480 = vmatprep.subr.bf16.mxu1 %v11735_v3 }
 0x19e   : > { %10482 = vmatpush3.bf16.msra.mxu1 %v12091_v39 }
 0x19f   : > { %10483 = vmatprep.subr.bf16.mxu1 %v11735_v3 }
 0x1a1   : > { %8815 = vmatmul.mubr.f32.vlgmr.msra.gmra.mrb[0].mxu1 %v818_v15  ;;  %v12595_v15 = vpack.c.bf16 %v2059_v12, %v2056_v55 }
 0x1a2   : > { %10485 = vmatpush3.bf16.msra.mxu1 %v12346_v60  ;;  %8849 = vmatprep.mubr.msk.f32.mxu1 %vm11736_vm0, %v11737_v9 }
 0x1a3   : > { %10486 = vmatprep.subr.bf16.mxu1 %v11735_v3 }
 0x1a6   : > { %10488 = vmatpush3.bf16.msra.mxu1 %v12356_v25 }
 0x1a7   : > { %10489 = vmatprep.subr.bf16.mxu1 %v11735_v3 }
 0x1aa   : > { %10491 = vmatpush3.bf16.msra.mxu1 %v12366_v26 }
 0x1ab   : > { %10492 = vmatprep.subr.bf16.mxu1 %v11735_v3 }
 0x1ae   : > { %10494 = vmatpush3.bf16.msra.mxu1 %v12374_v28 }
 0x1af   : > { %10495 = vmatprep.subr.bf16.mxu1 %v11735_v3 }
 0x1b2   : > { %10497 = vmatpush3.bf16.msra.mxu1 %v12382_v33 }
 0x1b3   : > { %10498 = vmatprep.subr.bf16.mxu1 %v11735_v3 }
 0x1b6   : > { %10500 = vmatpush3.bf16.msra.mxu1 %v12390_v37 }
 0x1b7   : > { %10501 = vmatprep.subr.bf16.mxu1 %v11735_v3 }
 0x1ba   : > { %10503 = vmatpush3.bf16.msra.mxu1 %v12398_v49 }
 0x1bb   : > { %10504 = vmatprep.subr.bf16.mxu1 %v11735_v3 }
 0x1be   : > { %10506 = vmatpush3.bf16.msra.mxu1 %v12406_v41 }
 0x1bf   : > { %10507 = vmatprep.subr.bf16.mxu1 %v11735_v3 }
 0x1c1   : > { %8850 = vmatmul.mubr.f32.vlgmr.msra.gmra.mrb[0].mxu1 %v12197_v4 }
 0x1c2   : > { %10509 = vmatpush3.bf16.msra.mxu1 %v11923_v50  ;;  %8884 = vmatprep.mubr.msk.f32.mxu1 %vm11736_vm0, %v11737_v9 }
 0x1c3   : > { %10510 = vmatprep.subr.bf16.mxu1 %v11735_v3 }
 0x1c6   : > { %10512 = vmatpush3.bf16.msra.mxu1 %v11936_v53 }
 0x1c7   : > { %10513 = vmatprep.subr.bf16.mxu1 %v11735_v3 }
 0x1ca   : > { %10515 = vmatpush3.bf16.msra.mxu1 %v11959_v63 }
 0x1cb   : > { %10516 = vmatprep.subr.bf16.mxu1 %v11735_v3 }
 0x1ce   : > { %10518 = vmatpush3.bf16.msra.mxu1 %v11982_v8 }
 0x1cf   : > { %10519 = vmatprep.subr.bf16.mxu1 %v11735_v3 }
 0x1d2   : > { %10521 = vmatpush3.bf16.msra.mxu1 %v11993_v19 }
 0x1d3   : > { %10522 = vmatprep.subr.bf16.mxu1 %v11735_v3 }
 0x1d6   : > { %10524 = vmatpush3.bf16.msra.mxu1 %v12067_v18 }
 0x1d7   : > { %10525 = vmatprep.subr.bf16.mxu1 %v11735_v3 }
 0x1da   : > { %10527 = vmatpush3.bf16.msra.mxu1 %v12079_v24 }
 0x1db   : > { %10528 = vmatprep.subr.bf16.mxu1 %v11735_v3 }
 0x1de   : > { %10530 = vmatpush3.bf16.msra.mxu1 %v12091_v39 }
 0x1df   : > { %10675 = vmatprep.subr.bf16.mxu1 %v11735_v3 }
 0x1e1   : > { %8885 = vmatmul.mubr.f32.vlgmr.msra.gmra.mrb[0].mxu1 %v12197_v4  ;;  %v2053_v4 = vand.u32 4294901760, %v199_v46 }
 0x1e2   : > { %9129 = vmatprep.mubr.msk.f32.mxu1 %vm11736_vm0, %v11737_v9 }
 0x2b4   : > { %v1372_v43 = vpop.f32.mrb[0].mxu1 }
 0x2b5   : > { %v12434_v44 = vsub.f32 %v12183_v45, %v1372_v43  ;;  %v8886_v52 = vpop.f32.mrb[1].mxu1 }
 0x2b7   : > { %v1377_v56 = vmul.f32 %v12434_v44, %v12434_v44 }
 0x2b9   : > { %v12438_v59 = vand.u32 4294901760, %v1377_v56 }
 0x2bb   : > { %v12441_v62 = vsub.f32 %v1377_v56, %v12438_v59 }
 0x2bd   : > { %v1461_v5 = vand.u32 4294901760, %v12441_v62 }
 0x2bf   : > { %v1462_v17 = vsub.f32 %v12441_v62, %v1461_v5 }
 0x2c1   : > { %v1463_v30 = vand.u32 4294901760, %v1462_v17 }
 0x2c3   : > { %8920 = vmatmul.mubr.f32.vlgmr.msra.gmra.mrb[2].mxu0 %v1463_v30 }
 0x2c4   : > { %10557 = vmatpush3.bf16.msra.mxu0 %v12222_v16  ;;  %8954 = vmatprep.mubr.msk.f32.mxu0 %vm11736_vm0, %v11737_v9  ;;  %v202_v16 = vld [vmem:[%s13742_s2 + $0x50] sm:$0xff] }
 0x2c5   : > { %10558 = vmatprep.subr.bf16.mxu0 %v11735_v3  ;;  %v2062_v1 = vand.u32 4294901760, %v202_v16 }
 0x2c8   : > { %10560 = vmatpush3.bf16.msra.mxu0 %v12245_v29 }
 0x2c9   : > { %10561 = vmatprep.subr.bf16.mxu0 %v11735_v3 }
 0x2cc   : > { %10563 = vmatpush3.bf16.msra.mxu0 %v12259_v11  ;;  %v204_v11 = vld [vmem:[%s13742_s2 + $0x60] sm:$0xff] }
 0x2cd   : > { %10564 = vmatprep.subr.bf16.mxu0 %v11735_v3 }
 0x2d0   : > { %10566 = vmatpush3.bf16.msra.mxu0 %v12270_v0  ;;  %v205_v0 = vld [vmem:[%s13742_s2 + $0x68] sm:$0xff] }
 0x2d1   : > { %10567 = vmatprep.subr.bf16.mxu0 %v11735_v3 }
 0x2d4   : > { %10569 = vmatpush3.bf16.msra.mxu0 %v12274_v31 }
 0x2d5   : > { %10570 = vmatprep.subr.bf16.mxu0 %v11735_v3 }
 0x2d8   : > { %10572 = vmatpush3.bf16.msra.mxu0 %v12115_v2  ;;  %v193_v2 = vld [vmem:[%s13742_s2 + $0x8] sm:$0xff] }
 0x2d9   : > { %10573 = vmatprep.subr.bf16.mxu0 %v11735_v3  ;;  %v2035_v34 = vand.u32 4294901760, %v193_v2 }
 0x2db   : > { %v12480_v35 = vsub.f32 %v193_v2, %v2035_v34 }
 0x2dc   : > { %10575 = vmatpush3.bf16.msra.mxu0 %v12135_v14  ;;  %v2032_v14 = vand.u32 4294901760, %v192_v51 }
 0x2dd   : > { %10576 = vmatprep.subr.bf16.mxu0 %v11735_v3 }
 0x2de   : > { %v12478_v45 = vsub.f32 %v192_v51, %v2032_v14 }
 0x2e0   : > { %10578 = vmatpush3.bf16.msra.mxu0 %v12137_v20  ;;  %v12476_v20 = vpack.c.bf16 %v2035_v34, %v2032_v14  ;;  %v2125_v56 = vand.u32 4294901760, %v12478_v45 }
 0x2e1   : > { %10579 = vmatprep.subr.bf16.mxu0 %v11735_v3 }
 0x2e2   : > { %10677 = vmatpush3.bf16.msra.mxu1 %v12476_v20 }
 0x2e3   : > { %8955 = vmatmul.mubr.f32.vlgmr.msra.gmra.mrb[2].mxu0 %v12438_v59  ;;  %10678 = vmatprep.subr.bf16.mxu1 %v11735_v3 }
 0x2e4   : > { %10581 = vmatpush3.bf16.msra.mxu0 %v12286_v47  ;;  %8989 = vmatprep.mubr.msk.f32.mxu0 %vm11736_vm0, %v11737_v9  ;;  %v12624_v47 = vsub.f32 %v199_v46, %v2053_v4 }
 0x2e5   : > { %10582 = vmatprep.subr.bf16.mxu0 %v11735_v3 }
 0x2e8   : > { %10584 = vmatpush3.bf16.msra.mxu0 %v12293_v6  ;;  %v12626_v6 = vsub.f32 %v200_v48, %v2056_v55  ;;  %v2174_v48 = vand.u32 4294901760, %v12624_v47 }
 0x2e9   : > { %10585 = vmatprep.subr.bf16.mxu0 %v11735_v3 }
 0x2ec   : > { %10587 = vmatpush3.bf16.msra.mxu0 %v12301_v27  ;;  %v12628_v27 = vsub.f32 %v201_v54, %v2059_v12  ;;  %v2175_v12 = vsub.f32 %v12624_v47, %v2174_v48 }
 0x2ed   : > { %10588 = vmatprep.subr.bf16.mxu0 %v11735_v3 }
 0x2f0   : > { %10590 = vmatpush3.bf16.msra.mxu0 %v12307_v32  ;;  %v207_v32 = vld [vmem:[%s13742_s2 + $0x78] sm:$0xff] }
 0x2f1   : > { %10591 = vmatprep.subr.bf16.mxu0 %v11735_v3 }
 0x2f4   : > { %10593 = vmatpush3.bf16.msra.mxu0 %v12313_v38  ;;  %v12633_v38 = vpack.c.bf16 %v2065_v42, %v2062_v1 }
 0x2f5   : > { %10594 = vmatprep.subr.bf16.mxu0 %v11735_v3 }
 0x2f8   : > { %10596 = vmatpush3.bf16.msra.mxu0 %v12141_v21 }
 0x2f9   : > { %10597 = vmatprep.subr.bf16.mxu0 %v11735_v3 }
 0x2fc   : > { %10599 = vmatpush3.bf16.msra.mxu0 %v12145_v22 }
 0x2fd   : > { %10600 = vmatprep.subr.bf16.mxu0 %v11735_v3 }
 0x300   : > { %10602 = vmatpush3.bf16.msra.mxu0 %v12149_v23  ;;  %v198_v23 = vld [vmem:[%s13742_s2 + $0x30] sm:$0xff] }
 0x301   : > { %10603 = vmatprep.subr.bf16.mxu0 %v11735_v3  ;;  %v2050_v58 = vand.u32 4294901760, %v198_v23 }
 0x303   : > { %8990 = vmatmul.mubr.f32.vlgmr.msra.gmra.mrb[2].mxu0 %v12441_v62  ;;  %v12585_v13 = vpack.c.bf16 %v2053_v4, %v2050_v58  ;;  %v12622_v31 = vsub.f32 %v198_v23, %v2050_v58 }
 0x304   : > { %10605 = vmatpush3.bf16.msra.mxu0 %v11923_v50  ;;  %9024 = vmatprep.mubr.msk.f32.mxu0 %vm11736_vm0, %v11737_v9 }
 0x305   : > { %10606 = vmatprep.subr.bf16.mxu0 %v11735_v3  ;;  %v2167_v4 = vand.u32 4294901760, %v12622_v31 }
 0x307   : > { %v2168_v55 = vsub.f32 %v12622_v31, %v2167_v4 }
 0x308   : > { %10608 = vmatpush3.bf16.msra.mxu0 %v11936_v53 }
 0x309   : > { %10609 = vmatprep.subr.bf16.mxu0 %v11735_v3 }
 0x30c   : > { %10611 = vmatpush3.bf16.msra.mxu0 %v11959_v63 }
 0x30d   : > { %10612 = vmatprep.subr.bf16.mxu0 %v11735_v3 }
 0x310   : > { %10614 = vmatpush3.bf16.msra.mxu0 %v11982_v8 }
 0x311   : > { %10615 = vmatprep.subr.bf16.mxu0 %v11735_v3 }
 0x314   : > { %10617 = vmatpush3.bf16.msra.mxu0 %v11993_v19 }
 0x315   : > { %10618 = vmatprep.subr.bf16.mxu0 %v11735_v3 }
 0x318   : > { %10620 = vmatpush3.bf16.msra.mxu0 %v12067_v18 }
 0x319   : > { %10621 = vmatprep.subr.bf16.mxu0 %v11735_v3 }
 0x31c   : > { %10623 = vmatpush3.bf16.msra.mxu0 %v12079_v24 }
 0x31d   : > { %10624 = vmatprep.subr.bf16.mxu0 %v11735_v3 }
 0x320   : > { %10626 = vmatpush3.bf16.msra.mxu0 %v12091_v39 }
 0x321   : > { %10627 = vmatprep.subr.bf16.mxu0 %v11735_v3 }
 0x323   : > { %9025 = vmatmul.mubr.f32.vlgmr.msra.gmra.mrb[2].mxu0 %v1461_v5  ;;  %v2126_v5 = vsub.f32 %v12478_v45, %v2125_v56 }
 0x324   : > { %10629 = vmatpush3.bf16.msra.mxu0 %v12346_v60  ;;  %9059 = vmatprep.mubr.msk.f32.mxu0 %vm11736_vm0, %v11737_v9  ;;  %v12635_v60 = vsub.f32 %v202_v16, %v2062_v1  ;;  %v2169_v16 = vand.u32 4294901760, %v2168_v55  ;;  %v2181_v1 = vand.u32 4294901760, %v12626_v6 }
 0x325   : > { %10630 = vmatprep.subr.bf16.mxu0 %v11735_v3  ;;  %v2127_v30 = vand.u32 4294901760, %v2126_v5 }
 0x328   : > { %10632 = vmatpush3.bf16.msra.mxu0 %v12356_v25  ;;  %v12637_v25 = vsub.f32 %v203_v61, %v2065_v42  ;;  %v2176_v61 = vand.u32 4294901760, %v2175_v12  ;;  %v2188_v42 = vand.u32 4294901760, %v12628_v27 }
 0x329   : > { %10633 = vmatprep.subr.bf16.mxu0 %v11735_v3 }
 0x32c   : > { %10635 = vmatpush3.bf16.msra.mxu0 %v12366_v26  ;;  %v2068_v26 = vand.u32 4294901760, %v204_v11 }
 0x32d   : > { %10636 = vmatprep.subr.bf16.mxu0 %v11735_v3 }
 0x330   : > { %10638 = vmatpush3.bf16.msra.mxu0 %v12374_v28  ;;  %v2071_v28 = vand.u32 4294901760, %v205_v0 }
 0x331   : > { %10639 = vmatprep.subr.bf16.mxu0 %v11735_v3 }
 0x332   : > { %v12643_v40 = vpack.c.bf16 %v2071_v28, %v2068_v26 }
 0x334   : > { %10641 = vmatpush3.bf16.msra.mxu0 %v12382_v33  ;;  %v2074_v33 = vand.u32 4294901760, %v206_v36 }
 0x335   : > { %10642 = vmatprep.subr.bf16.mxu0 %v11735_v3 }
 0x336   : > { %v12647_v43 = vsub.f32 %v206_v36, %v2074_v33  ;;  %v2189_v36 = vsub.f32 %v12628_v27, %v2188_v42 }
 0x338   : > { %10644 = vmatpush3.bf16.msra.mxu0 %v12390_v37  ;;  %v12640_v37 = vsub.f32 %v204_v11, %v2068_v26  ;;  %v10709_v11 = vpack.c.bf16 %v2176_v61, %v2169_v16  ;;  %v2190_v26 = vand.u32 4294901760, %v2189_v36 }
 0x339   : > { %10645 = vmatprep.subr.bf16.mxu0 %v11735_v3 }
 0x33c   : > { %10647 = vmatpush3.bf16.msra.mxu0 %v12398_v49  ;;  %v2077_v49 = vand.u32 4294901760, %v207_v32 }
 0x33d   : > { %10648 = vmatprep.subr.bf16.mxu0 %v11735_v3 }
 0x33e   : > { %v12649_v52 = vsub.f32 %v207_v32, %v2077_v49  ;;  %v12654_v62 = vpack.c.bf16 %v2077_v49, %v2074_v33  ;;  %v13749_v33 = vand.u32 4294901760, %v12637_v25 }
 0x340   : > { %10650 = vmatpush3.bf16.msra.mxu0 %v12406_v41  ;;  %v12645_v41 = vsub.f32 %v205_v0, %v2071_v28  ;;  %v2182_v0 = vsub.f32 %v12626_v6, %v2181_v1  ;;  %v13750_v28 = vand.u32 4294901760, %v12635_v60  ;;  %v13745_v55 = vand.u32 4294901760, %v12649_v52 }
 0x341   : > { %10651 = vmatprep.subr.bf16.mxu0 %v11735_v3 }
 0x342   : > { %v2183_v32 = vand.u32 4294901760, %v2182_v0  ;;  %v2196_v5 = vsub.f32 %v12635_v60, %v13750_v28  ;;  %v2231_v61 = vsub.f32 %v12649_v52, %v13745_v55 }
 0x343   : > { %9060 = vmatmul.mubr.f32.vlgmr.msra.gmra.mrb[2].mxu0 %v12438_v59 }
 0x344   : > { %10653 = vmatpush3.bf16.msra.mxu0 %v11923_v50  ;;  %9094 = vmatprep.mubr.msk.f32.mxu0 %vm11736_vm0, %v11737_v9  ;;  %v194_v50 = vld [vmem:[%s13742_s2 + $0x10] sm:$0xff]  ;;  %v10712_v49 = vpack.c.bf16 %v2190_v26, %v2183_v32  ;;  %v2232_v36 = vand.u32 4294901760, %v2231_v61  ;;  %v10724_v26 = vpack.c.bf16 %v12480_v35, %v12478_v45 }
 0x345   : > { %10654 = vmatprep.subr.bf16.mxu0 %v11735_v3 }
 0x348   : > { %10656 = vmatpush3.bf16.msra.mxu0 %v11936_v53  ;;  %v195_v53 = vld [vmem:[%s13742_s2 + $0x18] sm:$0xff] }
 0x349   : > { %10657 = vmatprep.subr.bf16.mxu0 %v11735_v3 }
 0x34c   : > { %10659 = vmatpush3.bf16.msra.mxu0 %v11959_v63  ;;  %v2038_v63 = vand.u32 4294901760, %v194_v50 }
 0x34d   : > { %10660 = vmatprep.subr.bf16.mxu0 %v11735_v3 }
 0x34e   : > { %v12605_v57 = vsub.f32 %v194_v50, %v2038_v63 }
 0x350   : > { %10662 = vmatpush3.bf16.msra.mxu0 %v11982_v8  ;;  %v2041_v8 = vand.u32 4294901760, %v195_v53  ;;  %v2139_v2 = vand.u32 4294901760, %v12605_v57 }
 0x351   : > { %10663 = vmatprep.subr.bf16.mxu0 %v11735_v3 }
 0x352   : > { %v12607_v29 = vsub.f32 %v195_v53, %v2041_v8  ;;  %v2140_v50 = vsub.f32 %v12605_v57, %v2139_v2 }
 0x354   : > { %10665 = vmatpush3.bf16.msra.mxu0 %v11993_v19  ;;  %v12565_v19 = vpack.c.bf16 %v2041_v8, %v2038_v63  ;;  %v2146_v14 = vand.u32 4294901760, %v12607_v29  ;;  %v2141_v63 = vand.u32 4294901760, %v2140_v50  ;;  %v13748_v50 = vand.u32 4294901760, %v12640_v37 }
 0x355   : > { %10666 = vmatprep.subr.bf16.mxu0 %v11735_v3 }
 0x356   : > { %10680 = vmatpush3.bf16.msra.mxu1 %v12565_v19  ;;  %v2147_v53 = vsub.f32 %v12607_v29, %v2146_v14 }
 0x357   : > { %10681 = vmatprep.subr.bf16.mxu1 %v11735_v3 }
 0x358   : > { %10668 = vmatpush3.bf16.msra.mxu0 %v12067_v18  ;;  %v196_v18 = vld [vmem:[%s13742_s2 + $0x20] sm:$0xff]  ;;  %v2148_v8 = vand.u32 4294901760, %v2147_v53  ;;  %v13747_v53 = vand.u32 4294901760, %v12645_v41 }
 0x359   : > { %10669 = vmatprep.subr.bf16.mxu0 %v11735_v3 }
 0x35c   : > { %10671 = vmatpush3.bf16.msra.mxu0 %v12079_v24  ;;  %v197_v24 = vld [vmem:[%s13742_s2 + $0x28] sm:$0xff] }
 0x35d   : > { %10672 = vmatprep.subr.bf16.mxu0 %v11735_v3  ;;  %v2047_v21 = vand.u32 4294901760, %v197_v24 }
 0x35f   : > { %v12611_v7 = vsub.f32 %v197_v24, %v2047_v21 }
 0x360   : > { %10674 = vmatpush3.bf16.msra.mxu0 %v12091_v39  ;;  %v2044_v39 = vand.u32 4294901760, %v196_v18 }
 0x361   : > { %10819 = vmatprep.subr.bf16.mxu0 %v11735_v3  ;;  %v2160_v24 = vand.u32 4294901760, %v12611_v7 }
 0x362   : > { %v12575_v22 = vpack.c.bf16 %v2047_v21, %v2044_v39  ;;  %v12609_v10 = vsub.f32 %v196_v18, %v2044_v39  ;;  %v12677_v39 = vpack.c.bf16 %v2148_v8, %v2141_v63  ;;  %v2210_v8 = vsub.f32 %v12640_v37, %v13748_v50 }
 0x363   : > { %9095 = vmatmul.mubr.f32.vlgmr.msra.gmra.mrb[2].mxu0 %v12438_v59  ;;  %v2132_v59 = vand.u32 4294901760, %v12480_v35  ;;  %v2161_v23 = vsub.f32 %v12611_v7, %v2160_v24 }
 0x364   : > { %9323 = vmatprep.mubr.msk.f32.mxu0 %vm11736_vm0, %v11737_v9  ;;  %10683 = vmatpush3.bf16.msra.mxu1 %v12575_v22  ;;  %v2153_v18 = vand.u32 4294901760, %v12609_v10 }
 0x365   : > { %10684 = vmatprep.subr.bf16.mxu1 %v11735_v3  ;;  %v2133_v17 = vsub.f32 %v12480_v35, %v2132_v59  ;;  %v2162_v58 = vand.u32 4294901760, %v2161_v23  ;;  %v2211_v23 = vand.u32 4294901760, %v2210_v8  ;;  %v10739_v8 = vpack.c.bf16 %v12637_v25, %v12635_v60 }
 0x366   : > { %v2154_v21 = vsub.f32 %v12609_v10, %v2153_v18  ;;  %v10778_v45 = vpack.c.bf16 %v2160_v24, %v2153_v18  ;;  %v10781_v35 = vpack.c.bf16 %v2174_v48, %v2167_v4 }
 0x367   : > { %v2134_v51 = vand.u32 4294901760, %v2133_v17  ;;  %v2203_v17 = vsub.f32 %v12637_v25, %v13749_v33 }
 0x368   : > { %10686 = vmatpush3.bf16.msra.mxu1 %v12585_v13  ;;  %v2155_v46 = vand.u32 4294901760, %v2154_v21  ;;  %v2217_v21 = vsub.f32 %v12645_v41, %v13747_v53 }
 0x369   : > { %10687 = vmatprep.subr.bf16.mxu1 %v11735_v3  ;;  %v12666_v34 = vpack.c.bf16 %v2134_v51, %v2127_v30  ;;  %v2197_v30 = vand.u32 4294901760, %v2196_v5  ;;  %v2204_v51 = vand.u32 4294901760, %v2203_v17  ;;  %v10727_v5 = vpack.c.bf16 %v12607_v29, %v12605_v57 }
 0x36a   : > { %v10706_v54 = vpack.c.bf16 %v2162_v58, %v2155_v46  ;;  %v2218_v46 = vand.u32 4294901760, %v2217_v21  ;;  %v13746_v58 = vand.u32 4294901760, %v12647_v43  ;;  %v10730_v17 = vpack.c.bf16 %v12611_v7, %v12609_v10 }
 0x36b   : > { %v10715_v63 = vpack.c.bf16 %v2204_v51, %v2197_v30  ;;  %v10733_v30 = vpack.c.bf16 %v12624_v47, %v12622_v31  ;;  %v10736_v51 = vpack.c.bf16 %v12628_v27, %v12626_v6  ;;  %v10742_v21 = vpack.c.bf16 %v12645_v41, %v12640_v37 }
 0x36c   : > { %10689 = vmatpush3.bf16.msra.mxu1 %v12595_v15  ;;  %v10718_v12 = vpack.c.bf16 %v2218_v46, %v2211_v23  ;;  %v2224_v16 = vsub.f32 %v12647_v43, %v13746_v58  ;;  %v10745_v23 = vpack.c.bf16 %v12649_v52, %v12647_v43  ;;  %v7735_v58 = vld [vmem:[%s13741_s1 + $0xb2] ss:$0 sm:$0xff]  ;;  %v10784_v57 = vpack.c.bf16 %v2188_v42, %v2181_v1 }
 0x36d   : > { %10690 = vmatprep.subr.bf16.mxu1 %v11735_v3  ;;  %v13754_v29 = vand.u32 4294901760, %v12635_v60  ;;  %v13755_v10 = vand.u32 4294901760, %v12637_v25  ;;  %v13756_v31 = vand.u32 4294901760, %v12640_v37  ;;  %v13757_v47 = vand.u32 4294901760, %v12645_v41  ;;  %v2682_v25 = vld [vmem:[%s13742_s2 + $0xa0] sm:$0xff]  ;;  %v2683_v37 = vld [vmem:[%s13742_s2 + $0xa8] sm:$0xff] }
 0x36e   : > { %v2225_v0 = vand.u32 4294901760, %v2224_v16  ;;  %v13758_v6 = vand.u32 4294901760, %v12647_v43  ;;  %v13759_v27 = vand.u32 4294901760, %v12649_v52  ;;  %v2708_v41 = vand.u32 4294901760, %v2682_v25  ;;  %v2684_v52 = vld [vmem:[%s13742_s2 + $0xb0] sm:$0xff] }
 0x36f   : > { %v10787_v7 = vpack.c.bf16 %v13755_v10, %v13754_v29  ;;  %v2711_v43 = vand.u32 4294901760, %v2683_v37  ;;  %v2714_v1 = vand.u32 4294901760, %v2684_v52 }
 0x370   : > { %10692 = vmatpush3.bf16.msra.mxu1 %v12633_v38  ;;  %v10721_v32 = vpack.c.bf16 %v2232_v36, %v2225_v0  ;;  %v7734_v36 = vld [vmem:[%s13741_s1 + $0xb1] ss:$0 sm:$0xff]  ;;  %v12890_v4 = vsub.f32 %v2682_v25, %v2708_v41 }
 0x371   : > { %10693 = vmatprep.subr.bf16.mxu1 %v11735_v3 }
 0x374   : > { %10695 = vmatpush3.bf16.msra.mxu1 %v12643_v40 }
 0x375   : > { %10696 = vmatprep.subr.bf16.mxu1 %v11735_v3 }
 0x378   : > { %10698 = vmatpush3.bf16.msra.mxu1 %v12654_v62 }
 0x379   : > { %10699 = vmatprep.subr.bf16.mxu1 %v11735_v3 }
 0x436   : > { %v2015_v46 = vpop.f32.mrb[2].mxu0 }
 0x437   : > { %v11468_v16 = vadd.f32 1e-05, %v2015_v46  ;;  %v9096_v61 = vpop.f32.mrb[3].mxu0 }
 0x439   : > { %11647 = vrsqrt.f32 %v11468_v16 }
 0x443   : > { %v11648_v0 = vpop.eup %11647 }
 0x444   : > { %v2020_v55 = vmul.f32 %v11648_v0, %v12434_v44  ;;  %v10772_v44 = vpack.c.bf16 %v2132_v59, %v2125_v56  ;;  %v10790_v56 = vpack.c.bf16 %v13757_v47, %v13756_v31  ;;  %v10793_v59 = vpack.c.bf16 %v13759_v27, %v13758_v6 }
 0x446   : > { %v2025_v53 = vmul.f32 %v7734_v36, %v2020_v55 }
 0x448   : > { %v2030_v50 = vadd.f32 %v7735_v58, %v2025_v53 }
 0x44a   : > { %v12748_v33 = vand.u32 4294901760, %v2030_v50 }
 0x44c   : > { %v2113_v28 = vsub.f32 %v2030_v50, %v12748_v33 }
 0x44e   : > { %v2114_v46 = vand.u32 4294901760, %v2113_v28 }
 0x450   : > { %v2115_v61 = vsub.f32 %v2113_v28, %v2114_v46 }
 0x452   : > { %v2116_v16 = vand.u32 4294901760, %v2115_v61 }
 0x454   : > { %9130 = vmatmul.mubr.f32.vlgmr.msra.gmra.mrb[2].mxu1 %v2116_v16 }
 0x455   : > { %10701 = vmatpush3.bf16.msra.mxu1 %v12666_v34  ;;  %9164 = vmatprep.mubr.msk.f32.mxu1 %vm11736_vm0, %v11737_v9  ;;  %v10775_v34 = vpack.c.bf16 %v2146_v14, %v2139_v2 }
 0x456   : > { %10702 = vmatprep.subr.bf16.mxu1 %v11735_v3 }
 0x459   : > { %10704 = vmatpush3.bf16.msra.mxu1 %v12677_v39 }
 0x45a   : > { %10705 = vmatprep.subr.bf16.mxu1 %v11735_v3 }
 0x45d   : > { %10707 = vmatpush3.bf16.msra.mxu1 %v10706_v54  ;;  %v12895_v54 = vsub.f32 %v2683_v37, %v2711_v43 }
 0x45e   : > { %10708 = vmatprep.subr.bf16.mxu1 %v11735_v3 }
 0x461   : > { %10710 = vmatpush3.bf16.msra.mxu1 %v10709_v11  ;;  %v12898_v11 = vsub.f32 %v2684_v52, %v2714_v1 }
 0x462   : > { %10711 = vmatprep.subr.bf16.mxu1 %v11735_v3 }
 0x465   : > { %10713 = vmatpush3.bf16.msra.mxu1 %v10712_v49 }
 0x466   : > { %10714 = vmatprep.subr.bf16.mxu1 %v11735_v3 }
 0x469   : > { %10716 = vmatpush3.bf16.msra.mxu1 %v10715_v63 }
 0x46a   : > { %10717 = vmatprep.subr.bf16.mxu1 %v11735_v3 }
 0x46d   : > { %10719 = vmatpush3.bf16.msra.mxu1 %v10718_v12 }
 0x46e   : > { %10720 = vmatprep.subr.bf16.mxu1 %v11735_v3 }
 0x471   : > { %10722 = vmatpush3.bf16.msra.mxu1 %v10721_v32 }
 0x472   : > { %10723 = vmatprep.subr.bf16.mxu1 %v11735_v3 }
 0x474   : > { %9165 = vmatmul.mubr.f32.vlgmr.msra.gmra.mrb[2].mxu1 %v12748_v33 }
 0x475   : > { %10725 = vmatpush3.bf16.msra.mxu1 %v10724_v26  ;;  %9199 = vmatprep.mubr.msk.f32.mxu1 %vm11736_vm0, %v11737_v9 }
 0x476   : > { %10726 = vmatprep.subr.bf16.mxu1 %v11735_v3 }
 0x479   : > { %10728 = vmatpush3.bf16.msra.mxu1 %v10727_v5 }
 0x47a   : > { %10729 = vmatprep.subr.bf16.mxu1 %v11735_v3 }
 0x47d   : > { %10731 = vmatpush3.bf16.msra.mxu1 %v10730_v17 }
 0x47e   : > { %10732 = vmatprep.subr.bf16.mxu1 %v11735_v3 }
 0x481   : > { %10734 = vmatpush3.bf16.msra.mxu1 %v10733_v30 }
 0x482   : > { %10735 = vmatprep.subr.bf16.mxu1 %v11735_v3 }
 0x485   : > { %10737 = vmatpush3.bf16.msra.mxu1 %v10736_v51 }
 0x486   : > { %10738 = vmatprep.subr.bf16.mxu1 %v11735_v3 }
 0x489   : > { %10740 = vmatpush3.bf16.msra.mxu1 %v10739_v8 }
 0x48a   : > { %10741 = vmatprep.subr.bf16.mxu1 %v11735_v3 }
 0x48d   : > { %10743 = vmatpush3.bf16.msra.mxu1 %v10742_v21  ;;  %v2809_v21 = vand.u32 4294901760, %v12890_v4 }
 0x48e   : > { %10744 = vmatprep.subr.bf16.mxu1 %v11735_v3 }
 0x48f   : > { %v2810_v36 = vsub.f32 %v12890_v4, %v2809_v21 }
 0x491   : > { %10746 = vmatpush3.bf16.msra.mxu1 %v10745_v23  ;;  %v2816_v23 = vand.u32 4294901760, %v12895_v54  ;;  %v2811_v61 = vand.u32 4294901760, %v2810_v36 }
 0x492   : > { %10747 = vmatprep.subr.bf16.mxu1 %v11735_v3 }
 0x494   : > { %9200 = vmatmul.mubr.f32.vlgmr.msra.gmra.mrb[2].mxu1 %v2113_v28 }
 0x495   : > { %10749 = vmatpush3.bf16.msra.mxu1 %v12476_v20  ;;  %9234 = vmatprep.mubr.msk.f32.mxu1 %vm11736_vm0, %v11737_v9 }
 0x496   : > { %10750 = vmatprep.subr.bf16.mxu1 %v11735_v3 }
 0x499   : > { %10752 = vmatpush3.bf16.msra.mxu1 %v12565_v19 }
 0x49a   : > { %10753 = vmatprep.subr.bf16.mxu1 %v11735_v3 }
 0x49d   : > { %10755 = vmatpush3.bf16.msra.mxu1 %v12575_v22 }
 0x49e   : > { %10756 = vmatprep.subr.bf16.mxu1 %v11735_v3 }
 0x4a1   : > { %10758 = vmatpush3.bf16.msra.mxu1 %v12585_v13 }
 0x4a2   : > { %10759 = vmatprep.subr.bf16.mxu1 %v11735_v3 }
 0x4a5   : > { %10761 = vmatpush3.bf16.msra.mxu1 %v12595_v15 }
 0x4a6   : > { %10762 = vmatprep.subr.bf16.mxu1 %v11735_v3 }
 0x4a9   : > { %10764 = vmatpush3.bf16.msra.mxu1 %v12633_v38 }
 0x4aa   : > { %10765 = vmatprep.subr.bf16.mxu1 %v11735_v3 }
 0x4ad   : > { %10767 = vmatpush3.bf16.msra.mxu1 %v12643_v40 }
 0x4ae   : > { %10768 = vmatprep.subr.bf16.mxu1 %v11735_v3 }
 0x4b1   : > { %10770 = vmatpush3.bf16.msra.mxu1 %v12654_v62 }
 0x4b2   : > { %10771 = vmatprep.subr.bf16.mxu1 %v11735_v3 }
 0x4b4   : > { %9235 = vmatmul.mubr.f32.vlgmr.msra.gmra.mrb[2].mxu1 %v2114_v46  ;;  %v2817_v46 = vsub.f32 %v12895_v54, %v2816_v23 }
 0x4b5   : > { %10773 = vmatpush3.bf16.msra.mxu1 %v10772_v44  ;;  %9269 = vmatprep.mubr.msk.f32.mxu1 %vm11736_vm0, %v11737_v9  ;;  %v2823_v44 = vand.u32 4294901760, %v12898_v11 }
 0x4b6   : > { %10774 = vmatprep.subr.bf16.mxu1 %v11735_v3  ;;  %v2818_v16 = vand.u32 4294901760, %v2817_v46 }
 0x4b9   : > { %10776 = vmatpush3.bf16.msra.mxu1 %v10775_v34 }
 0x4ba   : > { %10777 = vmatprep.subr.bf16.mxu1 %v11735_v3 }
 0x4bd   : > { %10779 = vmatpush3.bf16.msra.mxu1 %v10778_v45  ;;  %v10838_v45 = vpack.c.bf16 %v2818_v16, %v2811_v61 }
 0x4be   : > { %10780 = vmatprep.subr.bf16.mxu1 %v11735_v3 }
 0x4c1   : > { %10782 = vmatpush3.bf16.msra.mxu1 %v10781_v35  ;;  %v2824_v35 = vsub.f32 %v12898_v11, %v2823_v44 }
 0x4c2   : > { %10783 = vmatprep.subr.bf16.mxu1 %v11735_v3 }
 0x4c3   : > { %v2825_v29 = vand.u32 4294901760, %v2824_v35 }
 0x4c5   : > { %10785 = vmatpush3.bf16.msra.mxu1 %v10784_v57 }
 0x4c6   : > { %10786 = vmatprep.subr.bf16.mxu1 %v11735_v3 }
 0x4c9   : > { %10788 = vmatpush3.bf16.msra.mxu1 %v10787_v7 }
 0x4ca   : > { %10789 = vmatprep.subr.bf16.mxu1 %v11735_v3 }
 0x4cd   : > { %10791 = vmatpush3.bf16.msra.mxu1 %v10790_v56  ;;  %v10850_v56 = vpack.c.bf16 %v12895_v54, %v12890_v4  ;;  %v210_v4 = vld [vmem:[%s13742_s2 + $0x150] sm:$0xff] }
 0x4ce   : > { %10792 = vmatprep.subr.bf16.mxu1 %v11735_v3  ;;  %v3244_v54 = vand.u32 4294901760, %v210_v4 }
 0x4d1   : > { %10794 = vmatpush3.bf16.msra.mxu1 %v10793_v59 }
 0x4d2   : > { %10795 = vmatprep.subr.bf16.mxu1 %v11735_v3 }
 0x4d4   : > { %9270 = vmatmul.mubr.f32.vlgmr.msra.gmra.mrb[2].mxu1 %v12748_v33 }
 0x4d5   : > { %10797 = vmatpush3.bf16.msra.mxu1 %v12476_v20  ;;  %9304 = vmatprep.mubr.msk.f32.mxu1 %vm11736_vm0, %v11737_v9  ;;  %v2678_v20 = vld [vmem:[%s13742_s2 + $0x80] sm:$0xff] }
 0x4d6   : > { %10798 = vmatprep.subr.bf16.mxu1 %v11735_v3 }
 0x4d9   : > { %10800 = vmatpush3.bf16.msra.mxu1 %v12565_v19  ;;  %v2679_v19 = vld [vmem:[%s13742_s2 + $0x88] sm:$0xff] }
 0x4da   : > { %10801 = vmatprep.subr.bf16.mxu1 %v11735_v3 }
 0x4dd   : > { %10803 = vmatpush3.bf16.msra.mxu1 %v12575_v22  ;;  %v2680_v22 = vld [vmem:[%s13742_s2 + $0x90] sm:$0xff] }
 0x4de   : > { %10804 = vmatprep.subr.bf16.mxu1 %v11735_v3  ;;  %v2702_v60 = vand.u32 4294901760, %v2680_v22 }
 0x4e0   : > { %v12886_v24 = vsub.f32 %v2680_v22, %v2702_v60 }
 0x4e1   : > { %10806 = vmatpush3.bf16.msra.mxu1 %v12585_v13  ;;  %v2696_v13 = vand.u32 4294901760, %v2678_v20 }
 0x4e2   : > { %10807 = vmatprep.subr.bf16.mxu1 %v11735_v3  ;;  %v2795_v32 = vand.u32 4294901760, %v12886_v24 }
 0x4e3   : > { %v12882_v14 = vsub.f32 %v2678_v20, %v2696_v13  ;;  %v10874_v20 = vpack.c.bf16 %v2816_v23, %v2809_v21 }
 0x4e4   : > { %v2796_v17 = vsub.f32 %v12886_v24, %v2795_v32 }
 0x4e5   : > { %10809 = vmatpush3.bf16.msra.mxu1 %v12595_v15  ;;  %v2699_v15 = vand.u32 4294901760, %v2679_v19  ;;  %v2781_v50 = vand.u32 4294901760, %v12882_v14 }
 0x4e6   : > { %10810 = vmatprep.subr.bf16.mxu1 %v11735_v3  ;;  %v2797_v51 = vand.u32 4294901760, %v2796_v17 }
 0x4e7   : > { %v12880_v2 = vpack.c.bf16 %v2699_v15, %v2696_v13  ;;  %v12884_v18 = vsub.f32 %v2679_v19, %v2699_v15  ;;  %v2782_v63 = vsub.f32 %v12882_v14, %v2781_v50 }
 0x4e9   : > { %10812 = vmatpush3.bf16.msra.mxu1 %v12633_v38  ;;  %v2681_v38 = vld [vmem:[%s13742_s2 + $0x98] sm:$0xff]  ;;  %10821 = vmatpush3.bf16.msra.mxu0 %v12880_v2  ;;  %v2788_v53 = vand.u32 4294901760, %v12884_v18  ;;  %v2783_v55 = vand.u32 4294901760, %v2782_v63  ;;  %v10844_v31 = vpack.c.bf16 %v12884_v18, %v12882_v14  ;;  %v208_v14 = vld [vmem:[%s13742_s2 + $0x140] sm:$0xff] }
 0x4ea   : > { %10813 = vmatprep.subr.bf16.mxu1 %v11735_v3  ;;  %10822 = vmatprep.subr.bf16.mxu0 %v11735_v3 }
 0x4eb   : > { %v2789_v58 = vsub.f32 %v12884_v18, %v2788_v53  ;;  %v10868_v27 = vpack.c.bf16 %v2788_v53, %v2781_v50  ;;  %v209_v18 = vld [vmem:[%s13742_s2 + $0x148] sm:$0xff] }
 0x4ed   : > { %10815 = vmatpush3.bf16.msra.mxu1 %v12643_v40  ;;  %v2705_v40 = vand.u32 4294901760, %v2681_v38  ;;  %v2790_v12 = vand.u32 4294901760, %v2789_v58  ;;  %v214_v58 = vld [vmem:[%s13742_s2 + $0x170] sm:$0xff] }
 0x4ee   : > { %10816 = vmatprep.subr.bf16.mxu1 %v11735_v3 }
 0x4ef   : > { %v12888_v39 = vsub.f32 %v2681_v38, %v2705_v40  ;;  %v12893_v48 = vpack.c.bf16 %v2705_v40, %v2702_v60  ;;  %v10832_v5 = vpack.c.bf16 %v2790_v12, %v2783_v55  ;;  %v215_v55 = vld [vmem:[%s13742_s2 + $0x178] sm:$0xff]  ;;  %v3256_v12 = vand.u32 4294901760, %v214_v58 }
 0x4f1   : > { %10818 = vmatpush3.bf16.msra.mxu1 %v12654_v62  ;;  %v2685_v62 = vld [vmem:[%s13742_s2 + $0xb8] sm:$0xff]  ;;  %10824 = vmatpush3.bf16.msra.mxu0 %v12893_v48  ;;  %v2802_v26 = vand.u32 4294901760, %v12888_v39  ;;  %v10847_v47 = vpack.c.bf16 %v12888_v39, %v12886_v24  ;;  %v3241_v24 = vand.u32 4294901760, %v209_v18 }
 0x4f2   : > { %10975 = vmatprep.subr.bf16.mxu1 %v11735_v3  ;;  %v2717_v42 = vand.u32 4294901760, %v2685_v62  ;;  %10825 = vmatprep.subr.bf16.mxu0 %v11735_v3 }
 0x4f3   : > { %v2803_v30 = vsub.f32 %v12888_v39, %v2802_v26  ;;  %v10871_v59 = vpack.c.bf16 %v2802_v26, %v2795_v32  ;;  %v3329_v63 = vsub.f32 %v209_v18, %v3241_v24  ;;  %v3259_v32 = vand.u32 4294901760, %v215_v55 }
 0x4f4   : > { %9305 = vmatmul.mubr.f32.vlgmr.msra.gmra.mrb[2].mxu1 %v12748_v33  ;;  %v12900_v28 = vsub.f32 %v2685_v62, %v2717_v42  ;;  %v12903_v33 = vpack.c.bf16 %v2711_v43, %v2708_v41  ;;  %v12907_v49 = vpack.c.bf16 %v2717_v42, %v2714_v1 }
 0x4f5   : > { %9570 = vmatprep.mubr.msk.f32.mxu1 %vm11736_vm0, %v11737_v9  ;;  %v2804_v8 = vand.u32 4294901760, %v2803_v30  ;;  %v13016_v17 = vpack.c.bf16 %v3259_v32, %v3256_v12 }
 0x4f6   : > { %10827 = vmatpush3.bf16.msra.mxu0 %v12903_v33  ;;  %v2830_v34 = vand.u32 4294901760, %v12900_v28  ;;  %v10853_v6 = vpack.c.bf16 %v12900_v28, %v12898_v11  ;;  %v212_v11 = vld [vmem:[%s13742_s2 + $0x160] sm:$0xff] }
 0x4f7   : > { %10828 = vmatprep.subr.bf16.mxu0 %v11735_v3  ;;  %v10835_v0 = vpack.c.bf16 %v2804_v8, %v2797_v51  ;;  %v3336_v8 = vsub.f32 %v210_v4, %v3244_v54 }
 0x4f8   : > { %v2831_v57 = vsub.f32 %v12900_v28, %v2830_v34  ;;  %v10877_v19 = vpack.c.bf16 %v2830_v34, %v2823_v44  ;;  %v213_v28 = vld [vmem:[%s13742_s2 + $0x168] sm:$0xff] }
 0x4f9   : > { %v3337_v36 = vand.u32 4294901760, %v3336_v8 }
 0x4fa   : > { %10830 = vmatpush3.bf16.msra.mxu0 %v12907_v49  ;;  %v2832_v10 = vand.u32 4294901760, %v2831_v57 }
 0x4fb   : > { %10831 = vmatprep.subr.bf16.mxu0 %v11735_v3  ;;  %v3338_v16 = vsub.f32 %v3336_v8, %v3337_v36 }
 0x4fc   : > { %v10841_v7 = vpack.c.bf16 %v2832_v10, %v2825_v29 }
 0x4fd   : > { %v3339_v35 = vand.u32 4294901760, %v3338_v16  ;;  %v4338_v16 = vld [vmem:[%s13742_s2 + $0xd8] sm:$0xff] }
 0x5c7   : > { %v12936_v22 = vpop.f32.mrb[2].mxu1 }
 0x5c8   : > { %v7736_v13 = vmul.f32 -1.442695, %v12936_v22  ;;  %v9306_v15 = vpop.f32.mrb[3].mxu1 }
 0x5ca   : > { %11649 = vpow2.f32 %v7736_v13 }
 0x5d4   : > { %v11650_v38 = vpop.eup %11649 }
 0x5d5   : > { %v2675_v60 = vadd.f32 1.0, %v11650_v38 }
 0x5d7   : > { %11651 = vrcp.f32 %v2675_v60 }
 0x5e1   : > { %v11652_v25 = vpop.eup %11651 }
 0x5e2   : > { %v2693_v37 = vsel %vm2691_vm2, %v11652_v25, 0 }
 0x5e3   : > { %v2768_v40 = vand.u32 4294901760, %v2693_v37 }
 0x5e5   : > { %v2769_v41 = vsub.f32 %v2693_v37, %v2768_v40 }
 0x5e7   : > { %v2770_v43 = vand.u32 4294901760, %v2769_v41 }
 0x5e9   : > { %v2771_v52 = vsub.f32 %v2769_v41, %v2770_v43 }
 0x5eb   : > { %v2772_v62 = vand.u32 4294901760, %v2771_v52 }
 0x5ed   : > { %9324 = vmatmul.mubr.f32.vlgmr.msra.gmra.mrb[4].mxu0 %v2772_v62 }
 0x5ee   : > { %10833 = vmatpush3.bf16.msra.mxu0 %v10832_v5  ;;  %9342 = vmatprep.mubr.msk.f32.mxu0 %vm11736_vm0, %v11737_v9  ;;  %v3330_v5 = vand.u32 4294901760, %v3329_v63 }
 0x5ef   : > { %10834 = vmatprep.subr.bf16.mxu0 %v11735_v3 }
 0x5f0   : > { %v3331_v51 = vsub.f32 %v3329_v63, %v3330_v5 }
 0x5f2   : > { %10836 = vmatpush3.bf16.msra.mxu0 %v10835_v0  ;;  %v3332_v0 = vand.u32 4294901760, %v3331_v51 }
 0x5f3   : > { %10837 = vmatprep.subr.bf16.mxu0 %v11735_v3 }
 0x5f6   : > { %10839 = vmatpush3.bf16.msra.mxu0 %v10838_v45 }
 0x5f7   : > { %10840 = vmatprep.subr.bf16.mxu0 %v11735_v3 }
 0x5fa   : > { %10842 = vmatpush3.bf16.msra.mxu0 %v10841_v7 }
 0x5fb   : > { %10843 = vmatprep.subr.bf16.mxu0 %v11735_v3 }
 0x5fd   : > { %9343 = vmatmul.mubr.f32.vlgmr.msra.gmra.mrb[4].mxu0 %v2768_v40 }
 0x5fe   : > { %10845 = vmatpush3.bf16.msra.mxu0 %v10844_v31  ;;  %9361 = vmatprep.mubr.msk.f32.mxu0 %vm11736_vm0, %v11737_v9 }
 0x5ff   : > { %10846 = vmatprep.subr.bf16.mxu0 %v11735_v3 }
 0x602   : > { %10848 = vmatpush3.bf16.msra.mxu0 %v10847_v47 }
 0x603   : > { %10849 = vmatprep.subr.bf16.mxu0 %v11735_v3 }
 0x606   : > { %10851 = vmatpush3.bf16.msra.mxu0 %v10850_v56  ;;  %v3364_v56 = vsub.f32 %v214_v58, %v3256_v12 }
 0x607   : > { %10852 = vmatprep.subr.bf16.mxu0 %v11735_v3 }
 0x60a   : > { %10854 = vmatpush3.bf16.msra.mxu0 %v10853_v6  ;;  %v3371_v6 = vsub.f32 %v215_v55, %v3259_v32 }
 0x60b   : > { %10855 = vmatprep.subr.bf16.mxu0 %v11735_v3 }
 0x60c   : > { %v13042_v52 = vpack.c.bf16 %v3371_v6, %v3364_v56 }
 0x60d   : > { %9362 = vmatmul.mubr.f32.vlgmr.msra.gmra.mrb[4].mxu0 %v2769_v41 }
 0x60e   : > { %10857 = vmatpush3.bf16.msra.mxu0 %v12880_v2  ;;  %9380 = vmatprep.mubr.msk.f32.mxu0 %vm11736_vm0, %v11737_v9 }
 0x60f   : > { %10858 = vmatprep.subr.bf16.mxu0 %v11735_v3 }
 0x612   : > { %10860 = vmatpush3.bf16.msra.mxu0 %v12893_v48 }
 0x613   : > { %10861 = vmatprep.subr.bf16.mxu0 %v11735_v3 }
 0x616   : > { %10863 = vmatpush3.bf16.msra.mxu0 %v12903_v33 }
 0x617   : > { %10864 = vmatprep.subr.bf16.mxu0 %v11735_v3 }
 0x61a   : > { %10866 = vmatpush3.bf16.msra.mxu0 %v12907_v49 }
 0x61b   : > { %10867 = vmatprep.subr.bf16.mxu0 %v11735_v3 }
 0x61d   : > { %9381 = vmatmul.mubr.f32.vlgmr.msra.gmra.mrb[4].mxu0 %v2770_v43 }
 0x61e   : > { %10869 = vmatpush3.bf16.msra.mxu0 %v10868_v27  ;;  %9399 = vmatprep.mubr.msk.f32.mxu0 %vm11736_vm0, %v11737_v9 }
 0x61f   : > { %10870 = vmatprep.subr.bf16.mxu0 %v11735_v3 }
 0x622   : > { %10872 = vmatpush3.bf16.msra.mxu0 %v10871_v59 }
 0x623   : > { %10873 = vmatprep.subr.bf16.mxu0 %v11735_v3 }
 0x626   : > { %10875 = vmatpush3.bf16.msra.mxu0 %v10874_v20  ;;  %v3365_v20 = vand.u32 4294901760, %v3364_v56 }
 0x627   : > { %10876 = vmatprep.subr.bf16.mxu0 %v11735_v3 }
 0x628   : > { %v3366_v15 = vsub.f32 %v3364_v56, %v3365_v20 }
 0x62a   : > { %10878 = vmatpush3.bf16.msra.mxu0 %v10877_v19  ;;  %v3372_v19 = vand.u32 4294901760, %v3371_v6  ;;  %v3367_v60 = vand.u32 4294901760, %v3366_v15 }
 0x62b   : > { %10879 = vmatprep.subr.bf16.mxu0 %v11735_v3 }
 0x62c   : > { %v3373_v38 = vsub.f32 %v3371_v6, %v3372_v19 }
 0x62d   : > { %9400 = vmatmul.mubr.f32.vlgmr.msra.gmra.mrb[4].mxu0 %v2768_v40 }
 0x62e   : > { %10881 = vmatpush3.bf16.msra.mxu0 %v12880_v2  ;;  %9418 = vmatprep.mubr.msk.f32.mxu0 %vm11736_vm0, %v11737_v9  ;;  %v3238_v2 = vand.u32 4294901760, %v208_v14  ;;  %v3374_v25 = vand.u32 4294901760, %v3373_v38 }
 0x62f   : > { %10882 = vmatprep.subr.bf16.mxu0 %v11735_v3 }
 0x630   : > { %v12983_v39 = vpack.c.bf16 %v3241_v24, %v3238_v2  ;;  %v3322_v53 = vsub.f32 %v208_v14, %v3238_v2  ;;  %v13032_v37 = vpack.c.bf16 %v3374_v25, %v3367_v60  ;;  %v13050_v2 = vpack.c.bf16 %v3372_v19, %v3365_v20  ;;  %v7737_v24 = vld [vmem:[%s13742_s2 + $0x180] ss:$0 sm:$0xff] }
 0x632   : > { %10884 = vmatpush3.bf16.msra.mxu0 %v12893_v48  ;;  %v211_v48 = vld [vmem:[%s13742_s2 + $0x158] sm:$0xff]  ;;  %v3323_v26 = vand.u32 4294901760, %v3322_v53 }
 0x633   : > { %10885 = vmatprep.subr.bf16.mxu0 %v11735_v3  ;;  %v3247_v1 = vand.u32 4294901760, %v211_v48 }
 0x634   : > { %v3324_v30 = vsub.f32 %v3322_v53, %v3323_v26  ;;  %v13044_v62 = vpack.c.bf16 %v3330_v5, %v3323_v26 }
 0x635   : > { %v12996_v42 = vpack.c.bf16 %v3247_v1, %v3244_v54  ;;  %v3343_v21 = vsub.f32 %v211_v48, %v3247_v1 }
 0x636   : > { %10887 = vmatpush3.bf16.msra.mxu0 %v12903_v33  ;;  %v3250_v33 = vand.u32 4294901760, %v212_v11  ;;  %v3325_v23 = vand.u32 4294901760, %v3324_v30 }
 0x637   : > { %10888 = vmatprep.subr.bf16.mxu0 %v11735_v3  ;;  %v3344_v46 = vand.u32 4294901760, %v3343_v21  ;;  %v13038_v41 = vpack.c.bf16 %v3343_v21, %v3336_v8 }
 0x638   : > { %v13020_v61 = vpack.c.bf16 %v3332_v0, %v3325_v23  ;;  %v3350_v34 = vsub.f32 %v212_v11, %v3250_v33  ;;  %v4336_v23 = vld [vmem:[%s13742_s2 + $0xc8] sm:$0xff]  ;;  %v4337_v0 = vld [vmem:[%s13742_s2 + $0xd0] sm:$0xff] }
 0x639   : > { %v3345_v44 = vsub.f32 %v3343_v21, %v3344_v46  ;;  %v13046_v14 = vpack.c.bf16 %v3344_v46, %v3337_v36  ;;  %v4335_v21 = vld [vmem:[%s13742_s2 + $0xc0] sm:$0xff]  ;;  %v4355_v46 = vand.u32 4294901760, %v4336_v23 }
 0x63a   : > { %10890 = vmatpush3.bf16.msra.mxu0 %v12907_v49  ;;  %v3253_v49 = vand.u32 4294901760, %v213_v28  ;;  %10977 = vmatpush3.bf16.msra.mxu1 %v13020_v61  ;;  %v3351_v29 = vand.u32 4294901760, %v3350_v34  ;;  %v4352_v36 = vand.u32 4294901760, %v4335_v21 }
 0x63b   : > { %10891 = vmatprep.subr.bf16.mxu0 %v11735_v3  ;;  %v3346_v57 = vand.u32 4294901760, %v3345_v44  ;;  %10978 = vmatprep.subr.bf16.mxu1 %v11735_v3  ;;  %v4358_v44 = vand.u32 4294901760, %v4337_v0  ;;  %v13205_v6 = vsub.f32 %v4336_v23, %v4355_v46 }
 0x63c   : > { %v13006_v50 = vpack.c.bf16 %v3253_v49, %v3250_v33  ;;  %v3357_v45 = vsub.f32 %v213_v28, %v3253_v49  ;;  %v3352_v31 = vsub.f32 %v3350_v34, %v3351_v29  ;;  %v13203_v56 = vsub.f32 %v4335_v21, %v4352_v36 }
 0x63d   : > { %9419 = vmatmul.mubr.f32.vlgmr.msra.gmra.mrb[4].mxu0 %v2768_v40  ;;  %v13024_v7 = vpack.c.bf16 %v3346_v57, %v3339_v35  ;;  %v13035_v40 = vpack.c.bf16 %v3329_v63, %v3322_v53  ;;  %v4361_v35 = vand.u32 4294901760, %v4338_v16 }
 0x63e   : > { %10893 = vmatpush3.bf16.msra.mxu0 %v12983_v39  ;;  %9437 = vmatprep.mubr.msk.f32.mxu0 %vm11736_vm0, %v11737_v9  ;;  %v3358_v10 = vand.u32 4294901760, %v3357_v45  ;;  %v3353_v27 = vand.u32 4294901760, %v3352_v31  ;;  %v13040_v43 = vpack.c.bf16 %v3357_v45, %v3350_v34  ;;  %v4339_v34 = vld [vmem:[%s13742_s2 + $0xe0] sm:$0xff]  ;;  %v4342_v31 = vld [vmem:[%s13742_s2 + $0xf8] sm:$0xff] }
 0x63f   : > { %10894 = vmatprep.subr.bf16.mxu0 %v11735_v3  ;;  %10980 = vmatpush3.bf16.msra.mxu1 %v13024_v7  ;;  %v4364_v57 = vand.u32 4294901760, %v4339_v34  ;;  %v13214_v19 = vpack.c.bf16 %v4361_v35, %v4358_v44  ;;  %v4373_v60 = vand.u32 4294901760, %v4342_v31 }
 0x640   : > { %v3359_v47 = vsub.f32 %v3357_v45, %v3358_v10  ;;  %10981 = vmatprep.subr.bf16.mxu1 %v11735_v3  ;;  %v13048_v18 = vpack.c.bf16 %v3358_v10, %v3351_v29  ;;  %v4340_v45 = vld [vmem:[%s13742_s2 + $0xe8] sm:$0xff]  ;;  %v4341_v10 = vld [vmem:[%s13742_s2 + $0xf0] sm:$0xff] }
 0x641   : > { %v4367_v29 = vand.u32 4294901760, %v4340_v45  ;;  %v13211_v20 = vsub.f32 %v4339_v34, %v4364_v57  ;;  %v4370_v38 = vand.u32 4294901760, %v4341_v10 }
 0x642   : > { %10896 = vmatpush3.bf16.msra.mxu0 %v12996_v42  ;;  %v3360_v59 = vand.u32 4294901760, %v3359_v47  ;;  %v13201_v47 = vpack.c.bf16 %v4355_v46, %v4352_v36 }
 0x643   : > { %10897 = vmatprep.subr.bf16.mxu0 %v11735_v3  ;;  %v13216_v15 = vsub.f32 %v4340_v45, %v4367_v29  ;;  %v13219_v25 = vsub.f32 %v4341_v10, %v4370_v38 }
 0x644   : > { %v13028_v13 = vpack.c.bf16 %v3360_v59, %v3353_v27  ;;  %v13207_v27 = vsub.f32 %v4337_v0, %v4358_v44  ;;  %v13209_v59 = vsub.f32 %v4338_v16, %v4361_v35 }
 0x645   : > { %v4479_v46 = vand.u32 4294901760, %v13219_v25 }
 0x646   : > { %10899 = vmatpush3.bf16.msra.mxu0 %v13006_v50  ;;  %10983 = vmatpush3.bf16.msra.mxu1 %v13028_v13 }
 0x647   : > { %10900 = vmatprep.subr.bf16.mxu0 %v11735_v3  ;;  %10984 = vmatprep.subr.bf16.mxu1 %v11735_v3  ;;  %v4480_v34 = vsub.f32 %v13219_v25, %v4479_v46 }
 0x649   : > { %v4481_v35 = vand.u32 4294901760, %v4480_v34 }
 0x64a   : > { %10902 = vmatpush3.bf16.msra.mxu0 %v13016_v17  ;;  %10986 = vmatpush3.bf16.msra.mxu1 %v13032_v37 }
 0x64b   : > { %10903 = vmatprep.subr.bf16.mxu0 %v11735_v3  ;;  %10987 = vmatprep.subr.bf16.mxu1 %v11735_v3 }
 0x710   : > { %v3228_v4 = vpop.f32.mrb[4].mxu0 }
 0x711   : > { %v13055_v48 = vadd.f32 %v7737_v24, %v3228_v4  ;;  %v9420_v54 = vpop.f32.mrb[5].mxu0  ;;  %v13221_v24 = vsub.f32 %v4342_v31, %v4373_v60  ;;  %v13224_v4 = vpack.c.bf16 %v4367_v29, %v4364_v57 }
 0x712   : > { %v4437_v54 = vand.u32 4294901760, %v13203_v56 }
 0x713   : > { %v3235_v1 = vsel %vm2691_vm2, %v13055_v48, 0  ;;  %v4486_v16 = vand.u32 4294901760, %v13221_v24 }
 0x714   : > { %v3310_v11 = vand.u32 4294901760, %v3235_v1 }
 0x715   : > { %v4487_v45 = vsub.f32 %v13221_v24, %v4486_v16 }
 0x716   : > { %v3311_v28 = vsub.f32 %v3235_v1, %v3310_v11  ;;  %v4444_v1 = vand.u32 4294901760, %v13205_v6 }
 0x717   : > { %v4488_v57 = vand.u32 4294901760, %v4487_v45 }
 0x718   : > { %v3312_v33 = vand.u32 4294901760, %v3311_v28 }
 0x719   : > { %v11057_v29 = vpack.c.bf16 %v4488_v57, %v4481_v35 }
 0x71a   : > { %v3313_v49 = vsub.f32 %v3311_v28, %v3312_v33 }
 0x71c   : > { %v3314_v53 = vand.u32 4294901760, %v3313_v49 }
 0x71e   : > { %9438 = vmatmul.mubr.f32.vlgmr.msra.gmra.mrb[6].mxu0 %v3314_v53  ;;  %v4451_v53 = vand.u32 4294901760, %v13207_v27 }
 0x71f   : > { %10905 = vmatpush3.bf16.msra.mxu0 %v13020_v61  ;;  %9456 = vmatprep.mubr.msk.f32.mxu0 %vm11736_vm0, %v11737_v9 }
 0x720   : > { %10906 = vmatprep.subr.bf16.mxu0 %v11735_v3 }
 0x723   : > { %10908 = vmatpush3.bf16.msra.mxu0 %v13024_v7 }
 0x724   : > { %10909 = vmatprep.subr.bf16.mxu0 %v11735_v3 }
 0x727   : > { %10911 = vmatpush3.bf16.msra.mxu0 %v13028_v13 }
 0x728   : > { %10912 = vmatprep.subr.bf16.mxu0 %v11735_v3 }
 0x72b   : > { %10914 = vmatpush3.bf16.msra.mxu0 %v13032_v37 }
 0x72c   : > { %10915 = vmatprep.subr.bf16.mxu0 %v11735_v3 }
 0x72e   : > { %9457 = vmatmul.mubr.f32.vlgmr.msra.gmra.mrb[6].mxu0 %v3310_v11 }
 0x72f   : > { %10917 = vmatpush3.bf16.msra.mxu0 %v13035_v40  ;;  %9475 = vmatprep.mubr.msk.f32.mxu0 %vm11736_vm0, %v11737_v9 }
 0x730   : > { %10918 = vmatprep.subr.bf16.mxu0 %v11735_v3 }
 0x733   : > { %10920 = vmatpush3.bf16.msra.mxu0 %v13038_v41 }
 0x734   : > { %10921 = vmatprep.subr.bf16.mxu0 %v11735_v3 }
 0x737   : > { %10923 = vmatpush3.bf16.msra.mxu0 %v13040_v43 }
 0x738   : > { %10924 = vmatprep.subr.bf16.mxu0 %v11735_v3 }
 0x73b   : > { %10926 = vmatpush3.bf16.msra.mxu0 %v13042_v52 }
 0x73c   : > { %10927 = vmatprep.subr.bf16.mxu0 %v11735_v3 }
 0x73e   : > { %9476 = vmatmul.mubr.f32.vlgmr.msra.gmra.mrb[6].mxu0 %v3311_v28  ;;  %v4445_v28 = vsub.f32 %v13205_v6, %v4444_v1 }
 0x73f   : > { %10929 = vmatpush3.bf16.msra.mxu0 %v12983_v39  ;;  %9494 = vmatprep.mubr.msk.f32.mxu0 %vm11736_vm0, %v11737_v9 }
 0x740   : > { %10930 = vmatprep.subr.bf16.mxu0 %v11735_v3  ;;  %v4446_v49 = vand.u32 4294901760, %v4445_v28  ;;  %v11069_v28 = vpack.c.bf16 %v13221_v24, %v13219_v25 }
 0x743   : > { %10932 = vmatpush3.bf16.msra.mxu0 %v12996_v42 }
 0x744   : > { %10933 = vmatprep.subr.bf16.mxu0 %v11735_v3 }
 0x747   : > { %10935 = vmatpush3.bf16.msra.mxu0 %v13006_v50 }
 0x748   : > { %10936 = vmatprep.subr.bf16.mxu0 %v11735_v3 }
 0x74b   : > { %10938 = vmatpush3.bf16.msra.mxu0 %v13016_v17 }
 0x74c   : > { %10939 = vmatprep.subr.bf16.mxu0 %v11735_v3 }
 0x74e   : > { %9495 = vmatmul.mubr.f32.vlgmr.msra.gmra.mrb[6].mxu0 %v3312_v33 }
 0x74f   : > { %10941 = vmatpush3.bf16.msra.mxu0 %v13044_v62  ;;  %9513 = vmatprep.mubr.msk.f32.mxu0 %vm11736_vm0, %v11737_v9 }
 0x750   : > { %10942 = vmatprep.subr.bf16.mxu0 %v11735_v3 }
 0x753   : > { %10944 = vmatpush3.bf16.msra.mxu0 %v13046_v14 }
 0x754   : > { %10945 = vmatprep.subr.bf16.mxu0 %v11735_v3 }
 0x757   : > { %10947 = vmatpush3.bf16.msra.mxu0 %v13048_v18 }
 0x758   : > { %10948 = vmatprep.subr.bf16.mxu0 %v11735_v3 }
 0x75b   : > { %10950 = vmatpush3.bf16.msra.mxu0 %v13050_v2 }
 0x75c   : > { %10951 = vmatprep.subr.bf16.mxu0 %v11735_v3 }
 0x75e   : > { %9514 = vmatmul.mubr.f32.vlgmr.msra.gmra.mrb[6].mxu0 %v3310_v11 }
 0x75f   : > { %10953 = vmatpush3.bf16.msra.mxu0 %v12983_v39  ;;  %9532 = vmatprep.mubr.msk.f32.mxu0 %vm11736_vm0, %v11737_v9 }
 0x760   : > { %10954 = vmatprep.subr.bf16.mxu0 %v11735_v3 }
 0x763   : > { %10956 = vmatpush3.bf16.msra.mxu0 %v12996_v42 }
 0x764   : > { %10957 = vmatprep.subr.bf16.mxu0 %v11735_v3 }
 0x767   : > { %10959 = vmatpush3.bf16.msra.mxu0 %v13006_v50 }
 0x768   : > { %10960 = vmatprep.subr.bf16.mxu0 %v11735_v3 }
 0x76b   : > { %10962 = vmatpush3.bf16.msra.mxu0 %v13016_v17 }
 0x76c   : > { %10963 = vmatprep.subr.bf16.mxu0 %v11735_v3 }
 0x76e   : > { %9533 = vmatmul.mubr.f32.vlgmr.msra.gmra.mrb[6].mxu0 %v3310_v11  ;;  %v4438_v11 = vsub.f32 %v13203_v56, %v4437_v54 }
 0x76f   : > { %10965 = vmatpush3.bf16.msra.mxu0 %v12983_v39  ;;  %9551 = vmatprep.mubr.msk.f32.mxu0 %vm11736_vm0, %v11737_v9 }
 0x770   : > { %10966 = vmatprep.subr.bf16.mxu0 %v11735_v3  ;;  %v4439_v33 = vand.u32 4294901760, %v4438_v11  ;;  %v11066_v11 = vpack.c.bf16 %v13216_v15, %v13211_v20 }
 0x773   : > { %10968 = vmatpush3.bf16.msra.mxu0 %v12996_v42 }
 0x774   : > { %10969 = vmatprep.subr.bf16.mxu0 %v11735_v3 }
 0x777   : > { %10971 = vmatpush3.bf16.msra.mxu0 %v13006_v50 }
 0x778   : > { %10972 = vmatprep.subr.bf16.mxu0 %v11735_v3 }
 0x77b   : > { %10974 = vmatpush3.bf16.msra.mxu0 %v13016_v17 }
 0x77c   : > { %11035 = vmatprep.subr.bf16.mxu0 %v11735_v3 }
 0x841   : > { %v3770_v63 = vpop.f32.mrb[6].mxu0 }
 0x842   : > { %v13120_v58 = vsub.f32 %v13055_v48, %v3770_v63  ;;  %v9534_v55 = vpop.f32.mrb[7].mxu0  ;;  %v13228_v48 = vpack.c.bf16 %v4373_v60, %v4370_v38  ;;  %v4458_v63 = vand.u32 4294901760, %v13209_v59  ;;  %v11060_v38 = vpack.c.bf16 %v13205_v6, %v13203_v56  ;;  %v7738_v56 = vld [vmem:[%s13742_s2 + $0x181] ss:$0 sm:$0xff] }
 0x843   : > { %v11048_v55 = vpack.c.bf16 %v4446_v49, %v4439_v33  ;;  %v11063_v60 = vpack.c.bf16 %v13209_v59, %v13207_v27  ;;  %v11084_v33 = vpack.c.bf16 %v4444_v1, %v4437_v54 }
 0x844   : > { %v3775_v12 = vmul.f32 %v13120_v58, %v13120_v58  ;;  %v11087_v49 = vpack.c.bf16 %v4458_v63, %v4451_v53 }
 0x846   : > { %v3777_v32 = vsel %vm2691_vm2, %v3775_v12, 0  ;;  %v4452_v12 = vsub.f32 %v13207_v27, %v4451_v53  ;;  %v7739_v27 = vld [vmem:[%s13742_s2 + $0x182] ss:$0 sm:$0xff] }
 0x847   : > { %v3852_v26 = vand.u32 4294901760, %v3777_v32 }
 0x849   : > { %v3853_v5 = vsub.f32 %v3777_v32, %v3852_v26  ;;  %9571 = vmatmul.mubr.f32.vlgmr.msra.gmra.mrb[4].mxu1 %v3852_v26  ;;  %v4459_v32 = vsub.f32 %v13209_v59, %v4458_v63 }
 0x84a   : > { %10989 = vmatpush3.bf16.msra.mxu1 %v13035_v40  ;;  %9589 = vmatprep.mubr.msk.f32.mxu1 %vm11736_vm0, %v11737_v9 }
 0x84b   : > { %10990 = vmatprep.subr.bf16.mxu1 %v11735_v3  ;;  %v3854_v30 = vand.u32 4294901760, %v3853_v5 }
 0x84d   : > { %v3855_v51 = vsub.f32 %v3853_v5, %v3854_v30 }
 0x84e   : > { %10992 = vmatpush3.bf16.msra.mxu1 %v13038_v41 }
 0x84f   : > { %10993 = vmatprep.subr.bf16.mxu1 %v11735_v3  ;;  %v3856_v8 = vand.u32 4294901760, %v3855_v51  ;;  %v4472_v51 = vand.u32 4294901760, %v13216_v15 }
 0x851   : > { %9552 = vmatmul.mubr.f32.vlgmr.msra.gmra.mrb[8].mxu0 %v3856_v8  ;;  %v4473_v23 = vsub.f32 %v13216_v15, %v4472_v51 }
 0x852   : > { %10995 = vmatpush3.bf16.msra.mxu1 %v13040_v43  ;;  %9665 = vmatprep.mubr.msk.f32.mxu0 %vm11736_vm0, %v11737_v9 }
 0x853   : > { %10996 = vmatprep.subr.bf16.mxu1 %v11735_v3  ;;  %11037 = vmatpush3.bf16.msra.mxu0 %v13201_v47  ;;  %v4474_v36 = vand.u32 4294901760, %v4473_v23 }
 0x854   : > { %11038 = vmatprep.subr.bf16.mxu0 %v11735_v3 }
 0x856   : > { %10998 = vmatpush3.bf16.msra.mxu1 %v13042_v52 }
 0x857   : > { %10999 = vmatprep.subr.bf16.mxu1 %v11735_v3  ;;  %11040 = vmatpush3.bf16.msra.mxu0 %v13214_v19 }
 0x858   : > { %11041 = vmatprep.subr.bf16.mxu0 %v11735_v3 }
 0x859   : > { %9590 = vmatmul.mubr.f32.vlgmr.msra.gmra.mrb[4].mxu1 %v3853_v5  ;;  %v4460_v5 = vand.u32 4294901760, %v4459_v32  ;;  %v11093_v32 = vpack.c.bf16 %v4486_v16, %v4479_v46 }
 0x85a   : > { %11001 = vmatpush3.bf16.msra.mxu1 %v12983_v39  ;;  %9608 = vmatprep.mubr.msk.f32.mxu1 %vm11736_vm0, %v11737_v9 }
 0x85b   : > { %11002 = vmatprep.subr.bf16.mxu1 %v11735_v3  ;;  %11043 = vmatpush3.bf16.msra.mxu0 %v13224_v4 }
 0x85c   : > { %11044 = vmatprep.subr.bf16.mxu0 %v11735_v3 }
 0x85e   : > { %11004 = vmatpush3.bf16.msra.mxu1 %v12996_v42 }
 0x85f   : > { %11005 = vmatprep.subr.bf16.mxu1 %v11735_v3  ;;  %11046 = vmatpush3.bf16.msra.mxu0 %v13228_v48 }
 0x860   : > { %11047 = vmatprep.subr.bf16.mxu0 %v11735_v3 }
 0x862   : > { %11007 = vmatpush3.bf16.msra.mxu1 %v13006_v50 }
 0x863   : > { %11008 = vmatprep.subr.bf16.mxu1 %v11735_v3 }
 0x866   : > { %11010 = vmatpush3.bf16.msra.mxu1 %v13016_v17 }
 0x867   : > { %11011 = vmatprep.subr.bf16.mxu1 %v11735_v3 }
 0x869   : > { %9609 = vmatmul.mubr.f32.vlgmr.msra.gmra.mrb[4].mxu1 %v3854_v30  ;;  %v4465_v30 = vand.u32 4294901760, %v13211_v20 }
 0x86a   : > { %11013 = vmatpush3.bf16.msra.mxu1 %v13044_v62  ;;  %9627 = vmatprep.mubr.msk.f32.mxu1 %vm11736_vm0, %v11737_v9 }
 0x86b   : > { %11014 = vmatprep.subr.bf16.mxu1 %v11735_v3  ;;  %v4466_v21 = vsub.f32 %v13211_v20, %v4465_v30 }
 0x86d   : > { %v4467_v0 = vand.u32 4294901760, %v4466_v21 }
 0x86e   : > { %11016 = vmatpush3.bf16.msra.mxu1 %v13046_v14 }
 0x86f   : > { %11017 = vmatprep.subr.bf16.mxu1 %v11735_v3  ;;  %v11054_v44 = vpack.c.bf16 %v4474_v36, %v4467_v0 }
 0x872   : > { %11019 = vmatpush3.bf16.msra.mxu1 %v13048_v18 }
 0x873   : > { %11020 = vmatprep.subr.bf16.mxu1 %v11735_v3 }
 0x876   : > { %11022 = vmatpush3.bf16.msra.mxu1 %v13050_v2 }
 0x877   : > { %11023 = vmatprep.subr.bf16.mxu1 %v11735_v3 }
 0x879   : > { %9628 = vmatmul.mubr.f32.vlgmr.msra.gmra.mrb[4].mxu1 %v3852_v26 }
 0x87a   : > { %11025 = vmatpush3.bf16.msra.mxu1 %v12983_v39  ;;  %9646 = vmatprep.mubr.msk.f32.mxu1 %vm11736_vm0, %v11737_v9 }
 0x87b   : > { %11026 = vmatprep.subr.bf16.mxu1 %v11735_v3 }
 0x87e   : > { %11028 = vmatpush3.bf16.msra.mxu1 %v12996_v42 }
 0x87f   : > { %11029 = vmatprep.subr.bf16.mxu1 %v11735_v3 }
 0x882   : > { %11031 = vmatpush3.bf16.msra.mxu1 %v13006_v50 }
 0x883   : > { %11032 = vmatprep.subr.bf16.mxu1 %v11735_v3 }
 0x886   : > { %11034 = vmatpush3.bf16.msra.mxu1 %v13016_v17 }
 0x887   : > { %11107 = vmatprep.subr.bf16.mxu1 %v11735_v3 }
 0x889   : > { %9647 = vmatmul.mubr.f32.vlgmr.msra.gmra.mrb[4].mxu1 %v3852_v26  ;;  %v4453_v26 = vand.u32 4294901760, %v4452_v12  ;;  %v11090_v12 = vpack.c.bf16 %v4472_v51, %v4465_v30 }
 0x88a   : > { %11109 = vmatpush3.bf16.msra.mxu1 %v12983_v39  ;;  %9779 = vmatprep.mubr.msk.f32.mxu1 %vm11736_vm0, %v11737_v9 }
 0x88b   : > { %11110 = vmatprep.subr.bf16.mxu1 %v11735_v3  ;;  %v11051_v8 = vpack.c.bf16 %v4460_v5, %v4453_v26 }
 0x88e   : > { %11112 = vmatpush3.bf16.msra.mxu1 %v12996_v42 }
 0x88f   : > { %11113 = vmatprep.subr.bf16.mxu1 %v11735_v3 }
 0x892   : > { %11115 = vmatpush3.bf16.msra.mxu1 %v13006_v50 }
 0x893   : > { %11116 = vmatprep.subr.bf16.mxu1 %v11735_v3 }
 0x896   : > { %11118 = vmatpush3.bf16.msra.mxu1 %v13016_v17 }
 0x897   : > { %11119 = vmatprep.subr.bf16.mxu1 %v11735_v3 }
 0x924   : > { %v3858_v10 = vpop.f32.mrb[8].mxu0 }
 0x925   : > { %v9553_v31 = vpop.f32.mrb[9].mxu0  ;;  %v3859_v26 = vadd.f32 1e-05, %v3858_v10 }
 0x95c   : > { %v4312_v5 = vpop.f32.mrb[4].mxu1 }
 0x95d   : > { %v11471_v21 = vadd.f32 %v4312_v5, %v3859_v26  ;;  %v9648_v23 = vpop.f32.mrb[5].mxu1  ;;  %v5994_v26 = vld [vmem:[%s13742_s2 + $0x118] sm:$0xff] }
 0x95e   : > { %v5996_v23 = vld [vmem:[%s13742_s2 + $0x128] sm:$0xff] }
 0x95f   : > { %11653 = vrsqrt.f32 %v11471_v21  ;;  %v5995_v21 = vld [vmem:[%s13742_s2 + $0x120] sm:$0xff] }
 0x969   : > { %v11654_v0 = vpop.eup %11653 }
 0x96a   : > { %v4317_v6 = vmul.f32 %v11654_v0, %v13120_v58  ;;  %v6017_v0 = vand.u32 4294901760, %v5994_v26 }
 0x96c   : > { %v4322_v59 = vmul.f32 %v7738_v56, %v4317_v6  ;;  %v6020_v56 = vand.u32 4294901760, %v5995_v21  ;;  %v6023_v6 = vand.u32 4294901760, %v5996_v23 }
 0x96e   : > { %v4327_v20 = vadd.f32 %v7739_v27, %v4322_v59  ;;  %v5997_v27 = vld [vmem:[%s13742_s2 + $0x130] sm:$0xff]  ;;  %v5998_v59 = vld [vmem:[%s13742_s2 + $0x138] sm:$0xff] }
 0x970   : > { %v13265_v15 = vadd.f32 %v4327_v20, %v12936_v22  ;;  %v7741_v22 = vld [vmem:[%s13742_s2 + $0x183] ss:$0 sm:$0xff] }
 0x972   : > { %v7740_v25 = vmul.f32 -1.442695, %v13265_v15 }
 0x974   : > { %11655 = vpow2.f32 %v7740_v25 }
 0x97e   : > { %v11656_v24 = vpop.eup %11655 }
 0x97f   : > { %v4332_v54 = vadd.f32 1.0, %v11656_v24 }
 0x981   : > { %11657 = vrcp.f32 %v4332_v54 }
 0x98b   : > { %v11658_v1 = vpop.eup %11657 }
 0x98c   : > { %v4349_v53 = vsel %vm2691_vm2, %v11658_v1, 0  ;;  %v13470_v1 = vsub.f32 %v5994_v26, %v6017_v0 }
 0x98d   : > { %v4424_v63 = vand.u32 4294901760, %v4349_v53 }
 0x98f   : > { %v4425_v58 = vsub.f32 %v4349_v53, %v4424_v63  ;;  %v13472_v53 = vsub.f32 %v5995_v21, %v6020_v56 }
 0x991   : > { %v4426_v30 = vand.u32 4294901760, %v4425_v58 }
 0x993   : > { %v4427_v51 = vsub.f32 %v4425_v58, %v4426_v30 }
 0x995   : > { %v4428_v36 = vand.u32 4294901760, %v4427_v51  ;;  %v6029_v51 = vand.u32 4294901760, %v5998_v59 }
 0x997   : > { %9666 = vmatmul.mubr.f32.vlgmr.msra.gmra.mrb[10].mxu0 %v4428_v36 }
 0x998   : > { %11049 = vmatpush3.bf16.msra.mxu0 %v11048_v55  ;;  %9684 = vmatprep.mubr.msk.f32.mxu0 %vm11736_vm0, %v11737_v9 }
 0x999   : > { %11050 = vmatprep.subr.bf16.mxu0 %v11735_v3 }
 0x99c   : > { %11052 = vmatpush3.bf16.msra.mxu0 %v11051_v8 }
 0x99d   : > { %11053 = vmatprep.subr.bf16.mxu0 %v11735_v3 }
 0x9a0   : > { %11055 = vmatpush3.bf16.msra.mxu0 %v11054_v44 }
 0x9a1   : > { %11056 = vmatprep.subr.bf16.mxu0 %v11735_v3 }
 0x9a4   : > { %11058 = vmatpush3.bf16.msra.mxu0 %v11057_v29 }
 0x9a5   : > { %11059 = vmatprep.subr.bf16.mxu0 %v11735_v3 }
 0x9a7   : > { %9685 = vmatmul.mubr.f32.vlgmr.msra.gmra.mrb[10].mxu0 %v4424_v63 }
 0x9a8   : > { %11061 = vmatpush3.bf16.msra.mxu0 %v11060_v38  ;;  %9703 = vmatprep.mubr.msk.f32.mxu0 %vm11736_vm0, %v11737_v9 }
 0x9a9   : > { %11062 = vmatprep.subr.bf16.mxu0 %v11735_v3 }
 0x9ac   : > { %11064 = vmatpush3.bf16.msra.mxu0 %v11063_v60 }
 0x9ad   : > { %11065 = vmatprep.subr.bf16.mxu0 %v11735_v3 }
 0x9b0   : > { %11067 = vmatpush3.bf16.msra.mxu0 %v11066_v11 }
 0x9b1   : > { %11068 = vmatprep.subr.bf16.mxu0 %v11735_v3 }
 0x9b4   : > { %11070 = vmatpush3.bf16.msra.mxu0 %v11069_v28  ;;  %v5991_v28 = vld [vmem:[%s13742_s2 + $0x100] sm:$0xff] }
 0x9b5   : > { %11071 = vmatprep.subr.bf16.mxu0 %v11735_v3 }
 0x9b7   : > { %9704 = vmatmul.mubr.f32.vlgmr.msra.gmra.mrb[10].mxu0 %v4425_v58  ;;  %v13477_v58 = vsub.f32 %v5996_v23, %v6023_v6 }
 0x9b8   : > { %11073 = vmatpush3.bf16.msra.mxu0 %v13201_v47  ;;  %9722 = vmatprep.mubr.msk.f32.mxu0 %vm11736_vm0, %v11737_v9 }
 0x9b9   : > { %11074 = vmatprep.subr.bf16.mxu0 %v11735_v3 }
 0x9bc   : > { %11076 = vmatpush3.bf16.msra.mxu0 %v13214_v19 }
 0x9bd   : > { %11077 = vmatprep.subr.bf16.mxu0 %v11735_v3 }
 0x9c0   : > { %11079 = vmatpush3.bf16.msra.mxu0 %v13224_v4 }
 0x9c1   : > { %11080 = vmatprep.subr.bf16.mxu0 %v11735_v3 }
 0x9c4   : > { %11082 = vmatpush3.bf16.msra.mxu0 %v13228_v48 }
 0x9c5   : > { %11083 = vmatprep.subr.bf16.mxu0 %v11735_v3 }
 0x9c7   : > { %9723 = vmatmul.mubr.f32.vlgmr.msra.gmra.mrb[10].mxu0 %v4426_v30  ;;  %v6026_v30 = vand.u32 4294901760, %v5997_v27 }
 0x9c8   : > { %11085 = vmatpush3.bf16.msra.mxu0 %v11084_v33  ;;  %9741 = vmatprep.mubr.msk.f32.mxu0 %vm11736_vm0, %v11737_v9  ;;  %v5992_v33 = vld [vmem:[%s13742_s2 + $0x108] sm:$0xff] }
 0x9c9   : > { %11086 = vmatprep.subr.bf16.mxu0 %v11735_v3  ;;  %v13480_v36 = vsub.f32 %v5997_v27, %v6026_v30 }
 0x9cc   : > { %11088 = vmatpush3.bf16.msra.mxu0 %v11087_v49  ;;  %v5993_v49 = vld [vmem:[%s13742_s2 + $0x110] sm:$0xff] }
 0x9cd   : > { %11089 = vmatprep.subr.bf16.mxu0 %v11735_v3  ;;  %v6014_v5 = vand.u32 4294901760, %v5993_v49 }
 0x9cf   : > { %v13468_v54 = vsub.f32 %v5993_v49, %v6014_v5 }
 0x9d0   : > { %11091 = vmatpush3.bf16.msra.mxu0 %v11090_v12  ;;  %v6008_v12 = vand.u32 4294901760, %v5991_v28 }
 0x9d1   : > { %11092 = vmatprep.subr.bf16.mxu0 %v11735_v3 }
 0x9d2   : > { %v13464_v25 = vsub.f32 %v5991_v28, %v6008_v12 }
 0x9d4   : > { %11094 = vmatpush3.bf16.msra.mxu0 %v11093_v32  ;;  %v6011_v32 = vand.u32 4294901760, %v5992_v33 }
 0x9d5   : > { %11095 = vmatprep.subr.bf16.mxu0 %v11735_v3 }
 0x9d6   : > { %v13462_v20 = vpack.c.bf16 %v6011_v32, %v6008_v12  ;;  %v13466_v24 = vsub.f32 %v5992_v33, %v6011_v32  ;;  %v6135_v32 = vand.u32 4294901760, %v13480_v36 }
 0x9d7   : > { %9742 = vmatmul.mubr.f32.vlgmr.msra.gmra.mrb[10].mxu0 %v4424_v63 }
 0x9d8   : > { %11097 = vmatpush3.bf16.msra.mxu0 %v13201_v47  ;;  %9760 = vmatprep.mubr.msk.f32.mxu0 %vm11736_vm0, %v11737_v9  ;;  %v6136_v21 = vsub.f32 %v13480_v36, %v6135_v32  ;;  %v11276_v27 = vpack.c.bf16 %v13466_v24, %v13464_v25 }
 0x9d9   : > { %11098 = vmatprep.subr.bf16.mxu0 %v11735_v3 }
 0x9dc   : > { %11100 = vmatpush3.bf16.msra.mxu0 %v13214_v19 }
 0x9dd   : > { %11101 = vmatprep.subr.bf16.mxu0 %v11735_v3 }
 0x9e0   : > { %11103 = vmatpush3.bf16.msra.mxu0 %v13224_v4 }
 0x9e1   : > { %11104 = vmatprep.subr.bf16.mxu0 %v11735_v3 }
 0x9e4   : > { %11106 = vmatpush3.bf16.msra.mxu0 %v13228_v48 }
 0x9e5   : > { %11179 = vmatprep.subr.bf16.mxu0 %v11735_v3 }
 0x9e7   : > { %9761 = vmatmul.mubr.f32.vlgmr.msra.gmra.mrb[10].mxu0 %v4424_v63  ;;  %v13475_v63 = vpack.c.bf16 %v6017_v0, %v6014_v5  ;;  %v6137_v0 = vand.u32 4294901760, %v6136_v21 }
 0x9e8   : > { %11181 = vmatpush3.bf16.msra.mxu0 %v12983_v39  ;;  %9893 = vmatprep.mubr.msk.f32.mxu0 %vm11736_vm0, %v11737_v9 }
 0x9e9   : > { %11182 = vmatprep.subr.bf16.mxu0 %v11735_v3 }
 0x9ec   : > { %11184 = vmatpush3.bf16.msra.mxu0 %v12996_v42 }
 0x9ed   : > { %11185 = vmatprep.subr.bf16.mxu0 %v11735_v3 }
 0x9f0   : > { %11187 = vmatpush3.bf16.msra.mxu0 %v13006_v50 }
 0x9f1   : > { %11188 = vmatprep.subr.bf16.mxu0 %v11735_v3 }
 0x9f4   : > { %11190 = vmatpush3.bf16.msra.mxu0 %v13016_v17 }
 0x9f5   : > { %11191 = vmatprep.subr.bf16.mxu0 %v11735_v3 }
 0xaba   : > { %v4884_v47 = vpop.f32.mrb[10].mxu0 }
 0xabb   : > { %v11472_v19 = vadd.f32 %v7741_v22, %v4884_v47  ;;  %v9762_v4 = vpop.f32.mrb[11].mxu0  ;;  %v13482_v22 = vsub.f32 %v5998_v59, %v6029_v51  ;;  %v13485_v47 = vpack.c.bf16 %v6023_v6, %v6020_v56  ;;  %v11279_v59 = vpack.c.bf16 %v13470_v1, %v13468_v54 }
 0xabc   : > { %v6093_v4 = vand.u32 4294901760, %v13464_v25 }
 0xabd   : > { %v4891_v48 = vsel %vm2691_vm2, %v11472_v19, 0  ;;  %v6142_v26 = vand.u32 4294901760, %v13482_v22 }
 0xabe   : > { %v4966_v55 = vand.u32 4294901760, %v4891_v48 }
 0xabf   : > { %v6143_v23 = vsub.f32 %v13482_v22, %v6142_v26 }
 0xac0   : > { %v4967_v8 = vsub.f32 %v4891_v48, %v4966_v55  ;;  %v6100_v48 = vand.u32 4294901760, %v13466_v24 }
 0xac1   : > { %v6144_v56 = vand.u32 4294901760, %v6143_v23 }
 0xac2   : > { %v4968_v46 = vand.u32 4294901760, %v4967_v8 }
 0xac3   : > { %v11273_v6 = vpack.c.bf16 %v6144_v56, %v6137_v0 }
 0xac4   : > { %v4969_v16 = vsub.f32 %v4967_v8, %v4968_v46 }
 0xac6   : > { %v4970_v44 = vand.u32 4294901760, %v4969_v16 }
 0xac8   : > { %9780 = vmatmul.mubr.f32.vlgmr.msra.gmra.mrb[6].mxu1 %v4970_v44  ;;  %v6107_v44 = vand.u32 4294901760, %v13468_v54 }
 0xac9   : > { %11121 = vmatpush3.bf16.msra.mxu1 %v13020_v61  ;;  %9798 = vmatprep.mubr.msk.f32.mxu1 %vm11736_vm0, %v11737_v9 }
 0xaca   : > { %11122 = vmatprep.subr.bf16.mxu1 %v11735_v3 }
 0xacd   : > { %11124 = vmatpush3.bf16.msra.mxu1 %v13024_v7 }
 0xace   : > { %11125 = vmatprep.subr.bf16.mxu1 %v11735_v3 }
 0xad1   : > { %11127 = vmatpush3.bf16.msra.mxu1 %v13028_v13 }
 0xad2   : > { %11128 = vmatprep.subr.bf16.mxu1 %v11735_v3 }
 0xad5   : > { %11130 = vmatpush3.bf16.msra.mxu1 %v13032_v37 }
 0xad6   : > { %11131 = vmatprep.subr.bf16.mxu1 %v11735_v3 }
 0xad8   : > { %9799 = vmatmul.mubr.f32.vlgmr.msra.gmra.mrb[6].mxu1 %v4966_v55 }
 0xad9   : > { %11133 = vmatpush3.bf16.msra.mxu1 %v13035_v40  ;;  %9817 = vmatprep.mubr.msk.f32.mxu1 %vm11736_vm0, %v11737_v9 }
 0xada   : > { %11134 = vmatprep.subr.bf16.mxu1 %v11735_v3 }
 0xadd   : > { %11136 = vmatpush3.bf16.msra.mxu1 %v13038_v41 }
 0xade   : > { %11137 = vmatprep.subr.bf16.mxu1 %v11735_v3 }
 0xae1   : > { %11139 = vmatpush3.bf16.msra.mxu1 %v13040_v43 }
 0xae2   : > { %11140 = vmatprep.subr.bf16.mxu1 %v11735_v3 }
 0xae5   : > { %11142 = vmatpush3.bf16.msra.mxu1 %v13042_v52 }
 0xae6   : > { %11143 = vmatprep.subr.bf16.mxu1 %v11735_v3 }
 0xae8   : > { %9818 = vmatmul.mubr.f32.vlgmr.msra.gmra.mrb[6].mxu1 %v4967_v8  ;;  %v6101_v8 = vsub.f32 %v13466_v24, %v6100_v48 }
 0xae9   : > { %11145 = vmatpush3.bf16.msra.mxu1 %v12983_v39  ;;  %9836 = vmatprep.mubr.msk.f32.mxu1 %vm11736_vm0, %v11737_v9 }
 0xaea   : > { %11146 = vmatprep.subr.bf16.mxu1 %v11735_v3  ;;  %v6102_v16 = vand.u32 4294901760, %v6101_v8 }
 0xaed   : > { %11148 = vmatpush3.bf16.msra.mxu1 %v12996_v42 }
 0xaee   : > { %11149 = vmatprep.subr.bf16.mxu1 %v11735_v3 }
 0xaf1   : > { %11151 = vmatpush3.bf16.msra.mxu1 %v13006_v50 }
 0xaf2   : > { %11152 = vmatprep.subr.bf16.mxu1 %v11735_v3 }
 0xaf5   : > { %11154 = vmatpush3.bf16.msra.mxu1 %v13016_v17 }
 0xaf6   : > { %11155 = vmatprep.subr.bf16.mxu1 %v11735_v3 }
 0xaf8   : > { %9837 = vmatmul.mubr.f32.vlgmr.msra.gmra.mrb[6].mxu1 %v4968_v46 }
 0xaf9   : > { %11157 = vmatpush3.bf16.msra.mxu1 %v13044_v62  ;;  %9855 = vmatprep.mubr.msk.f32.mxu1 %vm11736_vm0, %v11737_v9 }
 0xafa   : > { %11158 = vmatprep.subr.bf16.mxu1 %v11735_v3 }
 0xafd   : > { %11160 = vmatpush3.bf16.msra.mxu1 %v13046_v14 }
 0xafe   : > { %11161 = vmatprep.subr.bf16.mxu1 %v11735_v3 }
 0xb01   : > { %11163 = vmatpush3.bf16.msra.mxu1 %v13048_v18 }
 0xb02   : > { %11164 = vmatprep.subr.bf16.mxu1 %v11735_v3 }
 0xb05   : > { %11166 = vmatpush3.bf16.msra.mxu1 %v13050_v2 }
 0xb06   : > { %11167 = vmatprep.subr.bf16.mxu1 %v11735_v3 }
 0xb08   : > { %9856 = vmatmul.mubr.f32.vlgmr.msra.gmra.mrb[6].mxu1 %v4966_v55 }
 0xb09   : > { %11169 = vmatpush3.bf16.msra.mxu1 %v12983_v39  ;;  %9874 = vmatprep.mubr.msk.f32.mxu1 %vm11736_vm0, %v11737_v9 }
 0xb0a   : > { %11170 = vmatprep.subr.bf16.mxu1 %v11735_v3 }
 0xb0d   : > { %11172 = vmatpush3.bf16.msra.mxu1 %v12996_v42 }
 0xb0e   : > { %11173 = vmatprep.subr.bf16.mxu1 %v11735_v3 }
 0xb11   : > { %11175 = vmatpush3.bf16.msra.mxu1 %v13006_v50 }
 0xb12   : > { %11176 = vmatprep.subr.bf16.mxu1 %v11735_v3 }
 0xb15   : > { %11178 = vmatpush3.bf16.msra.mxu1 %v13016_v17 }
 0xb16   : > { %11251 = vmatprep.subr.bf16.mxu1 %v11735_v3 }
 0xb18   : > { %9875 = vmatmul.mubr.f32.vlgmr.msra.gmra.mrb[6].mxu1 %v4966_v55  ;;  %v6094_v55 = vsub.f32 %v13464_v25, %v6093_v4  ;;  %v7742_v25 = vld [vmem:[%s13742_s2 + $0x184] ss:$0 sm:$0xff] }
 0xb19   : > { %10007 = vmatprep.mubr.msk.f32.mxu1 %vm11736_vm0, %v11737_v9  ;;  %11253 = vmatpush3.bf16.msra.mxu1 %v13462_v20 }
 0xb1a   : > { %11254 = vmatprep.subr.bf16.mxu1 %v11735_v3  ;;  %v6095_v46 = vand.u32 4294901760, %v6094_v55  ;;  %v11300_v55 = vpack.c.bf16 %v6100_v48, %v6093_v4 }
 0xb1d   : > { %11256 = vmatpush3.bf16.msra.mxu1 %v13475_v63 }
 0xb1e   : > { %11257 = vmatprep.subr.bf16.mxu1 %v11735_v3 }
 0xb21   : > { %11259 = vmatpush3.bf16.msra.mxu1 %v13485_v47 }
 0xb22   : > { %11260 = vmatprep.subr.bf16.mxu1 %v11735_v3 }
 0xbeb   : > { %v5426_v34 = vpop.f32.mrb[6].mxu1 }
 0xbec   : > { %v13373_v45 = vsub.f32 %v11472_v19, %v5426_v34  ;;  %v9876_v35 = vpop.f32.mrb[7].mxu1  ;;  %v13489_v19 = vpack.c.bf16 %v6029_v51, %v6026_v30  ;;  %v6114_v34 = vand.u32 4294901760, %v13470_v1  ;;  %v11282_v30 = vpack.c.bf16 %v13477_v58, %v13472_v53 }
 0xbed   : > { %v11264_v35 = vpack.c.bf16 %v6102_v16, %v6095_v46  ;;  %v11285_v51 = vpack.c.bf16 %v13482_v22, %v13480_v36  ;;  %v11309_v16 = vpack.c.bf16 %v6142_v26, %v6135_v32 }
 0xbee   : > { %v5431_v57 = vmul.f32 %v13373_v45, %v13373_v45  ;;  %11262 = vmatpush3.bf16.msra.mxu1 %v13489_v19  ;;  %v11303_v8 = vpack.c.bf16 %v6114_v34, %v6107_v44 }
 0xbef   : > { %11263 = vmatprep.subr.bf16.mxu1 %v11735_v3 }
 0xbf0   : > { %v5433_v29 = vsel %vm2691_vm2, %v5431_v57, 0  ;;  %v6108_v57 = vsub.f32 %v13468_v54, %v6107_v44  ;;  %v7743_v54 = vld [vmem:[%s13742_s2 + $0x185] ss:$0 sm:$0xff] }
 0xbf1   : > { %v5508_v10 = vand.u32 4294901760, %v5433_v29 }
 0xbf3   : > { %v5509_v31 = vsub.f32 %v5433_v29, %v5508_v10  ;;  %v6115_v29 = vsub.f32 %v13470_v1, %v6114_v34 }
 0xbf5   : > { %v5510_v38 = vand.u32 4294901760, %v5509_v31 }
 0xbf7   : > { %v5511_v60 = vsub.f32 %v5509_v31, %v5510_v38 }
 0xbf9   : > { %v5512_v11 = vand.u32 4294901760, %v5511_v60  ;;  %v6128_v60 = vand.u32 4294901760, %v13477_v58 }
 0xbfb   : > { %9894 = vmatmul.mubr.f32.vlgmr.msra.gmra.mrb[12].mxu0 %v5512_v11  ;;  %v6129_v33 = vsub.f32 %v13477_v58, %v6128_v60 }
 0xbfc   : > { %11193 = vmatpush3.bf16.msra.mxu0 %v13020_v61  ;;  %9912 = vmatprep.mubr.msk.f32.mxu0 %vm11736_vm0, %v11737_v9 }
 0xbfd   : > { %11194 = vmatprep.subr.bf16.mxu0 %v11735_v3  ;;  %v6130_v12 = vand.u32 4294901760, %v6129_v33 }
 0xc00   : > { %11196 = vmatpush3.bf16.msra.mxu0 %v13024_v7 }
 0xc01   : > { %11197 = vmatprep.subr.bf16.mxu0 %v11735_v3 }
 0xc04   : > { %11199 = vmatpush3.bf16.msra.mxu0 %v13028_v13 }
 0xc05   : > { %11200 = vmatprep.subr.bf16.mxu0 %v11735_v3 }
 0xc08   : > { %11202 = vmatpush3.bf16.msra.mxu0 %v13032_v37 }
 0xc09   : > { %11203 = vmatprep.subr.bf16.mxu0 %v11735_v3 }
 0xc0b   : > { %9913 = vmatmul.mubr.f32.vlgmr.msra.gmra.mrb[12].mxu0 %v5508_v10 }
 0xc0c   : > { %11205 = vmatpush3.bf16.msra.mxu0 %v13035_v40  ;;  %9931 = vmatprep.mubr.msk.f32.mxu0 %vm11736_vm0, %v11737_v9 }
 0xc0d   : > { %11206 = vmatprep.subr.bf16.mxu0 %v11735_v3 }
 0xc10   : > { %11208 = vmatpush3.bf16.msra.mxu0 %v13038_v41 }
 0xc11   : > { %11209 = vmatprep.subr.bf16.mxu0 %v11735_v3 }
 0xc14   : > { %11211 = vmatpush3.bf16.msra.mxu0 %v13040_v43 }
 0xc15   : > { %11212 = vmatprep.subr.bf16.mxu0 %v11735_v3 }
 0xc18   : > { %11214 = vmatpush3.bf16.msra.mxu0 %v13042_v52 }
 0xc19   : > { %11215 = vmatprep.subr.bf16.mxu0 %v11735_v3 }
 0xc1b   : > { %9932 = vmatmul.mubr.f32.vlgmr.msra.gmra.mrb[12].mxu0 %v5509_v31  ;;  %v6116_v31 = vand.u32 4294901760, %v6115_v29 }
 0xc1c   : > { %11217 = vmatpush3.bf16.msra.mxu0 %v12983_v39  ;;  %9950 = vmatprep.mubr.msk.f32.mxu0 %vm11736_vm0, %v11737_v9 }
 0xc1d   : > { %11218 = vmatprep.subr.bf16.mxu0 %v11735_v3 }
 0xc20   : > { %11220 = vmatpush3.bf16.msra.mxu0 %v12996_v42 }
 0xc21   : > { %11221 = vmatprep.subr.bf16.mxu0 %v11735_v3 }
 0xc24   : > { %11223 = vmatpush3.bf16.msra.mxu0 %v13006_v50 }
 0xc25   : > { %11224 = vmatprep.subr.bf16.mxu0 %v11735_v3 }
 0xc28   : > { %11226 = vmatpush3.bf16.msra.mxu0 %v13016_v17 }
 0xc29   : > { %11227 = vmatprep.subr.bf16.mxu0 %v11735_v3 }
 0xc2b   : > { %9951 = vmatmul.mubr.f32.vlgmr.msra.gmra.mrb[12].mxu0 %v5510_v38  ;;  %v6121_v38 = vand.u32 4294901760, %v13472_v53 }
 0xc2c   : > { %11229 = vmatpush3.bf16.msra.mxu0 %v13044_v62  ;;  %9969 = vmatprep.mubr.msk.f32.mxu0 %vm11736_vm0, %v11737_v9 }
 0xc2d   : > { %11230 = vmatprep.subr.bf16.mxu0 %v11735_v3  ;;  %v6122_v28 = vsub.f32 %v13472_v53, %v6121_v38  ;;  %v11306_v46 = vpack.c.bf16 %v6128_v60, %v6121_v38 }
 0xc2f   : > { %v6123_v49 = vand.u32 4294901760, %v6122_v28 }
 0xc30   : > { %11232 = vmatpush3.bf16.msra.mxu0 %v13046_v14 }
 0xc31   : > { %11233 = vmatprep.subr.bf16.mxu0 %v11735_v3  ;;  %v11270_v5 = vpack.c.bf16 %v6130_v12, %v6123_v49 }
 0xc34   : > { %11235 = vmatpush3.bf16.msra.mxu0 %v13048_v18 }
 0xc35   : > { %11236 = vmatprep.subr.bf16.mxu0 %v11735_v3 }
 0xc38   : > { %11238 = vmatpush3.bf16.msra.mxu0 %v13050_v2 }
 0xc39   : > { %11239 = vmatprep.subr.bf16.mxu0 %v11735_v3 }
 0xc3b   : > { %9970 = vmatmul.mubr.f32.vlgmr.msra.gmra.mrb[12].mxu0 %v5508_v10 }
 0xc3c   : > { %11241 = vmatpush3.bf16.msra.mxu0 %v12983_v39  ;;  %9988 = vmatprep.mubr.msk.f32.mxu0 %vm11736_vm0, %v11737_v9 }
 0xc3d   : > { %11242 = vmatprep.subr.bf16.mxu0 %v11735_v3 }
 0xc40   : > { %11244 = vmatpush3.bf16.msra.mxu0 %v12996_v42 }
 0xc41   : > { %11245 = vmatprep.subr.bf16.mxu0 %v11735_v3 }
 0xc44   : > { %11247 = vmatpush3.bf16.msra.mxu0 %v13006_v50 }
 0xc45   : > { %11248 = vmatprep.subr.bf16.mxu0 %v11735_v3 }
 0xc48   : > { %11250 = vmatpush3.bf16.msra.mxu0 %v13016_v17 }
 0xc49   : > { %11323 = vmatprep.subr.bf16.mxu0 %v11735_v3 }
 0xc4b   : > { %9989 = vmatmul.mubr.f32.vlgmr.msra.gmra.mrb[12].mxu0 %v5508_v10  ;;  %v6109_v10 = vand.u32 4294901760, %v6108_v57 }
 0xc4c   : > { %11325 = vmatpush3.bf16.msra.mxu0 %v12983_v39  ;;  %10121 = vmatprep.mubr.msk.f32.mxu0 %vm11736_vm0, %v11737_v9 }
 0xc4d   : > { %11326 = vmatprep.subr.bf16.mxu0 %v11735_v3  ;;  %v11267_v11 = vpack.c.bf16 %v6116_v31, %v6109_v10 }
 0xc50   : > { %11328 = vmatpush3.bf16.msra.mxu0 %v12996_v42 }
 0xc51   : > { %11329 = vmatprep.subr.bf16.mxu0 %v11735_v3 }
 0xc54   : > { %11331 = vmatpush3.bf16.msra.mxu0 %v13006_v50 }
 0xc55   : > { %11332 = vmatprep.subr.bf16.mxu0 %v11735_v3 }
 0xc58   : > { %11334 = vmatpush3.bf16.msra.mxu0 %v13016_v17 }
 0xc59   : > { %11335 = vmatprep.subr.bf16.mxu0 %v11735_v3 }
 0xd1e   : > { %v5968_v57 = vpop.f32.mrb[12].mxu0 }
 0xd1f   : > { %v11473_v29 = vadd.f32 1e-05, %v5968_v57  ;;  %v9990_v10 = vpop.f32.mrb[13].mxu0 }
 0xd21   : > { %11659 = vrsqrt.f32 %v11473_v29 }
 0xd2b   : > { %v11660_v31 = vpop.eup %11659 }
 0xd2c   : > { %v5973_v24 = vmul.f32 %v11660_v31, %v13373_v45 }
 0xd2e   : > { %v5978_v1 = vmul.f32 %v7742_v25, %v5973_v24 }
 0xd30   : > { %v5983_v53 = vadd.f32 %v7743_v54, %v5978_v1 }
 0xd32   : > { %v13526_v58 = vadd.f32 %v5983_v53, %v13265_v15  ;;  %v7745_v15 = vld [vmem:[%s13742_s2 + $0x186] ss:$0 sm:$0xff] }
 0xd34   : > { %v7744_v36 = vmul.f32 -1.442695, %v13526_v58 }
 0xd36   : > { %11661 = vpow2.f32 %v7744_v36 }
 0xd40   : > { %v11662_v22 = vpop.eup %11661 }
 0xd41   : > { %v5988_v4 = vadd.f32 1.0, %v11662_v22 }
 0xd43   : > { %11663 = vrcp.f32 %v5988_v4 }
 0xd4d   : > { %v11664_v48 = vpop.eup %11663 }
 0xd4e   : > { %v6005_v44 = vsel %vm2691_vm2, %v11664_v48, 0 }
 0xd4f   : > { %v6080_v34 = vand.u32 4294901760, %v6005_v44 }
 0xd51   : > { %v6081_v45 = vsub.f32 %v6005_v44, %v6080_v34 }
 0xd53   : > { %v6082_v38 = vand.u32 4294901760, %v6081_v45 }
 0xd55   : > { %v6083_v60 = vsub.f32 %v6081_v45, %v6082_v38 }
 0xd57   : > { %v6084_v28 = vand.u32 4294901760, %v6083_v60 }
 0xd59   : > { %10008 = vmatmul.mubr.f32.vlgmr.msra.gmra.mrb[8].mxu1 %v6084_v28 }
 0xd5a   : > { %11265 = vmatpush3.bf16.msra.mxu1 %v11264_v35  ;;  %10026 = vmatprep.mubr.msk.f32.mxu1 %vm11736_vm0, %v11737_v9 }
 0xd5b   : > { %11266 = vmatprep.subr.bf16.mxu1 %v11735_v3 }
 0xd5e   : > { %11268 = vmatpush3.bf16.msra.mxu1 %v11267_v11 }
 0xd5f   : > { %11269 = vmatprep.subr.bf16.mxu1 %v11735_v3 }
 0xd62   : > { %11271 = vmatpush3.bf16.msra.mxu1 %v11270_v5 }
 0xd63   : > { %11272 = vmatprep.subr.bf16.mxu1 %v11735_v3 }
 0xd66   : > { %11274 = vmatpush3.bf16.msra.mxu1 %v11273_v6 }
 0xd67   : > { %11275 = vmatprep.subr.bf16.mxu1 %v11735_v3 }
 0xd69   : > { %10027 = vmatmul.mubr.f32.vlgmr.msra.gmra.mrb[8].mxu1 %v6080_v34 }
 0xd6a   : > { %11277 = vmatpush3.bf16.msra.mxu1 %v11276_v27  ;;  %10045 = vmatprep.mubr.msk.f32.mxu1 %vm11736_vm0, %v11737_v9 }
 0xd6b   : > { %11278 = vmatprep.subr.bf16.mxu1 %v11735_v3 }
 0xd6e   : > { %11280 = vmatpush3.bf16.msra.mxu1 %v11279_v59 }
 0xd6f   : > { %11281 = vmatprep.subr.bf16.mxu1 %v11735_v3 }
 0xd72   : > { %11283 = vmatpush3.bf16.msra.mxu1 %v11282_v30 }
 0xd73   : > { %11284 = vmatprep.subr.bf16.mxu1 %v11735_v3 }
 0xd76   : > { %11286 = vmatpush3.bf16.msra.mxu1 %v11285_v51 }
 0xd77   : > { %11287 = vmatprep.subr.bf16.mxu1 %v11735_v3 }
 0xd79   : > { %10046 = vmatmul.mubr.f32.vlgmr.msra.gmra.mrb[8].mxu1 %v6081_v45 }
 0xd7a   : > { %11289 = vmatpush3.bf16.msra.mxu1 %v13462_v20  ;;  %10064 = vmatprep.mubr.msk.f32.mxu1 %vm11736_vm0, %v11737_v9 }
 0xd7b   : > { %11290 = vmatprep.subr.bf16.mxu1 %v11735_v3 }
 0xd7e   : > { %11292 = vmatpush3.bf16.msra.mxu1 %v13475_v63 }
 0xd7f   : > { %11293 = vmatprep.subr.bf16.mxu1 %v11735_v3 }
 0xd82   : > { %11295 = vmatpush3.bf16.msra.mxu1 %v13485_v47 }
 0xd83   : > { %11296 = vmatprep.subr.bf16.mxu1 %v11735_v3 }
 0xd86   : > { %11298 = vmatpush3.bf16.msra.mxu1 %v13489_v19 }
 0xd87   : > { %11299 = vmatprep.subr.bf16.mxu1 %v11735_v3 }
 0xd89   : > { %10065 = vmatmul.mubr.f32.vlgmr.msra.gmra.mrb[8].mxu1 %v6082_v38 }
 0xd8a   : > { %11301 = vmatpush3.bf16.msra.mxu1 %v11300_v55  ;;  %10083 = vmatprep.mubr.msk.f32.mxu1 %vm11736_vm0, %v11737_v9 }
 0xd8b   : > { %11302 = vmatprep.subr.bf16.mxu1 %v11735_v3 }
 0xd8e   : > { %11304 = vmatpush3.bf16.msra.mxu1 %v11303_v8 }
 0xd8f   : > { %11305 = vmatprep.subr.bf16.mxu1 %v11735_v3 }
 0xd92   : > { %11307 = vmatpush3.bf16.msra.mxu1 %v11306_v46 }
 0xd93   : > { %11308 = vmatprep.subr.bf16.mxu1 %v11735_v3 }
 0xd96   : > { %11310 = vmatpush3.bf16.msra.mxu1 %v11309_v16 }
 0xd97   : > { %11311 = vmatprep.subr.bf16.mxu1 %v11735_v3 }
 0xd99   : > { %10084 = vmatmul.mubr.f32.vlgmr.msra.gmra.mrb[8].mxu1 %v6080_v34 }
 0xd9a   : > { %11313 = vmatpush3.bf16.msra.mxu1 %v13462_v20  ;;  %10102 = vmatprep.mubr.msk.f32.mxu1 %vm11736_vm0, %v11737_v9 }
 0xd9b   : > { %11314 = vmatprep.subr.bf16.mxu1 %v11735_v3 }
 0xd9e   : > { %11316 = vmatpush3.bf16.msra.mxu1 %v13475_v63 }
 0xd9f   : > { %11317 = vmatprep.subr.bf16.mxu1 %v11735_v3 }
 0xda2   : > { %11319 = vmatpush3.bf16.msra.mxu1 %v13485_v47 }
 0xda3   : > { %11320 = vmatprep.subr.bf16.mxu1 %v11735_v3 }
 0xda6   : > { %11322 = vmatpush3.bf16.msra.mxu1 %v13489_v19 }
 0xda7   : > { %11395 = vmatprep.subr.bf16.mxu1 %v11735_v3 }
 0xda9   : > { %10103 = vmatmul.mubr.f32.vlgmr.msra.gmra.mrb[8].mxu1 %v6080_v34 }
 0xdaa   : > { %11397 = vmatpush3.bf16.msra.mxu1 %v12983_v39  ;;  %10235 = vmatprep.mubr.msk.f32.mxu1 %vm11736_vm0, %v11737_v9 }
 0xdab   : > { %11398 = vmatprep.subr.bf16.mxu1 %v11735_v3 }
 0xdae   : > { %11400 = vmatpush3.bf16.msra.mxu1 %v12996_v42 }
 0xdaf   : > { %11401 = vmatprep.subr.bf16.mxu1 %v11735_v3 }
 0xdb2   : > { %11403 = vmatpush3.bf16.msra.mxu1 %v13006_v50 }
 0xdb3   : > { %11404 = vmatprep.subr.bf16.mxu1 %v11735_v3 }
 0xdb6   : > { %11406 = vmatpush3.bf16.msra.mxu1 %v13016_v17 }
 0xdb7   : > { %11407 = vmatprep.subr.bf16.mxu1 %v11735_v3 }
 0xe7c   : > { %v6540_v20 = vpop.f32.mrb[8].mxu1 }
 0xe7d   : > { %v11474_v63 = vadd.f32 %v7745_v15, %v6540_v20  ;;  %v10104_v47 = vpop.f32.mrb[9].mxu1 }
 0xe7f   : > { %v6547_v19 = vsel %vm2691_vm2, %v11474_v63, 0 }
 0xe80   : > { %v6622_v35 = vand.u32 4294901760, %v6547_v19 }
 0xe82   : > { %v6623_v11 = vsub.f32 %v6547_v19, %v6622_v35 }
 0xe84   : > { %v6624_v33 = vand.u32 4294901760, %v6623_v11 }
 0xe86   : > { %v6625_v49 = vsub.f32 %v6623_v11, %v6624_v33 }
 0xe88   : > { %v6626_v12 = vand.u32 4294901760, %v6625_v49 }
 0xe8a   : > { %10122 = vmatmul.mubr.f32.vlgmr.msra.gmra.mrb[14].mxu0 %v6626_v12 }
 0xe8b   : > { %11337 = vmatpush3.bf16.msra.mxu0 %v13020_v61  ;;  %10140 = vmatprep.mubr.msk.f32.mxu0 %vm11736_vm0, %v11737_v9 }
 0xe8c   : > { %11338 = vmatprep.subr.bf16.mxu0 %v11735_v3 }
 0xe8f   : > { %11340 = vmatpush3.bf16.msra.mxu0 %v13024_v7 }
 0xe90   : > { %11341 = vmatprep.subr.bf16.mxu0 %v11735_v3 }
 0xe93   : > { %11343 = vmatpush3.bf16.msra.mxu0 %v13028_v13 }
 0xe94   : > { %11344 = vmatprep.subr.bf16.mxu0 %v11735_v3 }
 0xe97   : > { %11346 = vmatpush3.bf16.msra.mxu0 %v13032_v37 }
 0xe98   : > { %11347 = vmatprep.subr.bf16.mxu0 %v11735_v3 }
 0xe9a   : > { %10141 = vmatmul.mubr.f32.vlgmr.msra.gmra.mrb[14].mxu0 %v6622_v35 }
 0xe9b   : > { %11349 = vmatpush3.bf16.msra.mxu0 %v13035_v40  ;;  %10159 = vmatprep.mubr.msk.f32.mxu0 %vm11736_vm0, %v11737_v9 }
 0xe9c   : > { %11350 = vmatprep.subr.bf16.mxu0 %v11735_v3 }
 0xe9f   : > { %11352 = vmatpush3.bf16.msra.mxu0 %v13038_v41 }
 0xea0   : > { %11353 = vmatprep.subr.bf16.mxu0 %v11735_v3 }
 0xea3   : > { %11355 = vmatpush3.bf16.msra.mxu0 %v13040_v43 }
 0xea4   : > { %11356 = vmatprep.subr.bf16.mxu0 %v11735_v3 }
 0xea7   : > { %11358 = vmatpush3.bf16.msra.mxu0 %v13042_v52 }
 0xea8   : > { %11359 = vmatprep.subr.bf16.mxu0 %v11735_v3 }
 0xeaa   : > { %10160 = vmatmul.mubr.f32.vlgmr.msra.gmra.mrb[14].mxu0 %v6623_v11 }
 0xeab   : > { %11361 = vmatpush3.bf16.msra.mxu0 %v12983_v39  ;;  %10178 = vmatprep.mubr.msk.f32.mxu0 %vm11736_vm0, %v11737_v9 }
 0xeac   : > { %11362 = vmatprep.subr.bf16.mxu0 %v11735_v3 }
 0xeaf   : > { %11364 = vmatpush3.bf16.msra.mxu0 %v12996_v42 }
 0xeb0   : > { %11365 = vmatprep.subr.bf16.mxu0 %v11735_v3 }
 0xeb3   : > { %11367 = vmatpush3.bf16.msra.mxu0 %v13006_v50 }
 0xeb4   : > { %11368 = vmatprep.subr.bf16.mxu0 %v11735_v3 }
 0xeb7   : > { %11370 = vmatpush3.bf16.msra.mxu0 %v13016_v17 }
 0xeb8   : > { %11371 = vmatprep.subr.bf16.mxu0 %v11735_v3 }
 0xeba   : > { %10179 = vmatmul.mubr.f32.vlgmr.msra.gmra.mrb[14].mxu0 %v6624_v33 }
 0xebb   : > { %11373 = vmatpush3.bf16.msra.mxu0 %v13044_v62  ;;  %10197 = vmatprep.mubr.msk.f32.mxu0 %vm11736_vm0, %v11737_v9 }
 0xebc   : > { %11374 = vmatprep.subr.bf16.mxu0 %v11735_v3 }
 0xebf   : > { %11376 = vmatpush3.bf16.msra.mxu0 %v13046_v14 }
 0xec0   : > { %11377 = vmatprep.subr.bf16.mxu0 %v11735_v3 }
 0xec3   : > { %11379 = vmatpush3.bf16.msra.mxu0 %v13048_v18 }
 0xec4   : > { %11380 = vmatprep.subr.bf16.mxu0 %v11735_v3 }
 0xec7   : > { %11382 = vmatpush3.bf16.msra.mxu0 %v13050_v2 }
 0xec8   : > { %11383 = vmatprep.subr.bf16.mxu0 %v11735_v3 }
 0xeca   : > { %10198 = vmatmul.mubr.f32.vlgmr.msra.gmra.mrb[14].mxu0 %v6622_v35 }
 0xecb   : > { %11385 = vmatpush3.bf16.msra.mxu0 %v12983_v39  ;;  %10216 = vmatprep.mubr.msk.f32.mxu0 %vm11736_vm0, %v11737_v9 }
 0xecc   : > { %11386 = vmatprep.subr.bf16.mxu0 %v11735_v3 }
 0xecf   : > { %11388 = vmatpush3.bf16.msra.mxu0 %v12996_v42 }
 0xed0   : > { %11389 = vmatprep.subr.bf16.mxu0 %v11735_v3 }
 0xed3   : > { %11391 = vmatpush3.bf16.msra.mxu0 %v13006_v50 }
 0xed4   : > { %11392 = vmatprep.subr.bf16.mxu0 %v11735_v3 }
 0xed7   : > { %11394 = vmatpush3.bf16.msra.mxu0 %v13016_v17 }
 0xeda   : > { %10217 = vmatmul.mubr.f32.vlgmr.msra.gmra.mrb[14].mxu0 %v6622_v35 }
 0xfad   : > { %v7082_v32 = vpop.f32.mrb[14].mxu0 }
 0xfae   : > { %v13631_v26 = vsub.f32 %v11474_v63, %v7082_v32  ;;  %v10218_v5 = vpop.f32.mrb[15].mxu0 }
 0xfb0   : > { %v7087_v21 = vmul.f32 %v13631_v26, %v13631_v26 }
 0xfb2   : > { %v7089_v23 = vsel %vm2691_vm2, %v7087_v21, 0 }
 0xfb3   : > { %v7164_v0 = vand.u32 4294901760, %v7089_v23 }
 0xfb5   : > { %v7165_v56 = vsub.f32 %v7089_v23, %v7164_v0 }
 0xfb7   : > { %v7166_v6 = vand.u32 4294901760, %v7165_v56 }
 0xfb9   : > { %v7167_v27 = vsub.f32 %v7165_v56, %v7166_v6 }
 0xfbb   : > { %v7168_v59 = vand.u32 4294901760, %v7167_v27 }
 0xfbd   : > { %10236 = vmatmul.mubr.f32.vlgmr.msra.gmra.mrb[10].mxu1 %v7168_v59 }
 0xfbe   : > { %11409 = vmatpush3.bf16.msra.mxu1 %v13020_v61  ;;  %10254 = vmatprep.mubr.msk.f32.mxu1 %vm11736_vm0, %v11737_v9 }
 0xfbf   : > { %11410 = vmatprep.subr.bf16.mxu1 %v11735_v3 }
 0xfc2   : > { %11412 = vmatpush3.bf16.msra.mxu1 %v13024_v7 }
 0xfc3   : > { %11413 = vmatprep.subr.bf16.mxu1 %v11735_v3 }
 0xfc6   : > { %11415 = vmatpush3.bf16.msra.mxu1 %v13028_v13 }
 0xfc7   : > { %11416 = vmatprep.subr.bf16.mxu1 %v11735_v3 }
 0xfca   : > { %11418 = vmatpush3.bf16.msra.mxu1 %v13032_v37 }
 0xfcb   : > { %11419 = vmatprep.subr.bf16.mxu1 %v11735_v3 }
 0xfcd   : > { %10255 = vmatmul.mubr.f32.vlgmr.msra.gmra.mrb[10].mxu1 %v7164_v0 }
 0xfce   : > { %11421 = vmatpush3.bf16.msra.mxu1 %v13035_v40  ;;  %10273 = vmatprep.mubr.msk.f32.mxu1 %vm11736_vm0, %v11737_v9 }
 0xfcf   : > { %11422 = vmatprep.subr.bf16.mxu1 %v11735_v3 }
 0xfd2   : > { %11424 = vmatpush3.bf16.msra.mxu1 %v13038_v41 }
 0xfd3   : > { %11425 = vmatprep.subr.bf16.mxu1 %v11735_v3 }
 0xfd6   : > { %11427 = vmatpush3.bf16.msra.mxu1 %v13040_v43 }
 0xfd7   : > { %11428 = vmatprep.subr.bf16.mxu1 %v11735_v3 }
 0xfda   : > { %11430 = vmatpush3.bf16.msra.mxu1 %v13042_v52 }
 0xfdb   : > { %11431 = vmatprep.subr.bf16.mxu1 %v11735_v3 }
 0xfdd   : > { %10274 = vmatmul.mubr.f32.vlgmr.msra.gmra.mrb[10].mxu1 %v7165_v56 }
 0xfde   : > { %11433 = vmatpush3.bf16.msra.mxu1 %v12983_v39  ;;  %10292 = vmatprep.mubr.msk.f32.mxu1 %vm11736_vm0, %v11737_v9 }
 0xfdf   : > { %11434 = vmatprep.subr.bf16.mxu1 %v11735_v3 }
 0xfe2   : > { %11436 = vmatpush3.bf16.msra.mxu1 %v12996_v42 }
 0xfe3   : > { %11437 = vmatprep.subr.bf16.mxu1 %v11735_v3 }
 0xfe6   : > { %11439 = vmatpush3.bf16.msra.mxu1 %v13006_v50 }
 0xfe7   : > { %11440 = vmatprep.subr.bf16.mxu1 %v11735_v3 }
 0xfea   : > { %11442 = vmatpush3.bf16.msra.mxu1 %v13016_v17 }
 0xfeb   : > { %11443 = vmatprep.subr.bf16.mxu1 %v11735_v3 }
 0xfed   : > { %10293 = vmatmul.mubr.f32.vlgmr.msra.gmra.mrb[10].mxu1 %v7166_v6 }
 0xfee   : > { %11445 = vmatpush3.bf16.msra.mxu1 %v13044_v62  ;;  %10311 = vmatprep.mubr.msk.f32.mxu1 %vm11736_vm0, %v11737_v9 }
 0xfef   : > { %11446 = vmatprep.subr.bf16.mxu1 %v11735_v3 }
 0xff2   : > { %11448 = vmatpush3.bf16.msra.mxu1 %v13046_v14 }
 0xff3   : > { %11449 = vmatprep.subr.bf16.mxu1 %v11735_v3 }
 0xff6   : > { %11451 = vmatpush3.bf16.msra.mxu1 %v13048_v18 }
 0xff7   : > { %11452 = vmatprep.subr.bf16.mxu1 %v11735_v3 }
 0xffa   : > { %11454 = vmatpush3.bf16.msra.mxu1 %v13050_v2 }
 0xffb   : > { %11455 = vmatprep.subr.bf16.mxu1 %v11735_v3 }
 0xffd   : > { %10312 = vmatmul.mubr.f32.vlgmr.msra.gmra.mrb[10].mxu1 %v7164_v0 }
 0xffe   : > { %11457 = vmatpush3.bf16.msra.mxu1 %v12983_v39  ;;  %10330 = vmatprep.mubr.msk.f32.mxu1 %vm11736_vm0, %v11737_v9  ;;  %v7746_v9 = vld [vmem:[%s13742_s2 + $0x187] ss:$0 sm:$0xff] }
 0xfff   : > { %11458 = vmatprep.subr.bf16.mxu1 %v11735_v3 }
0x1002   : > { %11460 = vmatpush3.bf16.msra.mxu1 %v12996_v42 }
0x1003   : > { %11461 = vmatprep.subr.bf16.mxu1 %v11735_v3 }
0x1006   : > { %11463 = vmatpush3.bf16.msra.mxu1 %v13006_v50 }
0x1007   : > { %11464 = vmatprep.subr.bf16.mxu1 %v11735_v3  ;;  %v7747_v3 = vld [vmem:[%s13742_s2 + $0x188] ss:$0 sm:$0xff] }
0x100a   : > { %11466 = vmatpush3.bf16.msra.mxu1 %v13016_v17 }
0x100d   : > { %10331 = vmatmul.mubr.f32.vlgmr.msra.gmra.mrb[10].mxu1 %v7164_v0 }
0x10e0   : > { %v7624_v61 = vpop.f32.mrb[10].mxu1 }
0x10e1   : > { %v11475_v7 = vadd.f32 1e-05, %v7624_v61  ;;  %v10332_v13 = vpop.f32.mrb[11].mxu1 }
0x10e3   : > { %11665 = vrsqrt.f32 %v11475_v7 }
0x10ed   : > { %v11666_v39 = vpop.eup %11665 }
0x10ee   : > { %v7629_v42 = vmul.f32 %v11666_v39, %v13631_v26 }
0x10f0   : > { %v7634_v50 = vmul.f32 %v7746_v9, %v7629_v42 }
0x10f2   : > { %v7639_v17 = vadd.f32 %v7747_v3, %v7634_v50 }
0x10f4   : > { %v7640_v37 = vadd.f32 %v7639_v17, %v13526_v58 }
0x10f6   : > { %v7748_v40 = vmul.f32 -1.442695, %v7640_v37 }
0x10f8   : > { %11667 = vpow2.f32 %v7748_v40 }
0x1102   : > { %v11668_v41 = vpop.eup %11667 }
0x1103   : > { %v7644_v43 = vadd.f32 1.0, %v11668_v41 }
0x1105   : > { %11669 = vrcp.f32 %v7644_v43 }
0x110f   : > { %v11670_v52 = vpop.eup %11669 }
0x1110   : > { %7648 = vrot.lane.b32.xlu0 %v11670_v52, %s11738_s4 }
0x1182   : > { %v7649_v62 = vpop.permute.xlu0 %7648 }
0x1183   : > { %v7651_v14 = vsub.f32 %v11670_v52, %v7649_v62 }
0x1185   : > { %7653 = vst.msk [vmem:[%s161_s8] sm:$0xff] %vm7652_vm3, %v7651_v14 }
0x1186   : > { %11684 = shalt.err (!%p11681_p3)
}
0x1187   : > { %s11685_s26 = scalar_lea.hbm %s13698_s17, 128  ;;  %s11689_s29 = scalar_lea.hbm %s13743_s3, 256 }
0x1188   : > { %p11686_p4 = scmp.ne.s32.totalorder %s13698_s17, %s11685_s26  ;;  %p11690_p9 = scmp.lt.u32.totalorder %s13698_s17, %s13743_s3 }
0x1189   : > { %p11691_p10 = scmp.lt.u32.totalorder %s11689_s29, %s11685_s26  ;;  %p11693_p12 = scmp.lt.u32.totalorder %s11685_s26, %s13698_s17 }
0x118a   : > { %p11687_p7 = pnand %p11686_p4, %p11798_p5 }
0x118b   : > { %p11692_p11 = por %p11691_p10, %p11690_p9 }
0x118c   : > { %p11688_p8 = pneg %p11687_p7 }
0x118d   : > { %p11694_p13 = por %p11693_p12, %p11692_p11 }
0x118f   : > { %p11695_p0 = pnand %p11694_p13, %p11688_p8 }
0x1191   : > { %11698 = shalt.err (!%p11695_p0)
}
0x1192   : > { %11604 = dma.vmem_to_hbm [thread:$0]  (%p11798_p5), %s13700_s9, 128, %s13698_s17, %s7655_s19  }
0x1193 PF: > { %p11610_p1 = scmp.ge.s32.totalorder %s11733_s15, 2  ;;  %s7680_s5 = sand.u32 1, %s11721_s12  }
0x1194   : > { %s7681_s6 = scalar_lea.sflag [#allocation3], %s7680_s5 }
0x1195   : > { %p11607_p2 = pnand %p11610_p1, %p11802_p6 }
0x1197   : > { %11716 = dma.done.wait (!%p11607_p2), %s7681_s6, 128  }
0x1198   : > { %11718 = vsyncadd (!%p11607_p2), %s7681_s6, 4294967168  ;;  %p13_p3 = scmp.ge.s32.totalorder %s11785_s18, 4   ;;  %s13760_s12 = smov %s11725_s13 }
0x1199   : > { %s13761_s13 = smov %s11729_s14  ;;  %s13762_s14 = smov %s11796_s21 }
0x119a   : > { %s13763_s15 = smov %s11785_s18  ;;  %15 = sbr.rel (!%p13_p3) target bundleno = 3 (0x3), region = 67 }
0x11a1   :  { %7686 = vsyncpa [#allocation3], 1 }
0x11a2   :  { %7688 = vsyncpa [#allocation3 + $0x1], 1 }

</bundles_post_ra>
